<compile_context>
chip_gen: v5e
topology: v5e:2x2
jax: 0.10.0
libtpu: 0.0.40
codegen_flags: <defaults>
</compile_context>

<pallas_src>
import functools

import jax
import jax.numpy as jnp
from jax.experimental import pallas as pl
from jax.experimental.pallas import tpu as pltpu

# ------------------------- model hyper-parameters ------------------------- #
BATCH = 2
IN_CH = 3
IMG = 16
PATCH = 8
WIDTH = 32
HEADS = 4
LAYERS = 2
OUT_DIM = 16
OUT_PAD = 128          # lane-dense output slab; wrapper slices back to OUT_DIM
LN_EPS = 1e-5


# ------------------------------ Pallas kernel ------------------------------ #
def _full_spec(shape):
    nd = len(shape)
    return pl.BlockSpec(shape, lambda *_: (0,) * nd)


def _layer_norm(x, g, b):
    mu = jnp.mean(x, axis=-1, keepdims=True)
    var = jnp.mean(jnp.square(x - mu), axis=-1, keepdims=True)
    return (x - mu) * jax.lax.rsqrt(var + LN_EPS) * g + b


def _clip_encoder_kernel(
    patches_ref,                     # (B*Tp, C*P*P)  bf16 (CLS/pad rows zero)
    patch_w_ref,                     # (C*P*P, W)     bf16
    pos_ref,                         # (B*Tp, W)      f32  (CLS folded in row 0)
    att_bias_ref,                    # (B, Tp, Tp)    f32  (0 / -1e30 key mask)
    ln_pre_g_ref, ln_pre_b_ref,      # (1, W)
    ln1_g_ref, ln1_b_ref,            # (L, 1, W)
    w_q_ref, w_k_ref, w_v_ref,       # (L, H, W, dh)  bf16 (scale folded into q)
    b_q_ref, b_k_ref, b_v_ref,       # (L, H, 1, dh)  f32
    w_out_ref, b_out_ref,            # (L, W, W) bf16, (L, 1, W) f32
    ln2_g_ref, ln2_b_ref,            # (L, 1, W)
    w_fc_ref, b_fc_ref,              # (L, W, 4W) bf16, (L, 1, 4W) f32
    w_proj_ref, b_proj_ref,          # (L, 4W, W) bf16, (L, 1, W) f32
    ln_post_g_ref, ln_post_b_ref,    # (1, W)
    proj_ref,                        # (W, OUT_PAD)   bf16 (zero-padded lanes)
    out_ref,                         # (B, OUT_PAD)   f32
    *, batch, t_pad, heads,
):
    width = w_out_ref.shape[-1]
    layers = w_out_ref.shape[0]
    head_dim = width // heads
    bt = batch * t_pad

    # ---- patch embedding (conv1 as one full-tile matmul, no bias) ----
    # Rows are already laid out (B, Tp): CLS/pad rows are zero in the patch
    # matrix, and pos_ref carries CLS + positional with zero pad rows.
    x = jnp.dot(patches_ref[...], patch_w_ref[...],
                preferred_element_type=jnp.float32)            # (BT, W) f32
    x = x + pos_ref[...]

    # ---- ln_pre ----
    x = _layer_norm(x, ln_pre_g_ref[...], ln_pre_b_ref[...])

    att_bias = att_bias_ref[...]                               # (B, Tp, Tp)

    for l in range(layers):
        # --- residual attention block: x = x + out_proj(MHSA(ln_1(x))) ---
        h = _layer_norm(x, ln1_g_ref[l], ln1_b_ref[l]).astype(jnp.bfloat16)
        head_outs = []
        for hd in range(heads):
            # per-head q/k/v straight from matmuls (no activation lane slices);
            # 1/sqrt(head_dim) was folded into w_q / b_q at trace time.
            q = (jnp.dot(h, w_q_ref[l, hd], preferred_element_type=jnp.float32)
                 + b_q_ref[l, hd]).reshape(batch, t_pad, head_dim)
            k = (jnp.dot(h, w_k_ref[l, hd], preferred_element_type=jnp.float32)
                 + b_k_ref[l, hd]).reshape(batch, t_pad, head_dim)
            v = (jnp.dot(h, w_v_ref[l, hd], preferred_element_type=jnp.float32)
                 + b_v_ref[l, hd]).reshape(batch, t_pad, head_dim)
            s = jnp.einsum("btd,bsd->bts", q.astype(jnp.bfloat16),
                           k.astype(jnp.bfloat16),
                           preferred_element_type=jnp.float32)  # (B, Tp, Tp)
            s = s + att_bias                       # mask padded key tokens
            s = s - jnp.max(s, axis=-1, keepdims=True)
            p = jnp.exp(s)
            p = p * pl.reciprocal(jnp.sum(p, axis=-1, keepdims=True),
                                  approx=True)
            o = jnp.einsum("bts,bsd->btd", p.astype(jnp.bfloat16),
                           v.astype(jnp.bfloat16),
                           preferred_element_type=jnp.float32)  # (B, Tp, dh)
            head_outs.append(o.reshape(bt, head_dim))
        # concat heads back to (BT, W); single output projection matmul.
        y = jnp.concatenate(head_outs, axis=-1).astype(jnp.bfloat16)
        y = jnp.dot(y, w_out_ref[l],
                    preferred_element_type=jnp.float32) + b_out_ref[l]
        x = x + y                                   # residual stays in vregs

        # --- MLP block: x = x + c_proj(QuickGELU(c_fc(ln_2(x)))) ---
        h = _layer_norm(x, ln2_g_ref[l], ln2_b_ref[l]).astype(jnp.bfloat16)
        u = jnp.dot(h, w_fc_ref[l],
                    preferred_element_type=jnp.float32) + b_fc_ref[l]
        u = u * jax.nn.sigmoid(1.702 * u)           # QuickGELU (f32)
        x = x + jnp.dot(u.astype(jnp.bfloat16), w_proj_ref[l],
                        preferred_element_type=jnp.float32) + b_proj_ref[l]

    # ---- CLS token -> ln_post -> projection -> L2 normalize ----
    cls_tok = x.reshape(batch, t_pad, width)[:, 0, :]           # (B, W)
    cls_tok = _layer_norm(cls_tok, ln_post_g_ref[...], ln_post_b_ref[...])
    feats = jnp.dot(cls_tok.astype(jnp.bfloat16), proj_ref[...],
                    preferred_element_type=jnp.float32)         # (B, OUT_PAD)
    # padded proj columns are zero -> padded feats are zero -> norm unchanged.
    # (no epsilon, matching torch's divide-by-norm behavior)
    inv_norm = jax.lax.rsqrt(jnp.sum(feats * feats, axis=-1, keepdims=True))
    out_ref[...] = (feats * inv_norm).astype(out_ref.dtype)


# ------------------------------- parameters -------------------------------- #
def init_params(key):
    n_tokens = (IMG // PATCH) ** 2 + 1
    keys = iter(jax.random.split(key, 16))

    def nrm(shape, std=0.02):
        return (std * jax.random.normal(next(keys), shape)).astype(jnp.float32)

    L, W4 = LAYERS, 4 * WIDTH
    return {
        # conv1 (patch embed, no bias in CLIP): flattened as (C*P*P, WIDTH)
        "patch_w": nrm((IN_CH * PATCH * PATCH, WIDTH)),
        "cls": nrm((WIDTH,)),
        "pos": nrm((n_tokens, WIDTH)),
        "ln_pre_g": jnp.ones((WIDTH,), jnp.float32),
        "ln_pre_b": jnp.zeros((WIDTH,), jnp.float32),
        # per-layer weights, stacked along a leading LAYERS axis
        "ln1_g": jnp.ones((L, WIDTH), jnp.float32),
        "ln1_b": jnp.zeros((L, WIDTH), jnp.float32),
        "w_qkv": nrm((L, WIDTH, 3 * WIDTH)),
        "b_qkv": jnp.zeros((L, 3 * WIDTH), jnp.float32),
        "w_out": nrm((L, WIDTH, WIDTH)),
        "b_out": jnp.zeros((L, WIDTH), jnp.float32),
        "ln2_g": jnp.ones((L, WIDTH), jnp.float32),
        "ln2_b": jnp.zeros((L, WIDTH), jnp.float32),
        "w_fc": nrm((L, WIDTH, W4)),
        "b_fc": jnp.zeros((L, W4), jnp.float32),
        "w_proj": nrm((L, W4, WIDTH)),
        "b_proj": jnp.zeros((L, WIDTH), jnp.float32),
        "ln_post_g": jnp.ones((WIDTH,), jnp.float32),
        "ln_post_b": jnp.zeros((WIDTH,), jnp.float32),
        "proj": nrm((WIDTH, OUT_DIM)),
    }


# -------------------------------- forward ---------------------------------- #
def clip_forward(params, image):
    """image: (B, C, H, W) float32 (NCHW) -> (B, OUT_DIM) L2-normalized."""
    B, C, H, W_img = image.shape
    gh, gw = H // PATCH, W_img // PATCH
    n_patches = gh * gw
    n_tokens = n_patches + 1
    t_pad = ((n_tokens + 7) // 8) * 8          # pad to a full sublane tile
    L, WD, HD = LAYERS, WIDTH, HEADS
    dh = WD // HD
    scale = 1.0 / float(dh) ** 0.5

    # --- patch extraction + padded (B, Tp) row layout (pure indexing glue) ---
    # TODO(synk): at 224x224 this transpose should be fused into the pallas
    # input (allow_input_fusion) or DMA-gathered; negligible at toy size.
    xim = image.reshape(B, C, gh, PATCH, gw, PATCH)
    patches = xim.transpose(0, 2, 4, 1, 3, 5).reshape(
        B, n_patches, C * PATCH * PATCH)
    patches_pad = jnp.zeros((B, t_pad, C * PATCH * PATCH), jnp.float32)
    patches_pad = patches_pad.at[:, 1:n_tokens, :].set(patches)
    patches_pad = patches_pad.reshape(B * t_pad, -1).astype(jnp.bfloat16)

    # CLS token folded into row 0 of positional embedding; pad rows zero;
    # tiled over batch so the kernel adds one full-tile slab.
    cls_pos = jnp.zeros((t_pad, WD), jnp.float32)
    cls_pos = cls_pos.at[:n_tokens].set(params["pos"])
    cls_pos = cls_pos.at[0].add(params["cls"])
    pos_full = jnp.tile(cls_pos, (B, 1))                        # (B*Tp, W)

    # additive attention bias masking padded key tokens
    key_ok = jnp.arange(t_pad) < n_tokens
    att_bias = jnp.where(key_ok, 0.0, -1e30).astype(jnp.float32)
    att_bias = jnp.broadcast_to(att_bias[None, None, :], (B, t_pad, t_pad))

    # per-head q/k/v weights (scale folded into q), bf16 for the MXU
    w_qkv, b_qkv = params["w_qkv"], params["b_qkv"]

    def split_w(w):            # (L, W, W) -> (L, H, W, dh)
        return w.reshape(L, WD, HD, dh).transpose(0, 2, 1, 3)

    def split_b(b):            # (L, W) -> (L, H, 1, dh)
        return b.reshape(L, HD, 1, dh)

    w_q = split_w(w_qkv[:, :, 0:WD] * scale).astype(jnp.bfloat16)
    w_k = split_w(w_qkv[:, :, WD:2 * WD]).astype(jnp.bfloat16)
    w_v = split_w(w_qkv[:, :, 2 * WD:3 * WD]).astype(jnp.bfloat16)
    b_q = split_b(b_qkv[:, 0:WD] * scale)
    b_k = split_b(b_qkv[:, WD:2 * WD])
    b_v = split_b(b_qkv[:, 2 * WD:3 * WD])

    # lane-dense output projection (zero-padded to OUT_PAD lanes)
    proj_pad = jnp.zeros((WD, OUT_PAD), jnp.float32)
    proj_pad = proj_pad.at[:, :OUT_DIM].set(params["proj"]).astype(jnp.bfloat16)

    args = (
        patches_pad,
        params["patch_w"].astype(jnp.bfloat16),
        pos_full,
        att_bias,
        params["ln_pre_g"].reshape(1, WD), params["ln_pre_b"].reshape(1, WD),
        params["ln1_g"].reshape(L, 1, WD), params["ln1_b"].reshape(L, 1, WD),
        w_q, w_k, w_v,
        b_q, b_k, b_v,
        params["w_out"].astype(jnp.bfloat16), params["b_out"].reshape(L, 1, WD),
        params["ln2_g"].reshape(L, 1, WD), params["ln2_b"].reshape(L, 1, WD),
        params["w_fc"].astype(jnp.bfloat16),
        params["b_fc"].reshape(L, 1, 4 * WD),
        params["w_proj"].astype(jnp.bfloat16),
        params["b_proj"].reshape(L, 1, WD),
        params["ln_post_g"].reshape(1, WD), params["ln_post_b"].reshape(1, WD),
        proj_pad,
    )
    kernel = functools.partial(
        _clip_encoder_kernel, batch=B, t_pad=t_pad, heads=HEADS)

    feats_pad = pl.pallas_call(
        kernel,
        out_shape=jax.ShapeDtypeStruct((B, OUT_PAD), jnp.float32),
        in_specs=[_full_spec(a.shape) for a in args],
        out_specs=_full_spec((B, OUT_PAD)),
    )(*args)
    return feats_pad[:, :OUT_DIM]


# TODO(synk): load_clip_to_cpu / pretrained weight loading, clip.tokenize and
# the encode_text precompute in __init__ have no Pallas equivalent; forward()
# only needs encode_image + normalization, which is what is implemented here.

# --------------------------------- driver ----------------------------------- #
if __name__ == "__main__":
    key = jax.random.PRNGKey(0)
    pkey, ikey = jax.random.split(key)
    params = init_params(pkey)
    image = jax.random.normal(ikey, (BATCH, IN_CH, IMG, IMG), dtype=jnp.float32)

    feats = jax.jit(clip_forward)(params, image)
    feats = jax.block_until_ready(feats)

    assert feats.shape == (BATCH, OUT_DIM), feats.shape
    # features must be unit-norm along the last dim
    norms = jnp.linalg.norm(feats, axis=-1)
    assert bool(jnp.all(jnp.abs(norms - 1.0) < 1e-4)), norms
    print("KERNEL_OK")
</pallas_src>

<mosaic_0001>
module attributes {stable_mosaic.version = 11 : i64} {
  func.func @_clip_encoder_kernel(%arg0: memref<16x192xbf16, #tpu.memory_space<vmem>>, %arg1: memref<192x32xbf16, #tpu.memory_space<vmem>>, %arg2: memref<16x32xf32, #tpu.memory_space<vmem>>, %arg3: memref<2x8x8xf32, #tpu.memory_space<vmem>>, %arg4: memref<1x32xf32, #tpu.memory_space<vmem>>, %arg5: memref<1x32xf32, #tpu.memory_space<vmem>>, %arg6: memref<2x1x32xf32, #tpu.memory_space<vmem>>, %arg7: memref<2x1x32xf32, #tpu.memory_space<vmem>>, %arg8: memref<2x4x32x8xbf16, #tpu.memory_space<vmem>>, %arg9: memref<2x4x32x8xbf16, #tpu.memory_space<vmem>>, %arg10: memref<2x4x32x8xbf16, #tpu.memory_space<vmem>>, %arg11: memref<2x4x1x8xf32, #tpu.memory_space<vmem>>, %arg12: memref<2x4x1x8xf32, #tpu.memory_space<vmem>>, %arg13: memref<2x4x1x8xf32, #tpu.memory_space<vmem>>, %arg14: memref<2x32x32xbf16, #tpu.memory_space<vmem>>, %arg15: memref<2x1x32xf32, #tpu.memory_space<vmem>>, %arg16: memref<2x1x32xf32, #tpu.memory_space<vmem>>, %arg17: memref<2x1x32xf32, #tpu.memory_space<vmem>>, %arg18: memref<2x32x128xbf16, #tpu.memory_space<vmem>>, %arg19: memref<2x1x128xf32, #tpu.memory_space<vmem>>, %arg20: memref<2x128x32xbf16, #tpu.memory_space<vmem>>, %arg21: memref<2x1x32xf32, #tpu.memory_space<vmem>>, %arg22: memref<1x32xf32, #tpu.memory_space<vmem>>, %arg23: memref<1x32xf32, #tpu.memory_space<vmem>>, %arg24: memref<32x128xbf16, #tpu.memory_space<vmem>>, %arg25: memref<2x128xf32, #tpu.memory_space<vmem>>) attributes {dimension_semantics = [], scalar_prefetch = 0 : i64, scratch_operands = 0 : i64, tpu.core_type = #tpu.core_type<tc>} {
    %c0 = arith.constant 0 : index
    %c0_0 = arith.constant 0 : index
    %0 = vector.load %arg0[%c0, %c0_0] : memref<16x192xbf16, #tpu.memory_space<vmem>>, vector<16x192xbf16>
    %c0_1 = arith.constant 0 : index
    %c0_2 = arith.constant 0 : index
    %1 = vector.load %arg1[%c0_1, %c0_2] : memref<192x32xbf16, #tpu.memory_space<vmem>>, vector<192x32xbf16>
    %cst = arith.constant dense<0.000000e+00> : vector<16x32xf32>
    %2 = tpu.matmul %0, %1, %cst {dimension_numbers = #tpu.dot_dimension_numbers<[1], [0], [0], [1], [0, 0, 1, 1], [], []>} : vector<16x192xbf16>, vector<192x32xbf16>, vector<16x32xf32> -> vector<16x32xf32>
    %c0_3 = arith.constant 0 : index
    %c0_4 = arith.constant 0 : index
    %3 = vector.load %arg2[%c0_3, %c0_4] : memref<16x32xf32, #tpu.memory_space<vmem>>, vector<16x32xf32>
    %4 = arith.addf %2, %3 : vector<16x32xf32>
    %c0_5 = arith.constant 0 : index
    %c0_6 = arith.constant 0 : index
    %5 = vector.load %arg4[%c0_5, %c0_6] : memref<1x32xf32, #tpu.memory_space<vmem>>, vector<1x32xf32>
    %c0_7 = arith.constant 0 : index
    %c0_8 = arith.constant 0 : index
    %6 = vector.load %arg5[%c0_7, %c0_8] : memref<1x32xf32, #tpu.memory_space<vmem>>, vector<1x32xf32>
    %cst_9 = arith.constant dense<0.000000e+00> : vector<16xf32>
    %7 = vector.multi_reduction <add>, %4, %cst_9 [1] : vector<16x32xf32> to vector<16xf32>
    %8 = vector.shape_cast %7 : vector<16xf32> to vector<16x1xf32>
    %cst_10 = arith.constant 3.200000e+01 : f32
    %9 = vector.broadcast %cst_10 : f32 to vector<16x1xf32>
    %10 = arith.divf %8, %9 : vector<16x1xf32>
    %11 = vector.broadcast %10 : vector<16x1xf32> to vector<16x32xf32>
    %12 = arith.subf %4, %11 : vector<16x32xf32>
    %13 = arith.mulf %12, %12 : vector<16x32xf32>
    %cst_11 = arith.constant dense<0.000000e+00> : vector<16xf32>
    %14 = vector.multi_reduction <add>, %13, %cst_11 [1] : vector<16x32xf32> to vector<16xf32>
    %15 = vector.shape_cast %14 : vector<16xf32> to vector<16x1xf32>
    %cst_12 = arith.constant 3.200000e+01 : f32
    %16 = vector.broadcast %cst_12 : f32 to vector<16x1xf32>
    %17 = arith.divf %15, %16 : vector<16x1xf32>
    %18 = vector.broadcast %10 : vector<16x1xf32> to vector<16x32xf32>
    %19 = arith.subf %4, %18 : vector<16x32xf32>
    %cst_13 = arith.constant 9.99999974E-6 : f32
    %20 = vector.broadcast %cst_13 : f32 to vector<16x1xf32>
    %21 = arith.addf %17, %20 : vector<16x1xf32>
    %22 = math.rsqrt %21 : vector<16x1xf32>
    %23 = vector.broadcast %22 : vector<16x1xf32> to vector<16x32xf32>
    %24 = arith.mulf %19, %23 : vector<16x32xf32>
    %25 = vector.broadcast %5 : vector<1x32xf32> to vector<16x32xf32>
    %26 = arith.mulf %24, %25 : vector<16x32xf32>
    %27 = vector.broadcast %6 : vector<1x32xf32> to vector<16x32xf32>
    %28 = arith.addf %26, %27 : vector<16x32xf32>
    %c0_14 = arith.constant 0 : index
    %c0_15 = arith.constant 0 : index
    %c0_16 = arith.constant 0 : index
    %29 = vector.load %arg3[%c0_14, %c0_15, %c0_16] : memref<2x8x8xf32, #tpu.memory_space<vmem>>, vector<2x8x8xf32>
    %c0_17 = arith.constant 0 : index
    %c0_18 = arith.constant 0 : index
    %c0_19 = arith.constant 0 : index
    %30 = vector.load %arg6[%c0_17, %c0_18, %c0_19] : memref<2x1x32xf32, #tpu.memory_space<vmem>>, vector<1x1x32xf32>
    %31 = vector.shape_cast %30 : vector<1x1x32xf32> to vector<1x32xf32>
    %c0_20 = arith.constant 0 : index
    %c0_21 = arith.constant 0 : index
    %c0_22 = arith.constant 0 : index
    %32 = vector.load %arg7[%c0_20, %c0_21, %c0_22] : memref<2x1x32xf32, #tpu.memory_space<vmem>>, vector<1x1x32xf32>
    %33 = vector.shape_cast %32 : vector<1x1x32xf32> to vector<1x32xf32>
    %cst_23 = arith.constant dense<0.000000e+00> : vector<16xf32>
    %34 = vector.multi_reduction <add>, %28, %cst_23 [1] : vector<16x32xf32> to vector<16xf32>
    %35 = vector.shape_cast %34 : vector<16xf32> to vector<16x1xf32>
    %cst_24 = arith.constant 3.200000e+01 : f32
    %36 = vector.broadcast %cst_24 : f32 to vector<16x1xf32>
    %37 = arith.divf %35, %36 : vector<16x1xf32>
    %38 = vector.broadcast %37 : vector<16x1xf32> to vector<16x32xf32>
    %39 = arith.subf %28, %38 : vector<16x32xf32>
    %40 = arith.mulf %39, %39 : vector<16x32xf32>
    %cst_25 = arith.constant dense<0.000000e+00> : vector<16xf32>
    %41 = vector.multi_reduction <add>, %40, %cst_25 [1] : vector<16x32xf32> to vector<16xf32>
    %42 = vector.shape_cast %41 : vector<16xf32> to vector<16x1xf32>
    %cst_26 = arith.constant 3.200000e+01 : f32
    %43 = vector.broadcast %cst_26 : f32 to vector<16x1xf32>
    %44 = arith.divf %42, %43 : vector<16x1xf32>
    %45 = vector.broadcast %37 : vector<16x1xf32> to vector<16x32xf32>
    %46 = arith.subf %28, %45 : vector<16x32xf32>
    %cst_27 = arith.constant 9.99999974E-6 : f32
    %47 = vector.broadcast %cst_27 : f32 to vector<16x1xf32>
    %48 = arith.addf %44, %47 : vector<16x1xf32>
    %49 = math.rsqrt %48 : vector<16x1xf32>
    %50 = vector.broadcast %49 : vector<16x1xf32> to vector<16x32xf32>
    %51 = arith.mulf %46, %50 : vector<16x32xf32>
    %52 = vector.broadcast %31 : vector<1x32xf32> to vector<16x32xf32>
    %53 = arith.mulf %51, %52 : vector<16x32xf32>
    %54 = vector.broadcast %33 : vector<1x32xf32> to vector<16x32xf32>
    %55 = arith.addf %53, %54 : vector<16x32xf32>
    %56 = arith.truncf %55 : vector<16x32xf32> to vector<16x32xbf16>
    %c0_28 = arith.constant 0 : index
    %c0_29 = arith.constant 0 : index
    %c0_30 = arith.constant 0 : index
    %c0_31 = arith.constant 0 : index
    %57 = vector.load %arg8[%c0_28, %c0_29, %c0_30, %c0_31] : memref<2x4x32x8xbf16, #tpu.memory_space<vmem>>, vector<1x1x32x8xbf16>
    %58 = vector.shape_cast %57 : vector<1x1x32x8xbf16> to vector<32x8xbf16>
    %cst_32 = arith.constant dense<0.000000e+00> : vector<16x8xf32>
    %59 = tpu.matmul %56, %58, %cst_32 {dimension_numbers = #tpu.dot_dimension_numbers<[1], [0], [0], [1], [0, 0, 1, 1], [], []>} : vector<16x32xbf16>, vector<32x8xbf16>, vector<16x8xf32> -> vector<16x8xf32>
    %c0_33 = arith.constant 0 : index
    %c0_34 = arith.constant 0 : index
    %c0_35 = arith.constant 0 : index
    %c0_36 = arith.constant 0 : index
    %60 = vector.load %arg11[%c0_33, %c0_34, %c0_35, %c0_36] : memref<2x4x1x8xf32, #tpu.memory_space<vmem>>, vector<1x1x1x8xf32>
    %61 = vector.shape_cast %60 : vector<1x1x1x8xf32> to vector<1x8xf32>
    %62 = vector.broadcast %61 : vector<1x8xf32> to vector<16x8xf32>
    %63 = arith.addf %59, %62 : vector<16x8xf32>
    %64 = vector.shape_cast %63 : vector<16x8xf32> to vector<2x8x8xf32>
    %c0_37 = arith.constant 0 : index
    %c0_38 = arith.constant 0 : index
    %c0_39 = arith.constant 0 : index
    %c0_40 = arith.constant 0 : index
    %65 = vector.load %arg9[%c0_37, %c0_38, %c0_39, %c0_40] : memref<2x4x32x8xbf16, #tpu.memory_space<vmem>>, vector<1x1x32x8xbf16>
    %66 = vector.shape_cast %65 : vector<1x1x32x8xbf16> to vector<32x8xbf16>
    %cst_41 = arith.constant dense<0.000000e+00> : vector<16x8xf32>
    %67 = tpu.matmul %56, %66, %cst_41 {dimension_numbers = #tpu.dot_dimension_numbers<[1], [0], [0], [1], [0, 0, 1, 1], [], []>} : vector<16x32xbf16>, vector<32x8xbf16>, vector<16x8xf32> -> vector<16x8xf32>
    %c0_42 = arith.constant 0 : index
    %c0_43 = arith.constant 0 : index
    %c0_44 = arith.constant 0 : index
    %c0_45 = arith.constant 0 : index
    %68 = vector.load %arg12[%c0_42, %c0_43, %c0_44, %c0_45] : memref<2x4x1x8xf32, #tpu.memory_space<vmem>>, vector<1x1x1x8xf32>
    %69 = vector.shape_cast %68 : vector<1x1x1x8xf32> to vector<1x8xf32>
    %70 = vector.broadcast %69 : vector<1x8xf32> to vector<16x8xf32>
    %71 = arith.addf %67, %70 : vector<16x8xf32>
    %72 = vector.shape_cast %71 : vector<16x8xf32> to vector<2x8x8xf32>
    %c0_46 = arith.constant 0 : index
    %c0_47 = arith.constant 0 : index
    %c0_48 = arith.constant 0 : index
    %c0_49 = arith.constant 0 : index
    %73 = vector.load %arg10[%c0_46, %c0_47, %c0_48, %c0_49] : memref<2x4x32x8xbf16, #tpu.memory_space<vmem>>, vector<1x1x32x8xbf16>
    %74 = vector.shape_cast %73 : vector<1x1x32x8xbf16> to vector<32x8xbf16>
    %cst_50 = arith.constant dense<0.000000e+00> : vector<16x8xf32>
    %75 = tpu.matmul %56, %74, %cst_50 {dimension_numbers = #tpu.dot_dimension_numbers<[1], [0], [0], [1], [0, 0, 1, 1], [], []>} : vector<16x32xbf16>, vector<32x8xbf16>, vector<16x8xf32> -> vector<16x8xf32>
    %c0_51 = arith.constant 0 : index
    %c0_52 = arith.constant 0 : index
    %c0_53 = arith.constant 0 : index
    %c0_54 = arith.constant 0 : index
    %76 = vector.load %arg13[%c0_51, %c0_52, %c0_53, %c0_54] : memref<2x4x1x8xf32, #tpu.memory_space<vmem>>, vector<1x1x1x8xf32>
    %77 = vector.shape_cast %76 : vector<1x1x1x8xf32> to vector<1x8xf32>
    %78 = vector.broadcast %77 : vector<1x8xf32> to vector<16x8xf32>
    %79 = arith.addf %75, %78 : vector<16x8xf32>
    %80 = vector.shape_cast %79 : vector<16x8xf32> to vector<2x8x8xf32>
    %81 = arith.truncf %64 : vector<2x8x8xf32> to vector<2x8x8xbf16>
    %82 = arith.truncf %72 : vector<2x8x8xf32> to vector<2x8x8xbf16>
    "tpu.trace_start"() <{level = 10 : i32, message = "btd,bsd->bts"}> : () -> ()
    %cst_55 = arith.constant dense<0.000000e+00> : vector<2x8x8xf32>
    %83 = tpu.matmul %81, %82, %cst_55 {dimension_numbers = #tpu.dot_dimension_numbers<[2], [2], [1], [1], [0, 0, 0, 1, 1, 1], [0], [0]>} : vector<2x8x8xbf16>, vector<2x8x8xbf16>, vector<2x8x8xf32> -> vector<2x8x8xf32>
    "tpu.trace_stop"() : () -> ()
    %84 = arith.addf %83, %29 : vector<2x8x8xf32>
    %cst_56 = arith.constant dense<0xFF800000> : vector<2x8xf32>
    %85 = vector.multi_reduction <maximumf>, %84, %cst_56 [2] : vector<2x8x8xf32> to vector<2x8xf32>
    %86 = vector.shape_cast %85 : vector<2x8xf32> to vector<2x8x1xf32>
    %87 = vector.broadcast %86 : vector<2x8x1xf32> to vector<2x8x8xf32>
    %88 = arith.subf %84, %87 : vector<2x8x8xf32>
    %89 = math.exp %88 : vector<2x8x8xf32>
    %cst_57 = arith.constant dense<0.000000e+00> : vector<2x8xf32>
    %90 = vector.multi_reduction <add>, %89, %cst_57 [2] : vector<2x8x8xf32> to vector<2x8xf32>
    %91 = vector.shape_cast %90 : vector<2x8xf32> to vector<2x8x1xf32>
    %92 = tpu.reciprocal %91 {approx = true} : vector<2x8x1xf32> -> vector<2x8x1xf32>
    %93 = vector.broadcast %92 : vector<2x8x1xf32> to vector<2x8x8xf32>
    %94 = arith.mulf %89, %93 : vector<2x8x8xf32>
    %95 = arith.truncf %94 : vector<2x8x8xf32> to vector<2x8x8xbf16>
    %96 = arith.truncf %80 : vector<2x8x8xf32> to vector<2x8x8xbf16>
    "tpu.trace_start"() <{level = 10 : i32, message = "bts,bsd->btd"}> : () -> ()
    %cst_58 = arith.constant dense<0.000000e+00> : vector<2x8x8xf32>
    %97 = tpu.matmul %95, %96, %cst_58 {dimension_numbers = #tpu.dot_dimension_numbers<[2], [1], [1], [2], [0, 0, 0, 1, 1, 2], [0], [0]>} : vector<2x8x8xbf16>, vector<2x8x8xbf16>, vector<2x8x8xf32> -> vector<2x8x8xf32>
    "tpu.trace_stop"() : () -> ()
    %98 = vector.shape_cast %97 : vector<2x8x8xf32> to vector<16x8xf32>
    %c0_59 = arith.constant 0 : index
    %c1 = arith.constant 1 : index
    %c0_60 = arith.constant 0 : index
    %c0_61 = arith.constant 0 : index
    %99 = vector.load %arg8[%c0_59, %c1, %c0_60, %c0_61] : memref<2x4x32x8xbf16, #tpu.memory_space<vmem>>, vector<1x1x32x8xbf16>
    %100 = vector.shape_cast %99 : vector<1x1x32x8xbf16> to vector<32x8xbf16>
    %cst_62 = arith.constant dense<0.000000e+00> : vector<16x8xf32>
    %101 = tpu.matmul %56, %100, %cst_62 {dimension_numbers = #tpu.dot_dimension_numbers<[1], [0], [0], [1], [0, 0, 1, 1], [], []>} : vector<16x32xbf16>, vector<32x8xbf16>, vector<16x8xf32> -> vector<16x8xf32>
    %c0_63 = arith.constant 0 : index
    %c1_64 = arith.constant 1 : index
    %c0_65 = arith.constant 0 : index
    %c0_66 = arith.constant 0 : index
    %102 = vector.load %arg11[%c0_63, %c1_64, %c0_65, %c0_66] : memref<2x4x1x8xf32, #tpu.memory_space<vmem>>, vector<1x1x1x8xf32>
    %103 = vector.shape_cast %102 : vector<1x1x1x8xf32> to vector<1x8xf32>
    %104 = vector.broadcast %103 : vector<1x8xf32> to vector<16x8xf32>
    %105 = arith.addf %101, %104 : vector<16x8xf32>
    %106 = vector.shape_cast %105 : vector<16x8xf32> to vector<2x8x8xf32>
    %c0_67 = arith.constant 0 : index
    %c1_68 = arith.constant 1 : index
    %c0_69 = arith.constant 0 : index
    %c0_70 = arith.constant 0 : index
    %107 = vector.load %arg9[%c0_67, %c1_68, %c0_69, %c0_70] : memref<2x4x32x8xbf16, #tpu.memory_space<vmem>>, vector<1x1x32x8xbf16>
    %108 = vector.shape_cast %107 : vector<1x1x32x8xbf16> to vector<32x8xbf16>
    %cst_71 = arith.constant dense<0.000000e+00> : vector<16x8xf32>
    %109 = tpu.matmul %56, %108, %cst_71 {dimension_numbers = #tpu.dot_dimension_numbers<[1], [0], [0], [1], [0, 0, 1, 1], [], []>} : vector<16x32xbf16>, vector<32x8xbf16>, vector<16x8xf32> -> vector<16x8xf32>
    %c0_72 = arith.constant 0 : index
    %c1_73 = arith.constant 1 : index
    %c0_74 = arith.constant 0 : index
    %c0_75 = arith.constant 0 : index
    %110 = vector.load %arg12[%c0_72, %c1_73, %c0_74, %c0_75] : memref<2x4x1x8xf32, #tpu.memory_space<vmem>>, vector<1x1x1x8xf32>
    %111 = vector.shape_cast %110 : vector<1x1x1x8xf32> to vector<1x8xf32>
    %112 = vector.broadcast %111 : vector<1x8xf32> to vector<16x8xf32>
    %113 = arith.addf %109, %112 : vector<16x8xf32>
    %114 = vector.shape_cast %113 : vector<16x8xf32> to vector<2x8x8xf32>
    %c0_76 = arith.constant 0 : index
    %c1_77 = arith.constant 1 : index
    %c0_78 = arith.constant 0 : index
    %c0_79 = arith.constant 0 : index
    %115 = vector.load %arg10[%c0_76, %c1_77, %c0_78, %c0_79] : memref<2x4x32x8xbf16, #tpu.memory_space<vmem>>, vector<1x1x32x8xbf16>
    %116 = vector.shape_cast %115 : vector<1x1x32x8xbf16> to vector<32x8xbf16>
    %cst_80 = arith.constant dense<0.000000e+00> : vector<16x8xf32>
    %117 = tpu.matmul %56, %116, %cst_80 {dimension_numbers = #tpu.dot_dimension_numbers<[1], [0], [0], [1], [0, 0, 1, 1], [], []>} : vector<16x32xbf16>, vector<32x8xbf16>, vector<16x8xf32> -> vector<16x8xf32>
    %c0_81 = arith.constant 0 : index
    %c1_82 = arith.constant 1 : index
    %c0_83 = arith.constant 0 : index
    %c0_84 = arith.constant 0 : index
    %118 = vector.load %arg13[%c0_81, %c1_82, %c0_83, %c0_84] : memref<2x4x1x8xf32, #tpu.memory_space<vmem>>, vector<1x1x1x8xf32>
    %119 = vector.shape_cast %118 : vector<1x1x1x8xf32> to vector<1x8xf32>
    %120 = vector.broadcast %119 : vector<1x8xf32> to vector<16x8xf32>
    %121 = arith.addf %117, %120 : vector<16x8xf32>
    %122 = vector.shape_cast %121 : vector<16x8xf32> to vector<2x8x8xf32>
    %123 = arith.truncf %106 : vector<2x8x8xf32> to vector<2x8x8xbf16>
    %124 = arith.truncf %114 : vector<2x8x8xf32> to vector<2x8x8xbf16>
    "tpu.trace_start"() <{level = 10 : i32, message = "btd,bsd->bts"}> : () -> ()
    %cst_85 = arith.constant dense<0.000000e+00> : vector<2x8x8xf32>
    %125 = tpu.matmul %123, %124, %cst_85 {dimension_numbers = #tpu.dot_dimension_numbers<[2], [2], [1], [1], [0, 0, 0, 1, 1, 1], [0], [0]>} : vector<2x8x8xbf16>, vector<2x8x8xbf16>, vector<2x8x8xf32> -> vector<2x8x8xf32>
    "tpu.trace_stop"() : () -> ()
    %126 = arith.addf %125, %29 : vector<2x8x8xf32>
    %cst_86 = arith.constant dense<0xFF800000> : vector<2x8xf32>
    %127 = vector.multi_reduction <maximumf>, %126, %cst_86 [2] : vector<2x8x8xf32> to vector<2x8xf32>
    %128 = vector.shape_cast %127 : vector<2x8xf32> to vector<2x8x1xf32>
    %129 = vector.broadcast %128 : vector<2x8x1xf32> to vector<2x8x8xf32>
    %130 = arith.subf %126, %129 : vector<2x8x8xf32>
    %131 = math.exp %130 : vector<2x8x8xf32>
    %cst_87 = arith.constant dense<0.000000e+00> : vector<2x8xf32>
    %132 = vector.multi_reduction <add>, %131, %cst_87 [2] : vector<2x8x8xf32> to vector<2x8xf32>
    %133 = vector.shape_cast %132 : vector<2x8xf32> to vector<2x8x1xf32>
    %134 = tpu.reciprocal %133 {approx = true} : vector<2x8x1xf32> -> vector<2x8x1xf32>
    %135 = vector.broadcast %134 : vector<2x8x1xf32> to vector<2x8x8xf32>
    %136 = arith.mulf %131, %135 : vector<2x8x8xf32>
    %137 = arith.truncf %136 : vector<2x8x8xf32> to vector<2x8x8xbf16>
    %138 = arith.truncf %122 : vector<2x8x8xf32> to vector<2x8x8xbf16>
    "tpu.trace_start"() <{level = 10 : i32, message = "bts,bsd->btd"}> : () -> ()
    %cst_88 = arith.constant dense<0.000000e+00> : vector<2x8x8xf32>
    %139 = tpu.matmul %137, %138, %cst_88 {dimension_numbers = #tpu.dot_dimension_numbers<[2], [1], [1], [2], [0, 0, 0, 1, 1, 2], [0], [0]>} : vector<2x8x8xbf16>, vector<2x8x8xbf16>, vector<2x8x8xf32> -> vector<2x8x8xf32>
    "tpu.trace_stop"() : () -> ()
    %140 = vector.shape_cast %139 : vector<2x8x8xf32> to vector<16x8xf32>
    %c0_89 = arith.constant 0 : index
    %c2 = arith.constant 2 : index
    %c0_90 = arith.constant 0 : index
    %c0_91 = arith.constant 0 : index
    %141 = vector.load %arg8[%c0_89, %c2, %c0_90, %c0_91] : memref<2x4x32x8xbf16, #tpu.memory_space<vmem>>, vector<1x1x32x8xbf16>
    %142 = vector.shape_cast %141 : vector<1x1x32x8xbf16> to vector<32x8xbf16>
    %cst_92 = arith.constant dense<0.000000e+00> : vector<16x8xf32>
    %143 = tpu.matmul %56, %142, %cst_92 {dimension_numbers = #tpu.dot_dimension_numbers<[1], [0], [0], [1], [0, 0, 1, 1], [], []>} : vector<16x32xbf16>, vector<32x8xbf16>, vector<16x8xf32> -> vector<16x8xf32>
    %c0_93 = arith.constant 0 : index
    %c2_94 = arith.constant 2 : index
    %c0_95 = arith.constant 0 : index
    %c0_96 = arith.constant 0 : index
    %144 = vector.load %arg11[%c0_93, %c2_94, %c0_95, %c0_96] : memref<2x4x1x8xf32, #tpu.memory_space<vmem>>, vector<1x1x1x8xf32>
    %145 = vector.shape_cast %144 : vector<1x1x1x8xf32> to vector<1x8xf32>
    %146 = vector.broadcast %145 : vector<1x8xf32> to vector<16x8xf32>
    %147 = arith.addf %143, %146 : vector<16x8xf32>
    %148 = vector.shape_cast %147 : vector<16x8xf32> to vector<2x8x8xf32>
    %c0_97 = arith.constant 0 : index
    %c2_98 = arith.constant 2 : index
    %c0_99 = arith.constant 0 : index
    %c0_100 = arith.constant 0 : index
    %149 = vector.load %arg9[%c0_97, %c2_98, %c0_99, %c0_100] : memref<2x4x32x8xbf16, #tpu.memory_space<vmem>>, vector<1x1x32x8xbf16>
    %150 = vector.shape_cast %149 : vector<1x1x32x8xbf16> to vector<32x8xbf16>
    %cst_101 = arith.constant dense<0.000000e+00> : vector<16x8xf32>
    %151 = tpu.matmul %56, %150, %cst_101 {dimension_numbers = #tpu.dot_dimension_numbers<[1], [0], [0], [1], [0, 0, 1, 1], [], []>} : vector<16x32xbf16>, vector<32x8xbf16>, vector<16x8xf32> -> vector<16x8xf32>
    %c0_102 = arith.constant 0 : index
    %c2_103 = arith.constant 2 : index
    %c0_104 = arith.constant 0 : index
    %c0_105 = arith.constant 0 : index
    %152 = vector.load %arg12[%c0_102, %c2_103, %c0_104, %c0_105] : memref<2x4x1x8xf32, #tpu.memory_space<vmem>>, vector<1x1x1x8xf32>
    %153 = vector.shape_cast %152 : vector<1x1x1x8xf32> to vector<1x8xf32>
    %154 = vector.broadcast %153 : vector<1x8xf32> to vector<16x8xf32>
    %155 = arith.addf %151, %154 : vector<16x8xf32>
    %156 = vector.shape_cast %155 : vector<16x8xf32> to vector<2x8x8xf32>
    %c0_106 = arith.constant 0 : index
    %c2_107 = arith.constant 2 : index
    %c0_108 = arith.constant 0 : index
    %c0_109 = arith.constant 0 : index
    %157 = vector.load %arg10[%c0_106, %c2_107, %c0_108, %c0_109] : memref<2x4x32x8xbf16, #tpu.memory_space<vmem>>, vector<1x1x32x8xbf16>
    %158 = vector.shape_cast %157 : vector<1x1x32x8xbf16> to vector<32x8xbf16>
    %cst_110 = arith.constant dense<0.000000e+00> : vector<16x8xf32>
    %159 = tpu.matmul %56, %158, %cst_110 {dimension_numbers = #tpu.dot_dimension_numbers<[1], [0], [0], [1], [0, 0, 1, 1], [], []>} : vector<16x32xbf16>, vector<32x8xbf16>, vector<16x8xf32> -> vector<16x8xf32>
    %c0_111 = arith.constant 0 : index
    %c2_112 = arith.constant 2 : index
    %c0_113 = arith.constant 0 : index
    %c0_114 = arith.constant 0 : index
    %160 = vector.load %arg13[%c0_111, %c2_112, %c0_113, %c0_114] : memref<2x4x1x8xf32, #tpu.memory_space<vmem>>, vector<1x1x1x8xf32>
    %161 = vector.shape_cast %160 : vector<1x1x1x8xf32> to vector<1x8xf32>
    %162 = vector.broadcast %161 : vector<1x8xf32> to vector<16x8xf32>
    %163 = arith.addf %159, %162 : vector<16x8xf32>
    %164 = vector.shape_cast %163 : vector<16x8xf32> to vector<2x8x8xf32>
    %165 = arith.truncf %148 : vector<2x8x8xf32> to vector<2x8x8xbf16>
    %166 = arith.truncf %156 : vector<2x8x8xf32> to vector<2x8x8xbf16>
    "tpu.trace_start"() <{level = 10 : i32, message = "btd,bsd->bts"}> : () -> ()
    %cst_115 = arith.constant dense<0.000000e+00> : vector<2x8x8xf32>
    %167 = tpu.matmul %165, %166, %cst_115 {dimension_numbers = #tpu.dot_dimension_numbers<[2], [2], [1], [1], [0, 0, 0, 1, 1, 1], [0], [0]>} : vector<2x8x8xbf16>, vector<2x8x8xbf16>, vector<2x8x8xf32> -> vector<2x8x8xf32>
    "tpu.trace_stop"() : () -> ()
    %168 = arith.addf %167, %29 : vector<2x8x8xf32>
    %cst_116 = arith.constant dense<0xFF800000> : vector<2x8xf32>
    %169 = vector.multi_reduction <maximumf>, %168, %cst_116 [2] : vector<2x8x8xf32> to vector<2x8xf32>
    %170 = vector.shape_cast %169 : vector<2x8xf32> to vector<2x8x1xf32>
    %171 = vector.broadcast %170 : vector<2x8x1xf32> to vector<2x8x8xf32>
    %172 = arith.subf %168, %171 : vector<2x8x8xf32>
    %173 = math.exp %172 : vector<2x8x8xf32>
    %cst_117 = arith.constant dense<0.000000e+00> : vector<2x8xf32>
    %174 = vector.multi_reduction <add>, %173, %cst_117 [2] : vector<2x8x8xf32> to vector<2x8xf32>
    %175 = vector.shape_cast %174 : vector<2x8xf32> to vector<2x8x1xf32>
    %176 = tpu.reciprocal %175 {approx = true} : vector<2x8x1xf32> -> vector<2x8x1xf32>
    %177 = vector.broadcast %176 : vector<2x8x1xf32> to vector<2x8x8xf32>
    %178 = arith.mulf %173, %177 : vector<2x8x8xf32>
    %179 = arith.truncf %178 : vector<2x8x8xf32> to vector<2x8x8xbf16>
    %180 = arith.truncf %164 : vector<2x8x8xf32> to vector<2x8x8xbf16>
    "tpu.trace_start"() <{level = 10 : i32, message = "bts,bsd->btd"}> : () -> ()
    %cst_118 = arith.constant dense<0.000000e+00> : vector<2x8x8xf32>
    %181 = tpu.matmul %179, %180, %cst_118 {dimension_numbers = #tpu.dot_dimension_numbers<[2], [1], [1], [2], [0, 0, 0, 1, 1, 2], [0], [0]>} : vector<2x8x8xbf16>, vector<2x8x8xbf16>, vector<2x8x8xf32> -> vector<2x8x8xf32>
    "tpu.trace_stop"() : () -> ()
    %182 = vector.shape_cast %181 : vector<2x8x8xf32> to vector<16x8xf32>
    %c0_119 = arith.constant 0 : index
    %c3 = arith.constant 3 : index
    %c0_120 = arith.constant 0 : index
    %c0_121 = arith.constant 0 : index
    %183 = vector.load %arg8[%c0_119, %c3, %c0_120, %c0_121] : memref<2x4x32x8xbf16, #tpu.memory_space<vmem>>, vector<1x1x32x8xbf16>
    %184 = vector.shape_cast %183 : vector<1x1x32x8xbf16> to vector<32x8xbf16>
    %cst_122 = arith.constant dense<0.000000e+00> : vector<16x8xf32>
    %185 = tpu.matmul %56, %184, %cst_122 {dimension_numbers = #tpu.dot_dimension_numbers<[1], [0], [0], [1], [0, 0, 1, 1], [], []>} : vector<16x32xbf16>, vector<32x8xbf16>, vector<16x8xf32> -> vector<16x8xf32>
    %c0_123 = arith.constant 0 : index
    %c3_124 = arith.constant 3 : index
    %c0_125 = arith.constant 0 : index
    %c0_126 = arith.constant 0 : index
    %186 = vector.load %arg11[%c0_123, %c3_124, %c0_125, %c0_126] : memref<2x4x1x8xf32, #tpu.memory_space<vmem>>, vector<1x1x1x8xf32>
    %187 = vector.shape_cast %186 : vector<1x1x1x8xf32> to vector<1x8xf32>
    %188 = vector.broadcast %187 : vector<1x8xf32> to vector<16x8xf32>
    %189 = arith.addf %185, %188 : vector<16x8xf32>
    %190 = vector.shape_cast %189 : vector<16x8xf32> to vector<2x8x8xf32>
    %c0_127 = arith.constant 0 : index
    %c3_128 = arith.constant 3 : index
    %c0_129 = arith.constant 0 : index
    %c0_130 = arith.constant 0 : index
    %191 = vector.load %arg9[%c0_127, %c3_128, %c0_129, %c0_130] : memref<2x4x32x8xbf16, #tpu.memory_space<vmem>>, vector<1x1x32x8xbf16>
    %192 = vector.shape_cast %191 : vector<1x1x32x8xbf16> to vector<32x8xbf16>
    %cst_131 = arith.constant dense<0.000000e+00> : vector<16x8xf32>
    %193 = tpu.matmul %56, %192, %cst_131 {dimension_numbers = #tpu.dot_dimension_numbers<[1], [0], [0], [1], [0, 0, 1, 1], [], []>} : vector<16x32xbf16>, vector<32x8xbf16>, vector<16x8xf32> -> vector<16x8xf32>
    %c0_132 = arith.constant 0 : index
    %c3_133 = arith.constant 3 : index
    %c0_134 = arith.constant 0 : index
    %c0_135 = arith.constant 0 : index
    %194 = vector.load %arg12[%c0_132, %c3_133, %c0_134, %c0_135] : memref<2x4x1x8xf32, #tpu.memory_space<vmem>>, vector<1x1x1x8xf32>
    %195 = vector.shape_cast %194 : vector<1x1x1x8xf32> to vector<1x8xf32>
    %196 = vector.broadcast %195 : vector<1x8xf32> to vector<16x8xf32>
    %197 = arith.addf %193, %196 : vector<16x8xf32>
    %198 = vector.shape_cast %197 : vector<16x8xf32> to vector<2x8x8xf32>
    %c0_136 = arith.constant 0 : index
    %c3_137 = arith.constant 3 : index
    %c0_138 = arith.constant 0 : index
    %c0_139 = arith.constant 0 : index
    %199 = vector.load %arg10[%c0_136, %c3_137, %c0_138, %c0_139] : memref<2x4x32x8xbf16, #tpu.memory_space<vmem>>, vector<1x1x32x8xbf16>
    %200 = vector.shape_cast %199 : vector<1x1x32x8xbf16> to vector<32x8xbf16>
    %cst_140 = arith.constant dense<0.000000e+00> : vector<16x8xf32>
    %201 = tpu.matmul %56, %200, %cst_140 {dimension_numbers = #tpu.dot_dimension_numbers<[1], [0], [0], [1], [0, 0, 1, 1], [], []>} : vector<16x32xbf16>, vector<32x8xbf16>, vector<16x8xf32> -> vector<16x8xf32>
    %c0_141 = arith.constant 0 : index
    %c3_142 = arith.constant 3 : index
    %c0_143 = arith.constant 0 : index
    %c0_144 = arith.constant 0 : index
    %202 = vector.load %arg13[%c0_141, %c3_142, %c0_143, %c0_144] : memref<2x4x1x8xf32, #tpu.memory_space<vmem>>, vector<1x1x1x8xf32>
    %203 = vector.shape_cast %202 : vector<1x1x1x8xf32> to vector<1x8xf32>
    %204 = vector.broadcast %203 : vector<1x8xf32> to vector<16x8xf32>
    %205 = arith.addf %201, %204 : vector<16x8xf32>
    %206 = vector.shape_cast %205 : vector<16x8xf32> to vector<2x8x8xf32>
    %207 = arith.truncf %190 : vector<2x8x8xf32> to vector<2x8x8xbf16>
    %208 = arith.truncf %198 : vector<2x8x8xf32> to vector<2x8x8xbf16>
    "tpu.trace_start"() <{level = 10 : i32, message = "btd,bsd->bts"}> : () -> ()
    %cst_145 = arith.constant dense<0.000000e+00> : vector<2x8x8xf32>
    %209 = tpu.matmul %207, %208, %cst_145 {dimension_numbers = #tpu.dot_dimension_numbers<[2], [2], [1], [1], [0, 0, 0, 1, 1, 1], [0], [0]>} : vector<2x8x8xbf16>, vector<2x8x8xbf16>, vector<2x8x8xf32> -> vector<2x8x8xf32>
    "tpu.trace_stop"() : () -> ()
    %210 = arith.addf %209, %29 : vector<2x8x8xf32>
    %cst_146 = arith.constant dense<0xFF800000> : vector<2x8xf32>
    %211 = vector.multi_reduction <maximumf>, %210, %cst_146 [2] : vector<2x8x8xf32> to vector<2x8xf32>
    %212 = vector.shape_cast %211 : vector<2x8xf32> to vector<2x8x1xf32>
    %213 = vector.broadcast %212 : vector<2x8x1xf32> to vector<2x8x8xf32>
    %214 = arith.subf %210, %213 : vector<2x8x8xf32>
    %215 = math.exp %214 : vector<2x8x8xf32>
    %cst_147 = arith.constant dense<0.000000e+00> : vector<2x8xf32>
    %216 = vector.multi_reduction <add>, %215, %cst_147 [2] : vector<2x8x8xf32> to vector<2x8xf32>
    %217 = vector.shape_cast %216 : vector<2x8xf32> to vector<2x8x1xf32>
    %218 = tpu.reciprocal %217 {approx = true} : vector<2x8x1xf32> -> vector<2x8x1xf32>
    %219 = vector.broadcast %218 : vector<2x8x1xf32> to vector<2x8x8xf32>
    %220 = arith.mulf %215, %219 : vector<2x8x8xf32>
    %221 = arith.truncf %220 : vector<2x8x8xf32> to vector<2x8x8xbf16>
    %222 = arith.truncf %206 : vector<2x8x8xf32> to vector<2x8x8xbf16>
    "tpu.trace_start"() <{level = 10 : i32, message = "bts,bsd->btd"}> : () -> ()
    %cst_148 = arith.constant dense<0.000000e+00> : vector<2x8x8xf32>
    %223 = tpu.matmul %221, %222, %cst_148 {dimension_numbers = #tpu.dot_dimension_numbers<[2], [1], [1], [2], [0, 0, 0, 1, 1, 2], [0], [0]>} : vector<2x8x8xbf16>, vector<2x8x8xbf16>, vector<2x8x8xf32> -> vector<2x8x8xf32>
    "tpu.trace_stop"() : () -> ()
    %224 = vector.shape_cast %223 : vector<2x8x8xf32> to vector<16x8xf32>
    %225 = tpu.concatenate %98, %140, %182, %224 in 1 : vector<16x8xf32>, vector<16x8xf32>, vector<16x8xf32>, vector<16x8xf32> -> vector<16x32xf32>
    %226 = arith.truncf %225 : vector<16x32xf32> to vector<16x32xbf16>
    %c0_149 = arith.constant 0 : index
    %c0_150 = arith.constant 0 : index
    %c0_151 = arith.constant 0 : index
    %227 = vector.load %arg14[%c0_149, %c0_150, %c0_151] : memref<2x32x32xbf16, #tpu.memory_space<vmem>>, vector<1x32x32xbf16>
    %228 = vector.shape_cast %227 : vector<1x32x32xbf16> to vector<32x32xbf16>
    %cst_152 = arith.constant dense<0.000000e+00> : vector<16x32xf32>
    %229 = tpu.matmul %226, %228, %cst_152 {dimension_numbers = #tpu.dot_dimension_numbers<[1], [0], [0], [1], [0, 0, 1, 1], [], []>} : vector<16x32xbf16>, vector<32x32xbf16>, vector<16x32xf32> -> vector<16x32xf32>
    %c0_153 = arith.constant 0 : index
    %c0_154 = arith.constant 0 : index
    %c0_155 = arith.constant 0 : index
    %230 = vector.load %arg15[%c0_153, %c0_154, %c0_155] : memref<2x1x32xf32, #tpu.memory_space<vmem>>, vector<1x1x32xf32>
    %231 = vector.shape_cast %230 : vector<1x1x32xf32> to vector<1x32xf32>
    %232 = vector.broadcast %231 : vector<1x32xf32> to vector<16x32xf32>
    %233 = arith.addf %229, %232 : vector<16x32xf32>
    %234 = arith.addf %28, %233 : vector<16x32xf32>
    %c0_156 = arith.constant 0 : index
    %c0_157 = arith.constant 0 : index
    %c0_158 = arith.constant 0 : index
    %235 = vector.load %arg16[%c0_156, %c0_157, %c0_158] : memref<2x1x32xf32, #tpu.memory_space<vmem>>, vector<1x1x32xf32>
    %236 = vector.shape_cast %235 : vector<1x1x32xf32> to vector<1x32xf32>
    %c0_159 = arith.constant 0 : index
    %c0_160 = arith.constant 0 : index
    %c0_161 = arith.constant 0 : index
    %237 = vector.load %arg17[%c0_159, %c0_160, %c0_161] : memref<2x1x32xf32, #tpu.memory_space<vmem>>, vector<1x1x32xf32>
    %238 = vector.shape_cast %237 : vector<1x1x32xf32> to vector<1x32xf32>
    %cst_162 = arith.constant dense<0.000000e+00> : vector<16xf32>
    %239 = vector.multi_reduction <add>, %234, %cst_162 [1] : vector<16x32xf32> to vector<16xf32>
    %240 = vector.shape_cast %239 : vector<16xf32> to vector<16x1xf32>
    %cst_163 = arith.constant 3.200000e+01 : f32
    %241 = vector.broadcast %cst_163 : f32 to vector<16x1xf32>
    %242 = arith.divf %240, %241 : vector<16x1xf32>
    %243 = vector.broadcast %242 : vector<16x1xf32> to vector<16x32xf32>
    %244 = arith.subf %234, %243 : vector<16x32xf32>
    %245 = arith.mulf %244, %244 : vector<16x32xf32>
    %cst_164 = arith.constant dense<0.000000e+00> : vector<16xf32>
    %246 = vector.multi_reduction <add>, %245, %cst_164 [1] : vector<16x32xf32> to vector<16xf32>
    %247 = vector.shape_cast %246 : vector<16xf32> to vector<16x1xf32>
    %cst_165 = arith.constant 3.200000e+01 : f32
    %248 = vector.broadcast %cst_165 : f32 to vector<16x1xf32>
    %249 = arith.divf %247, %248 : vector<16x1xf32>
    %250 = vector.broadcast %242 : vector<16x1xf32> to vector<16x32xf32>
    %251 = arith.subf %234, %250 : vector<16x32xf32>
    %cst_166 = arith.constant 9.99999974E-6 : f32
    %252 = vector.broadcast %cst_166 : f32 to vector<16x1xf32>
    %253 = arith.addf %249, %252 : vector<16x1xf32>
    %254 = math.rsqrt %253 : vector<16x1xf32>
    %255 = vector.broadcast %254 : vector<16x1xf32> to vector<16x32xf32>
    %256 = arith.mulf %251, %255 : vector<16x32xf32>
    %257 = vector.broadcast %236 : vector<1x32xf32> to vector<16x32xf32>
    %258 = arith.mulf %256, %257 : vector<16x32xf32>
    %259 = vector.broadcast %238 : vector<1x32xf32> to vector<16x32xf32>
    %260 = arith.addf %258, %259 : vector<16x32xf32>
    %261 = arith.truncf %260 : vector<16x32xf32> to vector<16x32xbf16>
    %c0_167 = arith.constant 0 : index
    %c0_168 = arith.constant 0 : index
    %c0_169 = arith.constant 0 : index
    %262 = vector.load %arg18[%c0_167, %c0_168, %c0_169] : memref<2x32x128xbf16, #tpu.memory_space<vmem>>, vector<1x32x128xbf16>
    %263 = vector.shape_cast %262 : vector<1x32x128xbf16> to vector<32x128xbf16>
    %cst_170 = arith.constant dense<0.000000e+00> : vector<16x128xf32>
    %264 = tpu.matmul %261, %263, %cst_170 {dimension_numbers = #tpu.dot_dimension_numbers<[1], [0], [0], [1], [0, 0, 1, 1], [], []>} : vector<16x32xbf16>, vector<32x128xbf16>, vector<16x128xf32> -> vector<16x128xf32>
    %c0_171 = arith.constant 0 : index
    %c0_172 = arith.constant 0 : index
    %c0_173 = arith.constant 0 : index
    %265 = vector.load %arg19[%c0_171, %c0_172, %c0_173] : memref<2x1x128xf32, #tpu.memory_space<vmem>>, vector<1x1x128xf32>
    %266 = vector.shape_cast %265 : vector<1x1x128xf32> to vector<1x128xf32>
    %267 = vector.broadcast %266 : vector<1x128xf32> to vector<16x128xf32>
    %268 = arith.addf %264, %267 : vector<16x128xf32>
    %cst_174 = arith.constant 1.702000e+00 : f32
    %269 = vector.broadcast %cst_174 : f32 to vector<16x128xf32>
    %270 = arith.mulf %269, %268 : vector<16x128xf32>
    %271 = arith.negf %270 : vector<16x128xf32>
    %272 = math.exp %271 : vector<16x128xf32>
    %cst_175 = arith.constant 1.000000e+00 : f32
    %273 = vector.broadcast %cst_175 : f32 to vector<16x128xf32>
    %274 = arith.addf %273, %272 : vector<16x128xf32>
    %275 = arith.divf %273, %274 : vector<16x128xf32>
    %276 = arith.mulf %268, %275 : vector<16x128xf32>
    %277 = arith.truncf %276 : vector<16x128xf32> to vector<16x128xbf16>
    %c0_176 = arith.constant 0 : index
    %c0_177 = arith.constant 0 : index
    %c0_178 = arith.constant 0 : index
    %278 = vector.load %arg20[%c0_176, %c0_177, %c0_178] : memref<2x128x32xbf16, #tpu.memory_space<vmem>>, vector<1x128x32xbf16>
    %279 = vector.shape_cast %278 : vector<1x128x32xbf16> to vector<128x32xbf16>
    %cst_179 = arith.constant dense<0.000000e+00> : vector<16x32xf32>
    %280 = tpu.matmul %277, %279, %cst_179 {dimension_numbers = #tpu.dot_dimension_numbers<[1], [0], [0], [1], [0, 0, 1, 1], [], []>} : vector<16x128xbf16>, vector<128x32xbf16>, vector<16x32xf32> -> vector<16x32xf32>
    %281 = arith.addf %234, %280 : vector<16x32xf32>
    %c0_180 = arith.constant 0 : index
    %c0_181 = arith.constant 0 : index
    %c0_182 = arith.constant 0 : index
    %282 = vector.load %arg21[%c0_180, %c0_181, %c0_182] : memref<2x1x32xf32, #tpu.memory_space<vmem>>, vector<1x1x32xf32>
    %283 = vector.shape_cast %282 : vector<1x1x32xf32> to vector<1x32xf32>
    %284 = vector.broadcast %283 : vector<1x32xf32> to vector<16x32xf32>
    %285 = arith.addf %281, %284 : vector<16x32xf32>
    %c1_183 = arith.constant 1 : index
    %c0_184 = arith.constant 0 : index
    %c0_185 = arith.constant 0 : index
    %286 = vector.load %arg6[%c1_183, %c0_184, %c0_185] : memref<2x1x32xf32, #tpu.memory_space<vmem>>, vector<1x1x32xf32>
    %287 = vector.shape_cast %286 : vector<1x1x32xf32> to vector<1x32xf32>
    %c1_186 = arith.constant 1 : index
    %c0_187 = arith.constant 0 : index
    %c0_188 = arith.constant 0 : index
    %288 = vector.load %arg7[%c1_186, %c0_187, %c0_188] : memref<2x1x32xf32, #tpu.memory_space<vmem>>, vector<1x1x32xf32>
    %289 = vector.shape_cast %288 : vector<1x1x32xf32> to vector<1x32xf32>
    %cst_189 = arith.constant dense<0.000000e+00> : vector<16xf32>
    %290 = vector.multi_reduction <add>, %285, %cst_189 [1] : vector<16x32xf32> to vector<16xf32>
    %291 = vector.shape_cast %290 : vector<16xf32> to vector<16x1xf32>
    %cst_190 = arith.constant 3.200000e+01 : f32
    %292 = vector.broadcast %cst_190 : f32 to vector<16x1xf32>
    %293 = arith.divf %291, %292 : vector<16x1xf32>
    %294 = vector.broadcast %293 : vector<16x1xf32> to vector<16x32xf32>
    %295 = arith.subf %285, %294 : vector<16x32xf32>
    %296 = arith.mulf %295, %295 : vector<16x32xf32>
    %cst_191 = arith.constant dense<0.000000e+00> : vector<16xf32>
    %297 = vector.multi_reduction <add>, %296, %cst_191 [1] : vector<16x32xf32> to vector<16xf32>
    %298 = vector.shape_cast %297 : vector<16xf32> to vector<16x1xf32>
    %cst_192 = arith.constant 3.200000e+01 : f32
    %299 = vector.broadcast %cst_192 : f32 to vector<16x1xf32>
    %300 = arith.divf %298, %299 : vector<16x1xf32>
    %301 = vector.broadcast %293 : vector<16x1xf32> to vector<16x32xf32>
    %302 = arith.subf %285, %301 : vector<16x32xf32>
    %cst_193 = arith.constant 9.99999974E-6 : f32
    %303 = vector.broadcast %cst_193 : f32 to vector<16x1xf32>
    %304 = arith.addf %300, %303 : vector<16x1xf32>
    %305 = math.rsqrt %304 : vector<16x1xf32>
    %306 = vector.broadcast %305 : vector<16x1xf32> to vector<16x32xf32>
    %307 = arith.mulf %302, %306 : vector<16x32xf32>
    %308 = vector.broadcast %287 : vector<1x32xf32> to vector<16x32xf32>
    %309 = arith.mulf %307, %308 : vector<16x32xf32>
    %310 = vector.broadcast %289 : vector<1x32xf32> to vector<16x32xf32>
    %311 = arith.addf %309, %310 : vector<16x32xf32>
    %312 = arith.truncf %311 : vector<16x32xf32> to vector<16x32xbf16>
    %c1_194 = arith.constant 1 : index
    %c0_195 = arith.constant 0 : index
    %c0_196 = arith.constant 0 : index
    %c0_197 = arith.constant 0 : index
    %313 = vector.load %arg8[%c1_194, %c0_195, %c0_196, %c0_197] : memref<2x4x32x8xbf16, #tpu.memory_space<vmem>>, vector<1x1x32x8xbf16>
    %314 = vector.shape_cast %313 : vector<1x1x32x8xbf16> to vector<32x8xbf16>
    %cst_198 = arith.constant dense<0.000000e+00> : vector<16x8xf32>
    %315 = tpu.matmul %312, %314, %cst_198 {dimension_numbers = #tpu.dot_dimension_numbers<[1], [0], [0], [1], [0, 0, 1, 1], [], []>} : vector<16x32xbf16>, vector<32x8xbf16>, vector<16x8xf32> -> vector<16x8xf32>
    %c1_199 = arith.constant 1 : index
    %c0_200 = arith.constant 0 : index
    %c0_201 = arith.constant 0 : index
    %c0_202 = arith.constant 0 : index
    %316 = vector.load %arg11[%c1_199, %c0_200, %c0_201, %c0_202] : memref<2x4x1x8xf32, #tpu.memory_space<vmem>>, vector<1x1x1x8xf32>
    %317 = vector.shape_cast %316 : vector<1x1x1x8xf32> to vector<1x8xf32>
    %318 = vector.broadcast %317 : vector<1x8xf32> to vector<16x8xf32>
    %319 = arith.addf %315, %318 : vector<16x8xf32>
    %320 = vector.shape_cast %319 : vector<16x8xf32> to vector<2x8x8xf32>
    %c1_203 = arith.constant 1 : index
    %c0_204 = arith.constant 0 : index
    %c0_205 = arith.constant 0 : index
    %c0_206 = arith.constant 0 : index
    %321 = vector.load %arg9[%c1_203, %c0_204, %c0_205, %c0_206] : memref<2x4x32x8xbf16, #tpu.memory_space<vmem>>, vector<1x1x32x8xbf16>
    %322 = vector.shape_cast %321 : vector<1x1x32x8xbf16> to vector<32x8xbf16>
    %cst_207 = arith.constant dense<0.000000e+00> : vector<16x8xf32>
    %323 = tpu.matmul %312, %322, %cst_207 {dimension_numbers = #tpu.dot_dimension_numbers<[1], [0], [0], [1], [0, 0, 1, 1], [], []>} : vector<16x32xbf16>, vector<32x8xbf16>, vector<16x8xf32> -> vector<16x8xf32>
    %c1_208 = arith.constant 1 : index
    %c0_209 = arith.constant 0 : index
    %c0_210 = arith.constant 0 : index
    %c0_211 = arith.constant 0 : index
    %324 = vector.load %arg12[%c1_208, %c0_209, %c0_210, %c0_211] : memref<2x4x1x8xf32, #tpu.memory_space<vmem>>, vector<1x1x1x8xf32>
    %325 = vector.shape_cast %324 : vector<1x1x1x8xf32> to vector<1x8xf32>
    %326 = vector.broadcast %325 : vector<1x8xf32> to vector<16x8xf32>
    %327 = arith.addf %323, %326 : vector<16x8xf32>
    %328 = vector.shape_cast %327 : vector<16x8xf32> to vector<2x8x8xf32>
    %c1_212 = arith.constant 1 : index
    %c0_213 = arith.constant 0 : index
    %c0_214 = arith.constant 0 : index
    %c0_215 = arith.constant 0 : index
    %329 = vector.load %arg10[%c1_212, %c0_213, %c0_214, %c0_215] : memref<2x4x32x8xbf16, #tpu.memory_space<vmem>>, vector<1x1x32x8xbf16>
    %330 = vector.shape_cast %329 : vector<1x1x32x8xbf16> to vector<32x8xbf16>
    %cst_216 = arith.constant dense<0.000000e+00> : vector<16x8xf32>
    %331 = tpu.matmul %312, %330, %cst_216 {dimension_numbers = #tpu.dot_dimension_numbers<[1], [0], [0], [1], [0, 0, 1, 1], [], []>} : vector<16x32xbf16>, vector<32x8xbf16>, vector<16x8xf32> -> vector<16x8xf32>
    %c1_217 = arith.constant 1 : index
    %c0_218 = arith.constant 0 : index
    %c0_219 = arith.constant 0 : index
    %c0_220 = arith.constant 0 : index
    %332 = vector.load %arg13[%c1_217, %c0_218, %c0_219, %c0_220] : memref<2x4x1x8xf32, #tpu.memory_space<vmem>>, vector<1x1x1x8xf32>
    %333 = vector.shape_cast %332 : vector<1x1x1x8xf32> to vector<1x8xf32>
    %334 = vector.broadcast %333 : vector<1x8xf32> to vector<16x8xf32>
    %335 = arith.addf %331, %334 : vector<16x8xf32>
    %336 = vector.shape_cast %335 : vector<16x8xf32> to vector<2x8x8xf32>
    %337 = arith.truncf %320 : vector<2x8x8xf32> to vector<2x8x8xbf16>
    %338 = arith.truncf %328 : vector<2x8x8xf32> to vector<2x8x8xbf16>
    "tpu.trace_start"() <{level = 10 : i32, message = "btd,bsd->bts"}> : () -> ()
    %cst_221 = arith.constant dense<0.000000e+00> : vector<2x8x8xf32>
    %339 = tpu.matmul %337, %338, %cst_221 {dimension_numbers = #tpu.dot_dimension_numbers<[2], [2], [1], [1], [0, 0, 0, 1, 1, 1], [0], [0]>} : vector<2x8x8xbf16>, vector<2x8x8xbf16>, vector<2x8x8xf32> -> vector<2x8x8xf32>
    "tpu.trace_stop"() : () -> ()
    %340 = arith.addf %339, %29 : vector<2x8x8xf32>
    %cst_222 = arith.constant dense<0xFF800000> : vector<2x8xf32>
    %341 = vector.multi_reduction <maximumf>, %340, %cst_222 [2] : vector<2x8x8xf32> to vector<2x8xf32>
    %342 = vector.shape_cast %341 : vector<2x8xf32> to vector<2x8x1xf32>
    %343 = vector.broadcast %342 : vector<2x8x1xf32> to vector<2x8x8xf32>
    %344 = arith.subf %340, %343 : vector<2x8x8xf32>
    %345 = math.exp %344 : vector<2x8x8xf32>
    %cst_223 = arith.constant dense<0.000000e+00> : vector<2x8xf32>
    %346 = vector.multi_reduction <add>, %345, %cst_223 [2] : vector<2x8x8xf32> to vector<2x8xf32>
    %347 = vector.shape_cast %346 : vector<2x8xf32> to vector<2x8x1xf32>
    %348 = tpu.reciprocal %347 {approx = true} : vector<2x8x1xf32> -> vector<2x8x1xf32>
    %349 = vector.broadcast %348 : vector<2x8x1xf32> to vector<2x8x8xf32>
    %350 = arith.mulf %345, %349 : vector<2x8x8xf32>
    %351 = arith.truncf %350 : vector<2x8x8xf32> to vector<2x8x8xbf16>
    %352 = arith.truncf %336 : vector<2x8x8xf32> to vector<2x8x8xbf16>
    "tpu.trace_start"() <{level = 10 : i32, message = "bts,bsd->btd"}> : () -> ()
    %cst_224 = arith.constant dense<0.000000e+00> : vector<2x8x8xf32>
    %353 = tpu.matmul %351, %352, %cst_224 {dimension_numbers = #tpu.dot_dimension_numbers<[2], [1], [1], [2], [0, 0, 0, 1, 1, 2], [0], [0]>} : vector<2x8x8xbf16>, vector<2x8x8xbf16>, vector<2x8x8xf32> -> vector<2x8x8xf32>
    "tpu.trace_stop"() : () -> ()
    %354 = vector.shape_cast %353 : vector<2x8x8xf32> to vector<16x8xf32>
    %c1_225 = arith.constant 1 : index
    %c1_226 = arith.constant 1 : index
    %c0_227 = arith.constant 0 : index
    %c0_228 = arith.constant 0 : index
    %355 = vector.load %arg8[%c1_225, %c1_226, %c0_227, %c0_228] : memref<2x4x32x8xbf16, #tpu.memory_space<vmem>>, vector<1x1x32x8xbf16>
    %356 = vector.shape_cast %355 : vector<1x1x32x8xbf16> to vector<32x8xbf16>
    %cst_229 = arith.constant dense<0.000000e+00> : vector<16x8xf32>
    %357 = tpu.matmul %312, %356, %cst_229 {dimension_numbers = #tpu.dot_dimension_numbers<[1], [0], [0], [1], [0, 0, 1, 1], [], []>} : vector<16x32xbf16>, vector<32x8xbf16>, vector<16x8xf32> -> vector<16x8xf32>
    %c1_230 = arith.constant 1 : index
    %c1_231 = arith.constant 1 : index
    %c0_232 = arith.constant 0 : index
    %c0_233 = arith.constant 0 : index
    %358 = vector.load %arg11[%c1_230, %c1_231, %c0_232, %c0_233] : memref<2x4x1x8xf32, #tpu.memory_space<vmem>>, vector<1x1x1x8xf32>
    %359 = vector.shape_cast %358 : vector<1x1x1x8xf32> to vector<1x8xf32>
    %360 = vector.broadcast %359 : vector<1x8xf32> to vector<16x8xf32>
    %361 = arith.addf %357, %360 : vector<16x8xf32>
    %362 = vector.shape_cast %361 : vector<16x8xf32> to vector<2x8x8xf32>
    %c1_234 = arith.constant 1 : index
    %c1_235 = arith.constant 1 : index
    %c0_236 = arith.constant 0 : index
    %c0_237 = arith.constant 0 : index
    %363 = vector.load %arg9[%c1_234, %c1_235, %c0_236, %c0_237] : memref<2x4x32x8xbf16, #tpu.memory_space<vmem>>, vector<1x1x32x8xbf16>
    %364 = vector.shape_cast %363 : vector<1x1x32x8xbf16> to vector<32x8xbf16>
    %cst_238 = arith.constant dense<0.000000e+00> : vector<16x8xf32>
    %365 = tpu.matmul %312, %364, %cst_238 {dimension_numbers = #tpu.dot_dimension_numbers<[1], [0], [0], [1], [0, 0, 1, 1], [], []>} : vector<16x32xbf16>, vector<32x8xbf16>, vector<16x8xf32> -> vector<16x8xf32>
    %c1_239 = arith.constant 1 : index
    %c1_240 = arith.constant 1 : index
    %c0_241 = arith.constant 0 : index
    %c0_242 = arith.constant 0 : index
    %366 = vector.load %arg12[%c1_239, %c1_240, %c0_241, %c0_242] : memref<2x4x1x8xf32, #tpu.memory_space<vmem>>, vector<1x1x1x8xf32>
    %367 = vector.shape_cast %366 : vector<1x1x1x8xf32> to vector<1x8xf32>
    %368 = vector.broadcast %367 : vector<1x8xf32> to vector<16x8xf32>
    %369 = arith.addf %365, %368 : vector<16x8xf32>
    %370 = vector.shape_cast %369 : vector<16x8xf32> to vector<2x8x8xf32>
    %c1_243 = arith.constant 1 : index
    %c1_244 = arith.constant 1 : index
    %c0_245 = arith.constant 0 : index
    %c0_246 = arith.constant 0 : index
    %371 = vector.load %arg10[%c1_243, %c1_244, %c0_245, %c0_246] : memref<2x4x32x8xbf16, #tpu.memory_space<vmem>>, vector<1x1x32x8xbf16>
    %372 = vector.shape_cast %371 : vector<1x1x32x8xbf16> to vector<32x8xbf16>
    %cst_247 = arith.constant dense<0.000000e+00> : vector<16x8xf32>
    %373 = tpu.matmul %312, %372, %cst_247 {dimension_numbers = #tpu.dot_dimension_numbers<[1], [0], [0], [1], [0, 0, 1, 1], [], []>} : vector<16x32xbf16>, vector<32x8xbf16>, vector<16x8xf32> -> vector<16x8xf32>
    %c1_248 = arith.constant 1 : index
    %c1_249 = arith.constant 1 : index
    %c0_250 = arith.constant 0 : index
    %c0_251 = arith.constant 0 : index
    %374 = vector.load %arg13[%c1_248, %c1_249, %c0_250, %c0_251] : memref<2x4x1x8xf32, #tpu.memory_space<vmem>>, vector<1x1x1x8xf32>
    %375 = vector.shape_cast %374 : vector<1x1x1x8xf32> to vector<1x8xf32>
    %376 = vector.broadcast %375 : vector<1x8xf32> to vector<16x8xf32>
    %377 = arith.addf %373, %376 : vector<16x8xf32>
    %378 = vector.shape_cast %377 : vector<16x8xf32> to vector<2x8x8xf32>
    %379 = arith.truncf %362 : vector<2x8x8xf32> to vector<2x8x8xbf16>
    %380 = arith.truncf %370 : vector<2x8x8xf32> to vector<2x8x8xbf16>
    "tpu.trace_start"() <{level = 10 : i32, message = "btd,bsd->bts"}> : () -> ()
    %cst_252 = arith.constant dense<0.000000e+00> : vector<2x8x8xf32>
    %381 = tpu.matmul %379, %380, %cst_252 {dimension_numbers = #tpu.dot_dimension_numbers<[2], [2], [1], [1], [0, 0, 0, 1, 1, 1], [0], [0]>} : vector<2x8x8xbf16>, vector<2x8x8xbf16>, vector<2x8x8xf32> -> vector<2x8x8xf32>
    "tpu.trace_stop"() : () -> ()
    %382 = arith.addf %381, %29 : vector<2x8x8xf32>
    %cst_253 = arith.constant dense<0xFF800000> : vector<2x8xf32>
    %383 = vector.multi_reduction <maximumf>, %382, %cst_253 [2] : vector<2x8x8xf32> to vector<2x8xf32>
    %384 = vector.shape_cast %383 : vector<2x8xf32> to vector<2x8x1xf32>
    %385 = vector.broadcast %384 : vector<2x8x1xf32> to vector<2x8x8xf32>
    %386 = arith.subf %382, %385 : vector<2x8x8xf32>
    %387 = math.exp %386 : vector<2x8x8xf32>
    %cst_254 = arith.constant dense<0.000000e+00> : vector<2x8xf32>
    %388 = vector.multi_reduction <add>, %387, %cst_254 [2] : vector<2x8x8xf32> to vector<2x8xf32>
    %389 = vector.shape_cast %388 : vector<2x8xf32> to vector<2x8x1xf32>
    %390 = tpu.reciprocal %389 {approx = true} : vector<2x8x1xf32> -> vector<2x8x1xf32>
    %391 = vector.broadcast %390 : vector<2x8x1xf32> to vector<2x8x8xf32>
    %392 = arith.mulf %387, %391 : vector<2x8x8xf32>
    %393 = arith.truncf %392 : vector<2x8x8xf32> to vector<2x8x8xbf16>
    %394 = arith.truncf %378 : vector<2x8x8xf32> to vector<2x8x8xbf16>
    "tpu.trace_start"() <{level = 10 : i32, message = "bts,bsd->btd"}> : () -> ()
    %cst_255 = arith.constant dense<0.000000e+00> : vector<2x8x8xf32>
    %395 = tpu.matmul %393, %394, %cst_255 {dimension_numbers = #tpu.dot_dimension_numbers<[2], [1], [1], [2], [0, 0, 0, 1, 1, 2], [0], [0]>} : vector<2x8x8xbf16>, vector<2x8x8xbf16>, vector<2x8x8xf32> -> vector<2x8x8xf32>
    "tpu.trace_stop"() : () -> ()
    %396 = vector.shape_cast %395 : vector<2x8x8xf32> to vector<16x8xf32>
    %c1_256 = arith.constant 1 : index
    %c2_257 = arith.constant 2 : index
    %c0_258 = arith.constant 0 : index
    %c0_259 = arith.constant 0 : index
    %397 = vector.load %arg8[%c1_256, %c2_257, %c0_258, %c0_259] : memref<2x4x32x8xbf16, #tpu.memory_space<vmem>>, vector<1x1x32x8xbf16>
    %398 = vector.shape_cast %397 : vector<1x1x32x8xbf16> to vector<32x8xbf16>
    %cst_260 = arith.constant dense<0.000000e+00> : vector<16x8xf32>
    %399 = tpu.matmul %312, %398, %cst_260 {dimension_numbers = #tpu.dot_dimension_numbers<[1], [0], [0], [1], [0, 0, 1, 1], [], []>} : vector<16x32xbf16>, vector<32x8xbf16>, vector<16x8xf32> -> vector<16x8xf32>
    %c1_261 = arith.constant 1 : index
    %c2_262 = arith.constant 2 : index
    %c0_263 = arith.constant 0 : index
    %c0_264 = arith.constant 0 : index
    %400 = vector.load %arg11[%c1_261, %c2_262, %c0_263, %c0_264] : memref<2x4x1x8xf32, #tpu.memory_space<vmem>>, vector<1x1x1x8xf32>
    %401 = vector.shape_cast %400 : vector<1x1x1x8xf32> to vector<1x8xf32>
    %402 = vector.broadcast %401 : vector<1x8xf32> to vector<16x8xf32>
    %403 = arith.addf %399, %402 : vector<16x8xf32>
    %404 = vector.shape_cast %403 : vector<16x8xf32> to vector<2x8x8xf32>
    %c1_265 = arith.constant 1 : index
    %c2_266 = arith.constant 2 : index
    %c0_267 = arith.constant 0 : index
    %c0_268 = arith.constant 0 : index
    %405 = vector.load %arg9[%c1_265, %c2_266, %c0_267, %c0_268] : memref<2x4x32x8xbf16, #tpu.memory_space<vmem>>, vector<1x1x32x8xbf16>
    %406 = vector.shape_cast %405 : vector<1x1x32x8xbf16> to vector<32x8xbf16>
    %cst_269 = arith.constant dense<0.000000e+00> : vector<16x8xf32>
    %407 = tpu.matmul %312, %406, %cst_269 {dimension_numbers = #tpu.dot_dimension_numbers<[1], [0], [0], [1], [0, 0, 1, 1], [], []>} : vector<16x32xbf16>, vector<32x8xbf16>, vector<16x8xf32> -> vector<16x8xf32>
    %c1_270 = arith.constant 1 : index
    %c2_271 = arith.constant 2 : index
    %c0_272 = arith.constant 0 : index
    %c0_273 = arith.constant 0 : index
    %408 = vector.load %arg12[%c1_270, %c2_271, %c0_272, %c0_273] : memref<2x4x1x8xf32, #tpu.memory_space<vmem>>, vector<1x1x1x8xf32>
    %409 = vector.shape_cast %408 : vector<1x1x1x8xf32> to vector<1x8xf32>
    %410 = vector.broadcast %409 : vector<1x8xf32> to vector<16x8xf32>
    %411 = arith.addf %407, %410 : vector<16x8xf32>
    %412 = vector.shape_cast %411 : vector<16x8xf32> to vector<2x8x8xf32>
    %c1_274 = arith.constant 1 : index
    %c2_275 = arith.constant 2 : index
    %c0_276 = arith.constant 0 : index
    %c0_277 = arith.constant 0 : index
    %413 = vector.load %arg10[%c1_274, %c2_275, %c0_276, %c0_277] : memref<2x4x32x8xbf16, #tpu.memory_space<vmem>>, vector<1x1x32x8xbf16>
    %414 = vector.shape_cast %413 : vector<1x1x32x8xbf16> to vector<32x8xbf16>
    %cst_278 = arith.constant dense<0.000000e+00> : vector<16x8xf32>
    %415 = tpu.matmul %312, %414, %cst_278 {dimension_numbers = #tpu.dot_dimension_numbers<[1], [0], [0], [1], [0, 0, 1, 1], [], []>} : vector<16x32xbf16>, vector<32x8xbf16>, vector<16x8xf32> -> vector<16x8xf32>
    %c1_279 = arith.constant 1 : index
    %c2_280 = arith.constant 2 : index
    %c0_281 = arith.constant 0 : index
    %c0_282 = arith.constant 0 : index
    %416 = vector.load %arg13[%c1_279, %c2_280, %c0_281, %c0_282] : memref<2x4x1x8xf32, #tpu.memory_space<vmem>>, vector<1x1x1x8xf32>
    %417 = vector.shape_cast %416 : vector<1x1x1x8xf32> to vector<1x8xf32>
    %418 = vector.broadcast %417 : vector<1x8xf32> to vector<16x8xf32>
    %419 = arith.addf %415, %418 : vector<16x8xf32>
    %420 = vector.shape_cast %419 : vector<16x8xf32> to vector<2x8x8xf32>
    %421 = arith.truncf %404 : vector<2x8x8xf32> to vector<2x8x8xbf16>
    %422 = arith.truncf %412 : vector<2x8x8xf32> to vector<2x8x8xbf16>
    "tpu.trace_start"() <{level = 10 : i32, message = "btd,bsd->bts"}> : () -> ()
    %cst_283 = arith.constant dense<0.000000e+00> : vector<2x8x8xf32>
    %423 = tpu.matmul %421, %422, %cst_283 {dimension_numbers = #tpu.dot_dimension_numbers<[2], [2], [1], [1], [0, 0, 0, 1, 1, 1], [0], [0]>} : vector<2x8x8xbf16>, vector<2x8x8xbf16>, vector<2x8x8xf32> -> vector<2x8x8xf32>
    "tpu.trace_stop"() : () -> ()
    %424 = arith.addf %423, %29 : vector<2x8x8xf32>
    %cst_284 = arith.constant dense<0xFF800000> : vector<2x8xf32>
    %425 = vector.multi_reduction <maximumf>, %424, %cst_284 [2] : vector<2x8x8xf32> to vector<2x8xf32>
    %426 = vector.shape_cast %425 : vector<2x8xf32> to vector<2x8x1xf32>
    %427 = vector.broadcast %426 : vector<2x8x1xf32> to vector<2x8x8xf32>
    %428 = arith.subf %424, %427 : vector<2x8x8xf32>
    %429 = math.exp %428 : vector<2x8x8xf32>
    %cst_285 = arith.constant dense<0.000000e+00> : vector<2x8xf32>
    %430 = vector.multi_reduction <add>, %429, %cst_285 [2] : vector<2x8x8xf32> to vector<2x8xf32>
    %431 = vector.shape_cast %430 : vector<2x8xf32> to vector<2x8x1xf32>
    %432 = tpu.reciprocal %431 {approx = true} : vector<2x8x1xf32> -> vector<2x8x1xf32>
    %433 = vector.broadcast %432 : vector<2x8x1xf32> to vector<2x8x8xf32>
    %434 = arith.mulf %429, %433 : vector<2x8x8xf32>
    %435 = arith.truncf %434 : vector<2x8x8xf32> to vector<2x8x8xbf16>
    %436 = arith.truncf %420 : vector<2x8x8xf32> to vector<2x8x8xbf16>
    "tpu.trace_start"() <{level = 10 : i32, message = "bts,bsd->btd"}> : () -> ()
    %cst_286 = arith.constant dense<0.000000e+00> : vector<2x8x8xf32>
    %437 = tpu.matmul %435, %436, %cst_286 {dimension_numbers = #tpu.dot_dimension_numbers<[2], [1], [1], [2], [0, 0, 0, 1, 1, 2], [0], [0]>} : vector<2x8x8xbf16>, vector<2x8x8xbf16>, vector<2x8x8xf32> -> vector<2x8x8xf32>
    "tpu.trace_stop"() : () -> ()
    %438 = vector.shape_cast %437 : vector<2x8x8xf32> to vector<16x8xf32>
    %c1_287 = arith.constant 1 : index
    %c3_288 = arith.constant 3 : index
    %c0_289 = arith.constant 0 : index
    %c0_290 = arith.constant 0 : index
    %439 = vector.load %arg8[%c1_287, %c3_288, %c0_289, %c0_290] : memref<2x4x32x8xbf16, #tpu.memory_space<vmem>>, vector<1x1x32x8xbf16>
    %440 = vector.shape_cast %439 : vector<1x1x32x8xbf16> to vector<32x8xbf16>
    %cst_291 = arith.constant dense<0.000000e+00> : vector<16x8xf32>
    %441 = tpu.matmul %312, %440, %cst_291 {dimension_numbers = #tpu.dot_dimension_numbers<[1], [0], [0], [1], [0, 0, 1, 1], [], []>} : vector<16x32xbf16>, vector<32x8xbf16>, vector<16x8xf32> -> vector<16x8xf32>
    %c1_292 = arith.constant 1 : index
    %c3_293 = arith.constant 3 : index
    %c0_294 = arith.constant 0 : index
    %c0_295 = arith.constant 0 : index
    %442 = vector.load %arg11[%c1_292, %c3_293, %c0_294, %c0_295] : memref<2x4x1x8xf32, #tpu.memory_space<vmem>>, vector<1x1x1x8xf32>
    %443 = vector.shape_cast %442 : vector<1x1x1x8xf32> to vector<1x8xf32>
    %444 = vector.broadcast %443 : vector<1x8xf32> to vector<16x8xf32>
    %445 = arith.addf %441, %444 : vector<16x8xf32>
    %446 = vector.shape_cast %445 : vector<16x8xf32> to vector<2x8x8xf32>
    %c1_296 = arith.constant 1 : index
    %c3_297 = arith.constant 3 : index
    %c0_298 = arith.constant 0 : index
    %c0_299 = arith.constant 0 : index
    %447 = vector.load %arg9[%c1_296, %c3_297, %c0_298, %c0_299] : memref<2x4x32x8xbf16, #tpu.memory_space<vmem>>, vector<1x1x32x8xbf16>
    %448 = vector.shape_cast %447 : vector<1x1x32x8xbf16> to vector<32x8xbf16>
    %cst_300 = arith.constant dense<0.000000e+00> : vector<16x8xf32>
    %449 = tpu.matmul %312, %448, %cst_300 {dimension_numbers = #tpu.dot_dimension_numbers<[1], [0], [0], [1], [0, 0, 1, 1], [], []>} : vector<16x32xbf16>, vector<32x8xbf16>, vector<16x8xf32> -> vector<16x8xf32>
    %c1_301 = arith.constant 1 : index
    %c3_302 = arith.constant 3 : index
    %c0_303 = arith.constant 0 : index
    %c0_304 = arith.constant 0 : index
    %450 = vector.load %arg12[%c1_301, %c3_302, %c0_303, %c0_304] : memref<2x4x1x8xf32, #tpu.memory_space<vmem>>, vector<1x1x1x8xf32>
    %451 = vector.shape_cast %450 : vector<1x1x1x8xf32> to vector<1x8xf32>
    %452 = vector.broadcast %451 : vector<1x8xf32> to vector<16x8xf32>
    %453 = arith.addf %449, %452 : vector<16x8xf32>
    %454 = vector.shape_cast %453 : vector<16x8xf32> to vector<2x8x8xf32>
    %c1_305 = arith.constant 1 : index
    %c3_306 = arith.constant 3 : index
    %c0_307 = arith.constant 0 : index
    %c0_308 = arith.constant 0 : index
    %455 = vector.load %arg10[%c1_305, %c3_306, %c0_307, %c0_308] : memref<2x4x32x8xbf16, #tpu.memory_space<vmem>>, vector<1x1x32x8xbf16>
    %456 = vector.shape_cast %455 : vector<1x1x32x8xbf16> to vector<32x8xbf16>
    %cst_309 = arith.constant dense<0.000000e+00> : vector<16x8xf32>
    %457 = tpu.matmul %312, %456, %cst_309 {dimension_numbers = #tpu.dot_dimension_numbers<[1], [0], [0], [1], [0, 0, 1, 1], [], []>} : vector<16x32xbf16>, vector<32x8xbf16>, vector<16x8xf32> -> vector<16x8xf32>
    %c1_310 = arith.constant 1 : index
    %c3_311 = arith.constant 3 : index
    %c0_312 = arith.constant 0 : index
    %c0_313 = arith.constant 0 : index
    %458 = vector.load %arg13[%c1_310, %c3_311, %c0_312, %c0_313] : memref<2x4x1x8xf32, #tpu.memory_space<vmem>>, vector<1x1x1x8xf32>
    %459 = vector.shape_cast %458 : vector<1x1x1x8xf32> to vector<1x8xf32>
    %460 = vector.broadcast %459 : vector<1x8xf32> to vector<16x8xf32>
    %461 = arith.addf %457, %460 : vector<16x8xf32>
    %462 = vector.shape_cast %461 : vector<16x8xf32> to vector<2x8x8xf32>
    %463 = arith.truncf %446 : vector<2x8x8xf32> to vector<2x8x8xbf16>
    %464 = arith.truncf %454 : vector<2x8x8xf32> to vector<2x8x8xbf16>
    "tpu.trace_start"() <{level = 10 : i32, message = "btd,bsd->bts"}> : () -> ()
    %cst_314 = arith.constant dense<0.000000e+00> : vector<2x8x8xf32>
    %465 = tpu.matmul %463, %464, %cst_314 {dimension_numbers = #tpu.dot_dimension_numbers<[2], [2], [1], [1], [0, 0, 0, 1, 1, 1], [0], [0]>} : vector<2x8x8xbf16>, vector<2x8x8xbf16>, vector<2x8x8xf32> -> vector<2x8x8xf32>
    "tpu.trace_stop"() : () -> ()
    %466 = arith.addf %465, %29 : vector<2x8x8xf32>
    %cst_315 = arith.constant dense<0xFF800000> : vector<2x8xf32>
    %467 = vector.multi_reduction <maximumf>, %466, %cst_315 [2] : vector<2x8x8xf32> to vector<2x8xf32>
    %468 = vector.shape_cast %467 : vector<2x8xf32> to vector<2x8x1xf32>
    %469 = vector.broadcast %468 : vector<2x8x1xf32> to vector<2x8x8xf32>
    %470 = arith.subf %466, %469 : vector<2x8x8xf32>
    %471 = math.exp %470 : vector<2x8x8xf32>
    %cst_316 = arith.constant dense<0.000000e+00> : vector<2x8xf32>
    %472 = vector.multi_reduction <add>, %471, %cst_316 [2] : vector<2x8x8xf32> to vector<2x8xf32>
    %473 = vector.shape_cast %472 : vector<2x8xf32> to vector<2x8x1xf32>
    %474 = tpu.reciprocal %473 {approx = true} : vector<2x8x1xf32> -> vector<2x8x1xf32>
    %475 = vector.broadcast %474 : vector<2x8x1xf32> to vector<2x8x8xf32>
    %476 = arith.mulf %471, %475 : vector<2x8x8xf32>
    %477 = arith.truncf %476 : vector<2x8x8xf32> to vector<2x8x8xbf16>
    %478 = arith.truncf %462 : vector<2x8x8xf32> to vector<2x8x8xbf16>
    "tpu.trace_start"() <{level = 10 : i32, message = "bts,bsd->btd"}> : () -> ()
    %cst_317 = arith.constant dense<0.000000e+00> : vector<2x8x8xf32>
    %479 = tpu.matmul %477, %478, %cst_317 {dimension_numbers = #tpu.dot_dimension_numbers<[2], [1], [1], [2], [0, 0, 0, 1, 1, 2], [0], [0]>} : vector<2x8x8xbf16>, vector<2x8x8xbf16>, vector<2x8x8xf32> -> vector<2x8x8xf32>
    "tpu.trace_stop"() : () -> ()
    %480 = vector.shape_cast %479 : vector<2x8x8xf32> to vector<16x8xf32>
    %481 = tpu.concatenate %354, %396, %438, %480 in 1 : vector<16x8xf32>, vector<16x8xf32>, vector<16x8xf32>, vector<16x8xf32> -> vector<16x32xf32>
    %482 = arith.truncf %481 : vector<16x32xf32> to vector<16x32xbf16>
    %c1_318 = arith.constant 1 : index
    %c0_319 = arith.constant 0 : index
    %c0_320 = arith.constant 0 : index
    %483 = vector.load %arg14[%c1_318, %c0_319, %c0_320] : memref<2x32x32xbf16, #tpu.memory_space<vmem>>, vector<1x32x32xbf16>
    %484 = vector.shape_cast %483 : vector<1x32x32xbf16> to vector<32x32xbf16>
    %cst_321 = arith.constant dense<0.000000e+00> : vector<16x32xf32>
    %485 = tpu.matmul %482, %484, %cst_321 {dimension_numbers = #tpu.dot_dimension_numbers<[1], [0], [0], [1], [0, 0, 1, 1], [], []>} : vector<16x32xbf16>, vector<32x32xbf16>, vector<16x32xf32> -> vector<16x32xf32>
    %c1_322 = arith.constant 1 : index
    %c0_323 = arith.constant 0 : index
    %c0_324 = arith.constant 0 : index
    %486 = vector.load %arg15[%c1_322, %c0_323, %c0_324] : memref<2x1x32xf32, #tpu.memory_space<vmem>>, vector<1x1x32xf32>
    %487 = vector.shape_cast %486 : vector<1x1x32xf32> to vector<1x32xf32>
    %488 = vector.broadcast %487 : vector<1x32xf32> to vector<16x32xf32>
    %489 = arith.addf %485, %488 : vector<16x32xf32>
    %490 = arith.addf %285, %489 : vector<16x32xf32>
    %c1_325 = arith.constant 1 : index
    %c0_326 = arith.constant 0 : index
    %c0_327 = arith.constant 0 : index
    %491 = vector.load %arg16[%c1_325, %c0_326, %c0_327] : memref<2x1x32xf32, #tpu.memory_space<vmem>>, vector<1x1x32xf32>
    %492 = vector.shape_cast %491 : vector<1x1x32xf32> to vector<1x32xf32>
    %c1_328 = arith.constant 1 : index
    %c0_329 = arith.constant 0 : index
    %c0_330 = arith.constant 0 : index
    %493 = vector.load %arg17[%c1_328, %c0_329, %c0_330] : memref<2x1x32xf32, #tpu.memory_space<vmem>>, vector<1x1x32xf32>
    %494 = vector.shape_cast %493 : vector<1x1x32xf32> to vector<1x32xf32>
    %cst_331 = arith.constant dense<0.000000e+00> : vector<16xf32>
    %495 = vector.multi_reduction <add>, %490, %cst_331 [1] : vector<16x32xf32> to vector<16xf32>
    %496 = vector.shape_cast %495 : vector<16xf32> to vector<16x1xf32>
    %cst_332 = arith.constant 3.200000e+01 : f32
    %497 = vector.broadcast %cst_332 : f32 to vector<16x1xf32>
    %498 = arith.divf %496, %497 : vector<16x1xf32>
    %499 = vector.broadcast %498 : vector<16x1xf32> to vector<16x32xf32>
    %500 = arith.subf %490, %499 : vector<16x32xf32>
    %501 = arith.mulf %500, %500 : vector<16x32xf32>
    %cst_333 = arith.constant dense<0.000000e+00> : vector<16xf32>
    %502 = vector.multi_reduction <add>, %501, %cst_333 [1] : vector<16x32xf32> to vector<16xf32>
    %503 = vector.shape_cast %502 : vector<16xf32> to vector<16x1xf32>
    %cst_334 = arith.constant 3.200000e+01 : f32
    %504 = vector.broadcast %cst_334 : f32 to vector<16x1xf32>
    %505 = arith.divf %503, %504 : vector<16x1xf32>
    %506 = vector.broadcast %498 : vector<16x1xf32> to vector<16x32xf32>
    %507 = arith.subf %490, %506 : vector<16x32xf32>
    %cst_335 = arith.constant 9.99999974E-6 : f32
    %508 = vector.broadcast %cst_335 : f32 to vector<16x1xf32>
    %509 = arith.addf %505, %508 : vector<16x1xf32>
    %510 = math.rsqrt %509 : vector<16x1xf32>
    %511 = vector.broadcast %510 : vector<16x1xf32> to vector<16x32xf32>
    %512 = arith.mulf %507, %511 : vector<16x32xf32>
    %513 = vector.broadcast %492 : vector<1x32xf32> to vector<16x32xf32>
    %514 = arith.mulf %512, %513 : vector<16x32xf32>
    %515 = vector.broadcast %494 : vector<1x32xf32> to vector<16x32xf32>
    %516 = arith.addf %514, %515 : vector<16x32xf32>
    %517 = arith.truncf %516 : vector<16x32xf32> to vector<16x32xbf16>
    %c1_336 = arith.constant 1 : index
    %c0_337 = arith.constant 0 : index
    %c0_338 = arith.constant 0 : index
    %518 = vector.load %arg18[%c1_336, %c0_337, %c0_338] : memref<2x32x128xbf16, #tpu.memory_space<vmem>>, vector<1x32x128xbf16>
    %519 = vector.shape_cast %518 : vector<1x32x128xbf16> to vector<32x128xbf16>
    %cst_339 = arith.constant dense<0.000000e+00> : vector<16x128xf32>
    %520 = tpu.matmul %517, %519, %cst_339 {dimension_numbers = #tpu.dot_dimension_numbers<[1], [0], [0], [1], [0, 0, 1, 1], [], []>} : vector<16x32xbf16>, vector<32x128xbf16>, vector<16x128xf32> -> vector<16x128xf32>
    %c1_340 = arith.constant 1 : index
    %c0_341 = arith.constant 0 : index
    %c0_342 = arith.constant 0 : index
    %521 = vector.load %arg19[%c1_340, %c0_341, %c0_342] : memref<2x1x128xf32, #tpu.memory_space<vmem>>, vector<1x1x128xf32>
    %522 = vector.shape_cast %521 : vector<1x1x128xf32> to vector<1x128xf32>
    %523 = vector.broadcast %522 : vector<1x128xf32> to vector<16x128xf32>
    %524 = arith.addf %520, %523 : vector<16x128xf32>
    %cst_343 = arith.constant 1.702000e+00 : f32
    %525 = vector.broadcast %cst_343 : f32 to vector<16x128xf32>
    %526 = arith.mulf %525, %524 : vector<16x128xf32>
    %527 = arith.negf %526 : vector<16x128xf32>
    %528 = math.exp %527 : vector<16x128xf32>
    %cst_344 = arith.constant 1.000000e+00 : f32
    %529 = vector.broadcast %cst_344 : f32 to vector<16x128xf32>
    %530 = arith.addf %529, %528 : vector<16x128xf32>
    %531 = arith.divf %529, %530 : vector<16x128xf32>
    %532 = arith.mulf %524, %531 : vector<16x128xf32>
    %533 = arith.truncf %532 : vector<16x128xf32> to vector<16x128xbf16>
    %c1_345 = arith.constant 1 : index
    %c0_346 = arith.constant 0 : index
    %c0_347 = arith.constant 0 : index
    %534 = vector.load %arg20[%c1_345, %c0_346, %c0_347] : memref<2x128x32xbf16, #tpu.memory_space<vmem>>, vector<1x128x32xbf16>
    %535 = vector.shape_cast %534 : vector<1x128x32xbf16> to vector<128x32xbf16>
    %cst_348 = arith.constant dense<0.000000e+00> : vector<16x32xf32>
    %536 = tpu.matmul %533, %535, %cst_348 {dimension_numbers = #tpu.dot_dimension_numbers<[1], [0], [0], [1], [0, 0, 1, 1], [], []>} : vector<16x128xbf16>, vector<128x32xbf16>, vector<16x32xf32> -> vector<16x32xf32>
    %537 = arith.addf %490, %536 : vector<16x32xf32>
    %c1_349 = arith.constant 1 : index
    %c0_350 = arith.constant 0 : index
    %c0_351 = arith.constant 0 : index
    %538 = vector.load %arg21[%c1_349, %c0_350, %c0_351] : memref<2x1x32xf32, #tpu.memory_space<vmem>>, vector<1x1x32xf32>
    %539 = vector.shape_cast %538 : vector<1x1x32xf32> to vector<1x32xf32>
    %540 = vector.broadcast %539 : vector<1x32xf32> to vector<16x32xf32>
    %541 = arith.addf %537, %540 : vector<16x32xf32>
    %542 = vector.shape_cast %541 : vector<16x32xf32> to vector<2x8x32xf32>
    %543 = vector.extract_strided_slice %542 {offsets = [0, 0, 0], sizes = [2, 1, 32], strides = [1, 1, 1]} : vector<2x8x32xf32> to vector<2x1x32xf32>
    %544 = vector.shape_cast %543 : vector<2x1x32xf32> to vector<2x32xf32>
    %c0_352 = arith.constant 0 : index
    %c0_353 = arith.constant 0 : index
    %545 = vector.load %arg22[%c0_352, %c0_353] : memref<1x32xf32, #tpu.memory_space<vmem>>, vector<1x32xf32>
    %c0_354 = arith.constant 0 : index
    %c0_355 = arith.constant 0 : index
    %546 = vector.load %arg23[%c0_354, %c0_355] : memref<1x32xf32, #tpu.memory_space<vmem>>, vector<1x32xf32>
    %cst_356 = arith.constant dense<0.000000e+00> : vector<2xf32>
    %547 = vector.multi_reduction <add>, %544, %cst_356 [1] : vector<2x32xf32> to vector<2xf32>
    %548 = vector.shape_cast %547 : vector<2xf32> to vector<2x1xf32>
    %cst_357 = arith.constant 3.200000e+01 : f32
    %549 = vector.broadcast %cst_357 : f32 to vector<2x1xf32>
    %550 = arith.divf %548, %549 : vector<2x1xf32>
    %551 = vector.broadcast %550 : vector<2x1xf32> to vector<2x32xf32>
    %552 = arith.subf %544, %551 : vector<2x32xf32>
    %553 = arith.mulf %552, %552 : vector<2x32xf32>
    %cst_358 = arith.constant dense<0.000000e+00> : vector<2xf32>
    %554 = vector.multi_reduction <add>, %553, %cst_358 [1] : vector<2x32xf32> to vector<2xf32>
    %555 = vector.shape_cast %554 : vector<2xf32> to vector<2x1xf32>
    %cst_359 = arith.constant 3.200000e+01 : f32
    %556 = vector.broadcast %cst_359 : f32 to vector<2x1xf32>
    %557 = arith.divf %555, %556 : vector<2x1xf32>
    %558 = vector.broadcast %550 : vector<2x1xf32> to vector<2x32xf32>
    %559 = arith.subf %544, %558 : vector<2x32xf32>
    %cst_360 = arith.constant 9.99999974E-6 : f32
    %560 = vector.broadcast %cst_360 : f32 to vector<2x1xf32>
    %561 = arith.addf %557, %560 : vector<2x1xf32>
    %562 = math.rsqrt %561 : vector<2x1xf32>
    %563 = vector.broadcast %562 : vector<2x1xf32> to vector<2x32xf32>
    %564 = arith.mulf %559, %563 : vector<2x32xf32>
    %565 = vector.broadcast %545 : vector<1x32xf32> to vector<2x32xf32>
    %566 = arith.mulf %564, %565 : vector<2x32xf32>
    %567 = vector.broadcast %546 : vector<1x32xf32> to vector<2x32xf32>
    %568 = arith.addf %566, %567 : vector<2x32xf32>
    %569 = arith.truncf %568 : vector<2x32xf32> to vector<2x32xbf16>
    %c0_361 = arith.constant 0 : index
    %c0_362 = arith.constant 0 : index
    %570 = vector.load %arg24[%c0_361, %c0_362] : memref<32x128xbf16, #tpu.memory_space<vmem>>, vector<32x128xbf16>
    %cst_363 = arith.constant dense<0.000000e+00> : vector<2x128xf32>
    %571 = tpu.matmul %569, %570, %cst_363 {dimension_numbers = #tpu.dot_dimension_numbers<[1], [0], [0], [1], [0, 0, 1, 1], [], []>} : vector<2x32xbf16>, vector<32x128xbf16>, vector<2x128xf32> -> vector<2x128xf32>
    %572 = arith.mulf %571, %571 : vector<2x128xf32>
    %cst_364 = arith.constant dense<0.000000e+00> : vector<2xf32>
    %573 = vector.multi_reduction <add>, %572, %cst_364 [1] : vector<2x128xf32> to vector<2xf32>
    %574 = vector.shape_cast %573 : vector<2xf32> to vector<2x1xf32>
    %575 = math.rsqrt %574 : vector<2x1xf32>
    %576 = vector.broadcast %575 : vector<2x1xf32> to vector<2x128xf32>
    %577 = arith.mulf %571, %576 : vector<2x128xf32>
    %c0_365 = arith.constant 0 : index
    %c0_366 = arith.constant 0 : index
    %578 = vector.load %arg25[%c0_365, %c0_366] : memref<2x128xf32, #tpu.memory_space<vmem>>, vector<2x128xf32>
    tpu.vector_store %arg25[%c0_365, %c0_366], %577 {strides = array<i32>} : memref<2x128xf32, #tpu.memory_space<vmem>>, vector<2x128xf32>,
    return
  }
}

</mosaic_0001>

<bundles_post_ra>
// kernel: clip_forward.1
= control target key start
LH: loop header
LB: loop body
LE: loop exit
PB: predicated region body
PF: predicated region fallthrough
CT: control target
= control target key end

     0   :  { %s4581_s0 = inlined_call_operand.vmem [shape: bf16[16,192], index: 0, kind: input, shape index: {}]   ;;  %s4582_s1 = inlined_call_operand.vmem [shape: bf16[192,32], index: 1, kind: input, shape index: {}]   ;;  %s4583_s2 = inlined_call_operand.vmem [shape: f32[16,32], index: 2, kind: input, shape index: {}]   ;;  %s4584_s3 = inlined_call_operand.vmem [shape: f32[2,8,8], index: 3, kind: input, shape index: {}]   ;;  %s4585_s4 = inlined_call_operand.vmem [shape: f32[1,32], index: 4, kind: input, shape index: {}]   ;;  %s4586_s5 = inlined_call_operand.vmem [shape: f32[1,32], index: 5, kind: input, shape index: {}]   ;;  %s4587_s6 = inlined_call_operand.vmem [shape: f32[2,1,32], index: 6, kind: input, shape index: {}]   ;;  %s4588_s7 = inlined_call_operand.vmem [shape: f32[2,1,32], index: 7, kind: input, shape index: {}]   ;;  %s4589_s8 = inlined_call_operand.vmem [shape: bf16[2,4,32,8], index: 8, kind: input, shape index: {}]   ;;  %s4590_s9 = inlined_call_operand.vmem [shape: bf16[2,4,32,8], index: 9, kind: input, shape index: {}]   ;;  %s4591_s10 = inlined_call_operand.vmem [shape: bf16[2,4,32,8], index: 10, kind: input, shape index: {}]   ;;  %s4592_s11 = inlined_call_operand.vmem [shape: f32[2,4,1,8], index: 11, kind: input, shape index: {}]   ;;  %s4593_s12 = inlined_call_operand.vmem [shape: f32[2,4,1,8], index: 12, kind: input, shape index: {}]   ;;  %s4594_s13 = inlined_call_operand.vmem [shape: f32[2,4,1,8], index: 13, kind: input, shape index: {}]   ;;  %s4595_s14 = inlined_call_operand.vmem [shape: bf16[2,32,32], index: 14, kind: input, shape index: {}]   ;;  %s4596_s15 = inlined_call_operand.vmem [shape: f32[2,1,32], index: 15, kind: input, shape index: {}]   ;;  %s4597_s16 = inlined_call_operand.vmem [shape: f32[2,1,32], index: 16, kind: input, shape index: {}]   ;;  %s4598_s17 = inlined_call_operand.vmem [shape: f32[2,1,32], index: 17, kind: input, shape index: {}]   ;;  %s4599_s18 = inlined_call_operand.vmem [shape: bf16[2,32,128], index: 18, kind: input, shape index: {}]   ;;  %s4600_s19 = inlined_call_operand.vmem [shape: f32[2,1,128], index: 19, kind: input, shape index: {}]   ;;  %s4601_s20 = inlined_call_operand.vmem [shape: bf16[2,128,32], index: 20, kind: input, shape index: {}]   ;;  %s4602_s21 = inlined_call_operand.vmem [shape: f32[2,1,32], index: 21, kind: input, shape index: {}]   ;;  %s4603_s22 = inlined_call_operand.vmem [shape: f32[1,32], index: 22, kind: input, shape index: {}]   ;;  %s4604_s23 = inlined_call_operand.vmem [shape: f32[1,32], index: 23, kind: input, shape index: {}]   ;;  %s4605_s24 = inlined_call_operand.vmem [shape: bf16[32,128], index: 24, kind: input, shape index: {}]   ;;  %s4606_s25 = inlined_call_operand.hbm [shape: f32[2,128], index: 25, kind: output, shape index: {}]  }
   0x1   :  { %4618 = sst [smem:[#allocation5_spill]] %s4581_s0 }
   0x2   :  { %4619 = sst [smem:[#allocation6_spill]] %s4582_s1 }
   0x3   :  { %4620 = sst [smem:[#allocation7_spill]] %s4583_s2 }
   0x4   :  { %4621 = sst [smem:[#allocation8_spill]] %s4584_s3 }
   0x5   :  { %4622 = sst [smem:[#allocation9_spill]] %s4585_s4 }
   0x6   :  { %4623 = sst [smem:[#allocation10_spill]] %s4586_s5 }
   0x7   :  { %4624 = sst [smem:[#allocation11_spill]] %s4587_s6 }
   0x8   :  { %4625 = sst [smem:[#allocation12_spill]] %s4588_s7 }
   0x9   :  { %4626 = sst [smem:[#allocation13_spill]] %s4589_s8 }
   0xa   :  { %4627 = sst [smem:[#allocation14_spill]] %s4590_s9 }
   0xb   :  { %s4628_s6 = sld [smem:[#allocation6_spill]]  ;;  %vm191_vm0 = vcmask 523264  }
   0xc   :  { %s4629_s3 = sld [smem:[#allocation5_spill]] }
  0x11   :  { %v3409_v0 = vld [vmem:[%s4628_s6 + $0x38] sm:$0xff]  ;;  %v3408_v2 = vld [vmem:[%s4628_s6 + $0x30] sm:$0xff]  ;;  %v3407_v4 = vld [vmem:[%s4628_s6 + $0x28] sm:$0xff] }
  0x12   :  { %v3413_v1 = vld [vmem:[%s4628_s6 + $0x58] sm:$0xff]  ;;  %195 = vmatpush.bf16.msra.mxu0 %v3409_v0  ;;  %v3412_v3 = vld [vmem:[%s4628_s6 + $0x50] sm:$0xff]  ;;  %v3411_v5 = vld [vmem:[%s4628_s6 + $0x48] sm:$0xff] }
  0x13   :  { %213 = vmatpush.bf16.msra.mxu1 %v3413_v1  ;;  %v3406_v6 = vld [vmem:[%s4628_s6 + $0x20] sm:$0xff]  ;;  %v2850_v9 = vld [vmem:[%s4629_s3 + $0x8] sm:$0xf0]  ;;  %v3405_v10 = vld [vmem:[%s4628_s6 + $0x18] sm:$0xff] }
  0x14   :  { %v3410_v7 = vld [vmem:[%s4628_s6 + $0x40] sm:$0xff]  ;;  %v3404_v12 = vld [vmem:[%s4628_s6 + $0x10] sm:$0xff] }
  0x15   :  { %v3400_v8 = vld [vmem:[%s4629_s3 + $0x4] sm:$0xf] }
  0x16   :  { %196 = vmatpush.bf16.msra.mxu0 %v3408_v2  ;;  %v2853_v11 = vor.u32 %v3400_v8, %v2850_v9 }
  0x17   :  { %214 = vmatpush.bf16.msra.mxu1 %v3412_v3 }
  0x1a   :  { %197 = vmatpush.bf16.msra.mxu0 %v3407_v4 }
  0x1b   :  { %215 = vmatpush.bf16.msra.mxu1 %v3411_v5 }
  0x1e   :  { %198 = vmatpush.bf16.msra.mxu0 %v3406_v6 }
  0x1f   :  { %216 = vmatpush.bf16.msra.mxu1 %v3410_v7 }
  0x22   :  { %199 = vmatpush.bf16.msra.mxu0 %v3405_v10  ;;  %2902 = vmatmul.msk.bf16.vlgmr.msra.gmra.mxu1 %vm191_vm0, %v2853_v11 }
  0x23   :  { %30 = vsyncpa [#allocation3], 0  ;;  %v3403_v13 = vld [vmem:[%s4628_s6 + $0x8] sm:$0xff]  ;;  %v3402_v14 = vld [vmem:[%s4628_s6] sm:$0xff]  ;;  %s4630_s27 = sld [smem:[#allocation7_spill]]  ;;  %vm225_vm1 = vcmask 261120  }
  0x24   :  { %v2848_v15 = vld [vmem:[%s4629_s3] sm:$0xf]  ;;  %v3401_v16 = vld [vmem:[%s4629_s3 + $0x4] sm:$0xf0]  ;;  %v3699_v30 = vmov 32.0   ;;  %s4631_s9 = sld [smem:[#allocation9_spill]] }
  0x25   :  { %v2849_v17 = vor.u32 %v3401_v16, %v2848_v15  ;;  %3565 = vrcp.f32 %v3699_v30  ;;  %s4632_s29 = sld [smem:[#allocation10_spill]]  ;;  %vm455_vm15 = vcmask 64512   ;;  %vm523_vm0 = vcmask 1043456   ;;  %s4617_s5 = smov 8  }
  0x26   :  { %200 = vmatpush.bf16.msra.mxu0 %v3404_v12  ;;  %s4633_s7 = sld [smem:[#allocation13_spill]]  ;;  %s4615_s30 = smov 24  }
  0x27   :  { %s4634_s8 = sld [smem:[#allocation14_spill]]  ;;  %s4640_s1 = smov 24  }
  0x28   :  { %s4635_s6 = sld [smem:[#allocation11_spill]] }
  0x29   :  { %v108_v18 = vld [vmem:[%s4630_s27] sm:$0xff]  ;;  %v109_v24 = vld [vmem:[%s4630_s27 + $0x8] sm:$0xff]  ;;  %s4636_s28 = sld [smem:[#allocation12_spill]] }
  0x2a   :  { %201 = vmatpush.bf16.msra.mxu0 %v3403_v13  ;;  %v3523_v61 = vld [vmem:[%s4631_s9] ss:$0 sm:$0xff]  ;;  %s4616_s9 = smov 16  }
  0x2b   :  { %v3566_v31 = vpop.eup %3565  ;;  %v3524_v1 = vld [vmem:[%s4632_s29] ss:$0 sm:$0xff]  ;;  %s4637_s29 = sld [smem:[#allocation8_spill]] }
  0x2c   :  { %v233_v32 = vmul.f32 32.0, %v3566_v31  ;;  %vm237_vm2 = vweird.f32 %v3566_v31  ;;  %v3420_v30 = vld [vmem:[%s4633_s7 + $0x10] sm:$0xff] }
  0x2e   :  { %202 = vmatpush.bf16.msra.mxu0 %v3402_v14  ;;  %v234_v33 = vsub.f32 1.0, %v233_v32 }
  0x30   :  { %v235_v34 = vmul.f32 %v3566_v31, %v234_v33  ;;  %v3419_v33 = vld [vmem:[%s4591_s10 + $0x8] sm:$0xff] }
  0x31   :  { %203 = vmatmul.bf16.vlgmr.msra.gmra.mxu0 %v2849_v17 }
  0x32   :  { %v236_v35 = vadd.f32 %v3566_v31, %v235_v34 }
  0x34   :  { %v3890_v36 = vsel %vm237_vm2, %v3566_v31, %v236_v35  ;;  %v3418_v35 = vld [vmem:[%s4591_s10] sm:$0xff]  ;;  %vm1227_vm2 = vcmask 130048  }
  0x9f   :  { %v218_v19 = vpop.f32.mrf.mxu1 }
  0xa7   :  { %v220_v27 = vpop.f32.mrf.mxu1 }
  0xae   :  { %v204_v20 = vpop.f32.mrf.mxu0 }
  0xaf   :  { %v205_v21 = vadd.f32 %v204_v20, %v108_v18 }
  0xb1   :  { %v219_v22 = vadd.f32 %v218_v19, %v205_v21 }
  0xb3   :  { %v226_v23 = vsel %vm225_vm1, %v219_v22, 0.0 }
  0xb4   :  { %227 = vadd.xlane.f32.xlu0 %v226_v23  ;;  %v3415_v23 = vld [vmem:[%s4633_s7 + $0x8] sm:$0xff] }
  0xb5   :  { %375 = vmatpush.bf16.msra.mxu2 %v3415_v23 }
  0xb6   :  { %v206_v25 = vpop.f32.mrf.mxu0 }
  0xb7   :  { %v207_v26 = vadd.f32 %v206_v25, %v109_v24  ;;  %v3417_v24 = vld [vmem:[%s4634_s8 + $0x8] sm:$0xff]  ;;  %v3421_v25 = vld [vmem:[%s4633_s7 + $0x18] sm:$0xff] }
  0xb8   :  { %409 = vmatpush.bf16.msrb.mxu1 %v3417_v24  ;;  %587 = vmatpush.bf16.msrb.mxu0 %v3421_v25 }
  0xb9   :  { %v221_v28 = vadd.f32 %v220_v27, %v207_v26 }
  0xbb   :  { %v229_v29 = vsel %vm225_vm1, %v221_v28, 0.0 }
  0xbc   :  { %230 = vadd.xlane.f32.xlu0 %v229_v29  ;;  %v3416_v29 = vld [vmem:[%s4634_s8] sm:$0xff]  ;;  %588 = vmatpush.bf16.msrb.mxu0 %v3420_v30 }
  0xbd   :  { %410 = vmatpush.bf16.msrb.mxu1 %v3416_v29  ;;  %v3994_v29 = vld [vmem:[%s4637_s29] sm:$0xff] }
 0x127   :  { %v228_v37 = vpop.xlane.xlu0 %227 }
 0x128   :  { %v239_v38 = vmul.f32 %v3890_v36, %v228_v37 }
 0x12a   :  { %v241_v39 = vsub.f32 %v219_v22, %v239_v38 }
 0x12c   :  { %v243_v40 = vmul.f32 %v241_v39, %v241_v39 }
 0x12e   :  { %v245_v41 = vsel %vm225_vm1, %v243_v40, 0.0 }
 0x12f   :  { %246 = vadd.xlane.f32.xlu1 %v245_v41  ;;  %v231_v42 = vpop.xlane.xlu0 %230 }
 0x130   :  { %v240_v43 = vmul.f32 %v3890_v36, %v231_v42 }
 0x132   :  { %v242_v44 = vsub.f32 %v221_v28, %v240_v43  ;;  %v3414_v28 = vld [vmem:[%s4633_s7] sm:$0xff] }
 0x133   :  { %376 = vmatpush.bf16.msra.mxu2 %v3414_v28 }
 0x134   :  { %v244_v45 = vmul.f32 %v242_v44, %v242_v44 }
 0x136   :  { %v248_v46 = vsel %vm225_vm1, %v244_v45, 0.0 }
 0x137   :  { %249 = vadd.xlane.f32.xlu1 %v248_v46  ;;  %443 = vmatpush.bf16.msrb.mxu2 %v3419_v33 }
 0x13b   :  { %444 = vmatpush.bf16.msrb.mxu2 %v3418_v35 }
 0x1a2   :  { %v247_v47 = vpop.xlane.xlu1 %246 }
 0x1a3   :  { %v251_v48 = vmul.f32 %v247_v47, %v3890_v36 }
 0x1a5   :  { %v253_v49 = vadd.f32 1e-05, %v251_v48 }
 0x1a7   :  { %3567 = vrsqrt.f32 %v253_v49  ;;  %vm261_vm4 = vweird.f32 %v253_v49 }
 0x1aa   :  { %v250_v50 = vpop.xlane.xlu1 %249 }
 0x1ab   :  { %v252_v51 = vmul.f32 %v250_v50, %v3890_v36  ;;  %v3525_v50 = vld [vmem:[%s4635_s6] ss:$0 sm:$0xff] }
 0x1ad   :  { %v3568_v52 = vpop.eup %3567  ;;  %v254_v53 = vadd.f32 1e-05, %v252_v51 }
 0x1ae   :  { %v256_v54 = vmul.f32 %v3568_v52, %v253_v49  ;;  %vm262_vm3 = vweird.f32 %v3568_v52 }
 0x1af   :  { %3569 = vrsqrt.f32 %v254_v53  ;;  %vm263_vm5 = vmor %vm261_vm4, %vm262_vm3  ;;  %vm271_vm7 = vweird.f32 %v254_v53  ;;  %vm1230_vm3 = vcmask 195584  }
 0x1b0   :  { %v257_v55 = vmul.f32 %v3568_v52, %v256_v54  ;;  %v3526_v54 = vld [vmem:[%s4636_s28] ss:$0 sm:$0xff] }
 0x1b2   :  { %v258_v56 = vmul.f32 0.5, %v257_v55 }
 0x1b4   :  { %v259_v57 = vsub.f32 1.5, %v258_v56 }
 0x1b5   :  { %v3570_v58 = vpop.eup %3569 }
 0x1b6   :  { %v260_v59 = vmul.f32 %v3568_v52, %v259_v57  ;;  %v266_v60 = vmul.f32 %v3570_v58, %v254_v53  ;;  %vm272_vm6 = vweird.f32 %v3570_v58 }
 0x1b7   :  { %vm273_vm8 = vmor %vm271_vm7, %vm272_vm6 }
 0x1b8   :  { %v264_v62 = vsel %vm263_vm5, %v3568_v52, %v260_v59  ;;  %v267_v63 = vmul.f32 %v3570_v58, %v266_v60 }
 0x1b9   :  { %v275_v0 = vmul.f32 %v264_v62, %v241_v39  ;;  %v3966_v62 = vld [vmem:[%s4592_s11 + $0x1] ss:$0 sm:$0xff] }
 0x1ba   :  { %v268_v2 = vmul.f32 0.5, %v267_v63 }
 0x1bb   :  { %v280_v3 = vmul.f32 %v3523_v61, %v275_v0 }
 0x1bc   :  { %v269_v4 = vsub.f32 1.5, %v268_v2 }
 0x1bd   :  { %v3904_v5 = vadd.f32 %v3524_v1, %v280_v3 }
 0x1be   :  { %v270_v6 = vmul.f32 %v3570_v58, %v269_v4  ;;  %v3529_v4 = vld [vmem:[%s4592_s11] ss:$0 sm:$0xff] }
 0x1bf   :  { %v291_v7 = vsel %vm225_vm1, %v3904_v5, 0.0 }
 0x1c0   :  { %v274_v8 = vsel %vm273_vm8, %v3570_v58, %v270_v6  ;;  %292 = vadd.xlane.f32.xlu2 %v291_v7 }
 0x1c1   :  { %v276_v9 = vmul.f32 %v274_v8, %v242_v44 }
 0x1c3   :  { %v281_v10 = vmul.f32 %v3523_v61, %v276_v9  ;;  %v3527_v61 = vld [vmem:[%s4593_s12] ss:$0 sm:$0xff] }
 0x1c5   :  { %v3908_v11 = vadd.f32 %v3524_v1, %v281_v10 }
 0x1c7   :  { %v294_v12 = vsel %vm225_vm1, %v3908_v11, 0.0 }
 0x1c8   :  { %295 = vadd.xlane.f32.xlu2 %v294_v12 }
 0x233   :  { %v293_v13 = vpop.xlane.xlu2 %292 }
 0x234   :  { %v297_v14 = vmul.f32 %v293_v13, %v3890_v36 }
 0x236   :  { %v299_v15 = vsub.f32 %v3904_v5, %v297_v14  ;;  %v3423_v14 = vld [vmem:[%s4634_s8 + $0x18] sm:$0xff] }
 0x238   :  { %v301_v16 = vmul.f32 %v299_v15, %v299_v15 }
 0x23a   :  { %v303_v17 = vsel %vm225_vm1, %v301_v16, 0.0 }
 0x23b   :  { %304 = vadd.xlane.f32.xlu0 %v303_v17  ;;  %v296_v18 = vpop.xlane.xlu2 %295 }
 0x23c   :  { %v298_v19 = vmul.f32 %v296_v18, %v3890_v36  ;;  %v3422_v18 = vld [vmem:[%s4634_s8 + $0x10] sm:$0xff] }
 0x23e   :  { %v300_v20 = vsub.f32 %v3908_v11, %v298_v19 }
 0x240   :  { %v302_v21 = vmul.f32 %v300_v20, %v300_v20 }
 0x242   :  { %v306_v22 = vsel %vm225_vm1, %v302_v21, 0.0 }
 0x243   :  { %307 = vadd.xlane.f32.xlu1 %v306_v22 }
 0x2ae   :  { %v305_v26 = vpop.xlane.xlu0 %304 }
 0x2af   :  { %v309_v27 = vmul.f32 %v305_v26, %v3890_v36 }
 0x2b1   :  { %v311_v31 = vadd.f32 1e-05, %v309_v27 }
 0x2b3   :  { %3571 = vrsqrt.f32 %v311_v31  ;;  %vm319_vm10 = vweird.f32 %v311_v31 }
 0x2b6   :  { %v308_v32 = vpop.xlane.xlu1 %307 }
 0x2b7   :  { %v310_v34 = vmul.f32 %v308_v32, %v3890_v36 }
 0x2b9   :  { %v3572_v37 = vpop.eup %3571  ;;  %v312_v38 = vadd.f32 1e-05, %v310_v34 }
 0x2ba   :  { %v314_v39 = vmul.f32 %v3572_v37, %v311_v31  ;;  %vm320_vm9 = vweird.f32 %v3572_v37  ;;  %v3999_v31 = vld [vmem:[%s4637_s29 + $0x8] sm:$0xff] }
 0x2bb   :  { %3573 = vrsqrt.f32 %v312_v38  ;;  %vm321_vm11 = vmor %vm319_vm10, %vm320_vm9  ;;  %vm329_vm13 = vweird.f32 %v312_v38 }
 0x2bc   :  { %v315_v40 = vmul.f32 %v3572_v37, %v314_v39 }
 0x2be   :  { %v316_v41 = vmul.f32 0.5, %v315_v40  ;;  %v3531_v40 = vld [vmem:[%s4593_s12 + $0x1] ss:$0 sm:$0xff] }
 0x2c0   :  { %v317_v42 = vsub.f32 1.5, %v316_v41 }
 0x2c1   :  { %v3574_v43 = vpop.eup %3573 }
 0x2c2   :  { %v318_v44 = vmul.f32 %v3572_v37, %v317_v42  ;;  %v324_v45 = vmul.f32 %v3574_v43, %v312_v38  ;;  %vm330_vm12 = vweird.f32 %v3574_v43 }
 0x2c3   :  { %vm331_vm14 = vmor %vm329_vm13, %vm330_vm12 }
 0x2c4   :  { %v325_v46 = vmul.f32 %v3574_v43, %v324_v45  ;;  %v322_v47 = vsel %vm321_vm11, %v3572_v37, %v318_v44 }
 0x2c5   :  { %v333_v51 = vmul.f32 %v322_v47, %v299_v15 }
 0x2c6   :  { %v326_v48 = vmul.f32 0.5, %v325_v46 }
 0x2c7   :  { %v338_v55 = vmul.f32 %v3525_v50, %v333_v51 }
 0x2c8   :  { %v327_v49 = vsub.f32 1.5, %v326_v48  ;;  %v3429_v48 = vld [vmem:[%s4634_s8 + $0x28] sm:$0xff] }
 0x2c9   :  { %v343_v58 = vadd.f32 %v3526_v54, %v338_v55 }
 0x2ca   :  { %v328_v52 = vmul.f32 %v3574_v43, %v327_v49 }
 0x2cc   :  { %v332_v53 = vsel %vm331_vm14, %v3574_v43, %v328_v52  ;;  %v3428_v52 = vld [vmem:[%s4634_s8 + $0x20] sm:$0xff] }
 0x2cd   :  { %v334_v56 = vmul.f32 %v332_v53, %v300_v20  ;;  %v3530_v20 = vld [vmem:[%s4594_s13] ss:$0 sm:$0xff] }
 0x2cf   :  { %v339_v57 = vmul.f32 %v3525_v50, %v334_v56 }
 0x2d1   :  { %v344_v59 = vadd.f32 %v3526_v54, %v339_v57 }
 0x2d3   :  { %v3950_v60 = vpack.c.bf16 %v344_v59, %v343_v58 }
 0x2d5   :  { %2911 = vmatmul.msk.bf16.vlgmr.msra.gmra.mxu2 %vm225_vm1, %v3950_v60  ;;  %2920 = vmatmul.msk.bf16.vlgmr.msrb.gmra.mxu1 %vm225_vm1, %v3950_v60 }
 0x2d6   :  { %2947 = vmatmul.msk.bf16.vlgmr.msrb.gmra.mxu0 %vm225_vm1, %v3950_v60 }
 0x2e5   :  { %2929 = vmatmul.msk.bf16.vlgmr.msrb.gmra.mxu2 %vm225_vm1, %v3950_v60 }
 0x352   :  { %v412_v63 = vpop.f32.mrf.mxu1 }
 0x353   :  { %v413_v0 = vadd.f32 %v3527_v61, %v412_v63  ;;  %v590_v1 = vpop.f32.mrf.mxu0 }
 0x354   :  { %v3969_v2 = vadd.f32 %v3966_v62, %v590_v1 }
 0x355   :  { %v453_v3 = vpack.c.bf16 %v413_v0, %v413_v0 }
 0x357   :  { %v460_v6 = vsel %vm455_vm15, %v453_v3, 0 }
 0x358   :  { %v378_v7 = vpop.f32.mrf.mxu2  ;;  %469 = vmatpush.bf16.xpose.msra.mxu3 %v460_v6 }
 0x359   :  { %v379_v8 = vadd.f32 %v3529_v4, %v378_v7  ;;  %v3532_v7 = vld [vmem:[%s4593_s12 + $0x2] ss:$0 sm:$0xff] }
 0x35a   :  { %v414_v9 = vpop.f32.mrf.mxu1 }
 0x35b   :  { %v415_v10 = vadd.f32 %v3527_v61, %v414_v9  ;;  %v451_v12 = vpack.c.bf16 %v379_v8, %v379_v8  ;;  %v592_v49 = vpop.f32.mrf.mxu0 }
 0x35c   :  { %v593_v51 = vadd.f32 %v3966_v62, %v592_v49 }
 0x35d   :  { %v454_v13 = vpack.c.bf16 %v415_v10, %v415_v10  ;;  %v3425_v10 = vld [vmem:[%s4591_s10 + $0x18] sm:$0xff] }
 0x35e   :  { %v668_v53 = vpack.c.bf16 %v593_v51, %v593_v51 }
 0x35f   :  { %2930 = vmatmul.msk.bf16.vlgmr.msra.gmra.mxu3 %vm455_vm15, %v451_v12  ;;  %v479_v15 = vsel %vm455_vm15, %v454_v13, 0  ;;  %v3424_v12 = vld [vmem:[%s4591_s10 + $0x10] sm:$0xff] }
 0x360   :  { %v380_v16 = vpop.f32.mrf.mxu2  ;;  %488 = vmatpush.bf16.xpose.msra.mxu1 %v479_v15 }
 0x361   :  { %v381_v17 = vadd.f32 %v3529_v4, %v380_v16 }
 0x363   :  { %v452_v19 = vpack.c.bf16 %v381_v17, %v381_v17 }
 0x367   :  { %2931 = vmatmul.msk.bf16.vlgmr.msra.gmra.mxu1 %vm455_vm15, %v452_v19 }
 0x368   :  { %623 = vmatpush.bf16.msrb.mxu1 %v3423_v14  ;;  %v446_v21 = vpop.f32.mrf.mxu2 }
 0x369   :  { %v447_v22 = vadd.f32 %v3530_v20, %v446_v21 }
 0x36b   :  { %v518_v23 = vpack.c.bf16 %v447_v22, %v447_v22  ;;  %v3426_v22 = vld [vmem:[%s4633_s7 + $0x20] sm:$0xff] }
 0x36c   :  { %624 = vmatpush.bf16.msrb.mxu1 %v3422_v18 }
 0x36d   :  { %v525_v24 = vsel %vm523_vm0, %v518_v23, 0 }
 0x36e   :  { %534 = vmatpush.bf16.msra.mxu2 %v525_v24 }
 0x370   :  { %v448_v25 = vpop.f32.mrf.mxu2 }
 0x371   :  { %v449_v26 = vadd.f32 %v3530_v20, %v448_v25  ;;  %v3427_v20 = vld [vmem:[%s4633_s7 + $0x28] sm:$0xff] }
 0x372   :  { %659 = vmatpush.bf16.msrb.mxu2 %v3425_v10 }
 0x373   :  { %v519_v27 = vpack.c.bf16 %v449_v26, %v449_v26  ;;  %v667_v26 = vpack.c.bf16 %v3969_v2, %v3969_v2 }
 0x375   :  { %v544_v28 = vsel %vm523_vm0, %v519_v27, 0 }
 0x376   :  { %553 = vmatpush.bf16.msrb.mxu3 %v544_v28  ;;  %660 = vmatpush.bf16.msrb.mxu2 %v3424_v12 }
 0x377   :  { %2961 = vmatmul.msk.bf16.vlgmr.msrb.gmra.mxu1 %vm225_vm1, %v3950_v60 }
 0x3e2   :  { %v471_v30 = vpop.f32.mrf.mxu3 }
 0x3e3   :  { %v472_v32 = vadd.f32 %v471_v30, %v3994_v29 }
 0x3e4   :  { %v490_v33 = vpop.f32.mrf.mxu1 }
 0x3e5   :  { %v491_v34 = vadd.f32 %v490_v33, %v3999_v31  ;;  %v494_v35 = vsel %vm455_vm15, %v472_v32, -inf }
 0x3e6   :  { %495 = vmax.xlane.f32.xlu1 %v494_v35 }
 0x3e7   :  { %v497_v37 = vsel %vm455_vm15, %v491_v34, -inf }
 0x3e8   :  { %498 = vmax.xlane.f32.xlu2 %v497_v37 }
 0x3ea   :  { %v473_v38 = vpop.f32.mrf.mxu3 }
 0x3ec   :  { %v492_v39 = vpop.f32.mrf.mxu1 }
 0x3ed   :  { %v3533_v39 = vld [vmem:[%s4594_s13 + $0x1] ss:$0 sm:$0xff] }
 0x3f4   :  { %v626_v41 = vpop.f32.mrf.mxu1 }
 0x3f5   :  { %v627_v42 = vadd.f32 %v3531_v40, %v626_v41 }
 0x3f7   :  { %v669_v43 = vpack.c.bf16 %v627_v42, %v627_v42  ;;  %v3435_v42 = vld [vmem:[%s4634_s8 + $0x38] sm:$0xff] }
 0x3f9   :  { %v675_v44 = vsel %vm455_vm15, %v669_v43, 0 }
 0x3fa   :  { %684 = vmatpush.bf16.xpose.msra.mxu3 %v675_v44 }
 0x3fc   :  { %v628_v45 = vpop.f32.mrf.mxu1 }
 0x3fd   :  { %v629_v46 = vadd.f32 %v3531_v40, %v628_v45 }
 0x3ff   :  { %v670_v47 = vpack.c.bf16 %v629_v46, %v629_v46  ;;  %v3434_v46 = vld [vmem:[%s4634_s8 + $0x30] sm:$0xff] }
 0x401   :  { %v694_v50 = vsel %vm455_vm15, %v670_v47, 0 }
 0x402   :  { %703 = vmatpush.bf16.xpose.msra.mxu0 %v694_v50 }
 0x409   :  { %2977 = vmatmul.msk.bf16.vlgmr.msra.gmra.mxu0 %vm455_vm15, %v668_v53 }
 0x40a   :  { %837 = vmatpush.bf16.msrb.mxu0 %v3429_v48 }
 0x40e   :  { %838 = vmatpush.bf16.msrb.mxu0 %v3428_v52 }
 0x419   :  { %3007 = vmatmul.msk.bf16.vlgmr.msrb.gmra.mxu0 %vm225_vm1, %v3950_v60 }
 0x459   :  { %v496_v54 = vpop.xlane.xlu1 %495 }
 0x45a   :  { %v500_v55 = vsub.f32 %v472_v32, %v496_v54 }
 0x45b   :  { %v499_v56 = vpop.xlane.xlu2 %498 }
 0x45c   :  { %v502_v57 = vmul.f32 1.442695, %v500_v55  ;;  %v501_v58 = vsub.f32 %v491_v34, %v499_v56 }
 0x45e   :  { %3575 = vpow2.f32 %v502_v57  ;;  %v504_v59 = vmul.f32 1.442695, %v501_v58 }
 0x460   :  { %3577 = vpow2.f32 %v504_v59  ;;  %v3433_v59 = vld [vmem:[%s4633_s7 + $0x38] sm:$0xff] }
 0x464   :  { %v3576_v61 = vpop.eup %3575 }
 0x465   :  { %v506_v62 = vsel %vm455_vm15, %v3576_v61, 0.0 }
 0x466   :  { %v3578_v63 = vpop.eup %3577  ;;  %507 = vadd.xlane.f32.xlu2 %v506_v62 }
 0x467   :  { %v509_v0 = vsel %vm455_vm15, %v3578_v63, 0.0 }
 0x468   :  { %510 = vadd.xlane.f32.xlu0 %v509_v0  ;;  %v3534_v0 = vld [vmem:[%s4592_s11 + $0x2] ss:$0 sm:$0xff] }
 0x486   :  { %v705_v1 = vpop.f32.mrf.mxu0 }
 0x487   :  { %v706_v3 = vadd.f32 %v705_v1, %v3999_v31 }
 0x489   :  { %v712_v4 = vsel %vm455_vm15, %v706_v3, -inf }
 0x48a   :  { %713 = vmax.xlane.f32.xlu0 %v712_v4 }
 0x48e   :  { %v707_v6 = vpop.f32.mrf.mxu0 }
 0x496   :  { %v840_v8 = vpop.f32.mrf.mxu0 }
 0x497   :  { %v4027_v9 = vadd.f32 %v3532_v7, %v840_v8 }
 0x499   :  { %v883_v52 = vpack.c.bf16 %v4027_v9, %v4027_v9 }
 0x49b   :  { %v889_v58 = vsel %vm455_vm15, %v883_v52, 0 }
 0x49e   :  { %v842_v23 = vpop.f32.mrf.mxu0 }
 0x49f   :  { %v843_v24 = vadd.f32 %v3532_v7, %v842_v23 }
 0x4a1   :  { %v884_v25 = vpack.c.bf16 %v843_v24, %v843_v24  ;;  %v3535_v24 = vld [vmem:[%s4593_s12 + $0x3] ss:$0 sm:$0xff] }
 0x4a3   :  { %v908_v27 = vsel %vm455_vm15, %v884_v25, 0  ;;  %v3536_v25 = vld [vmem:[%s4592_s11 + $0x3] ss:$0 sm:$0xff] }
 0x4d9   :  { %v508_v13 = vpop.xlane.xlu2 %507 }
 0x4da   :  { %3579 = vrcp.f32 %v508_v13 }
 0x4db   :  { %v511_v14 = vpop.xlane.xlu0 %510 }
 0x4dc   :  { %3581 = vrcp.f32 %v511_v14 }
 0x4e0   :  { %v3580_v15 = vpop.eup %3579 }
 0x4e1   :  { %v514_v16 = vmul.f32 %v3580_v15, %v3576_v61 }
 0x4e2   :  { %v3582_v17 = vpop.eup %3581 }
 0x4e3   :  { %v516_v18 = vpack.c.bf16 %v514_v16, %v514_v16  ;;  %v515_v19 = vmul.f32 %v3582_v17, %v3578_v63  ;;  %v3432_v63 = vld [vmem:[%s4633_s7 + $0x30] sm:$0xff] }
 0x4e5   :  { %2932 = vmatmul.msk.bf16.vlgmr.msra.gmra.mxu2 %vm455_vm15, %v516_v18  ;;  %v517_v21 = vpack.c.bf16 %v515_v19, %v515_v19 }
 0x4e7   :  { %2933 = vmatmul.msk.bf16.vlgmr.msrb.gmra.mxu3 %vm455_vm15, %v517_v21 }
 0x4e8   :  { %801 = vmatpush.bf16.msrb.mxu3 %v3427_v20 }
 0x4ec   :  { %802 = vmatpush.bf16.msrb.mxu3 %v3426_v22 }
 0x4f5   :  { %2975 = vmatmul.msk.bf16.vlgmr.msrb.gmra.mxu2 %vm225_vm1, %v3950_v60 }
 0x4f7   :  { %2976 = vmatmul.msk.bf16.vlgmr.msra.gmra.mxu3 %vm455_vm15, %v667_v26 }
 0x4f8   :  { %917 = vmatpush.bf16.xpose.msra.mxu3 %v908_v27 }
 0x4fd   :  { %v714_v28 = vpop.xlane.xlu0 %713 }
 0x4fe   :  { %v716_v30 = vsub.f32 %v706_v3, %v714_v28 }
 0x500   :  { %v719_v32 = vmul.f32 1.442695, %v716_v30 }
 0x502   :  { %3583 = vpow2.f32 %v719_v32 }
 0x507   :  { %2993 = vmatmul.msk.bf16.vlgmr.msrb.gmra.mxu3 %vm225_vm1, %v3950_v60 }
 0x508   :  { %v3584_v33 = vpop.eup %3583  ;;  %1051 = vmatpush.bf16.msrb.mxu3 %v3435_v42  ;;  %v3430_v42 = vld [vmem:[%s4591_s10 + $0x20] sm:$0xff] }
 0x509   :  { %v724_v34 = vsel %vm455_vm15, %v3584_v33, 0.0 }
 0x50a   :  { %725 = vadd.xlane.f32.xlu2 %v724_v34 }
 0x50c   :  { %1052 = vmatpush.bf16.msrb.mxu3 %v3434_v46 }
 0x568   :  { %v4052_v2 = vpop.f32.mrf.mxu2 }
 0x56a   :  { %v4054_v35 = vpop.f32.mrf.mxu3 }
 0x570   :  { %v538_v37 = vpop.f32.mrf.mxu2 }
 0x572   :  { %v557_v38 = vpop.f32.mrf.mxu3 }
 0x578   :  { %v662_v40 = vpop.f32.mrf.mxu2 }
 0x579   :  { %v663_v41 = vadd.f32 %v3533_v39, %v662_v40 }
 0x57a   :  { %v686_v43 = vpop.f32.mrf.mxu3 }
 0x57b   :  { %v733_v44 = vpack.c.bf16 %v663_v41, %v663_v41  ;;  %v687_v45 = vadd.f32 %v686_v43, %v3994_v29  ;;  %v3431_v41 = vld [vmem:[%s4591_s10 + $0x28] sm:$0xff] }
 0x57d   :  { %v739_v47 = vsel %vm523_vm0, %v733_v44, 0  ;;  %v726_v48 = vpop.xlane.xlu2 %725  ;;  %v709_v49 = vsel %vm455_vm15, %v687_v45, -inf }
 0x57e   :  { %3585 = vrcp.f32 %v726_v48  ;;  %710 = vmax.xlane.f32.xlu1 %v709_v49  ;;  %748 = vmatpush.bf16.msra.mxu1 %v739_v47 }
 0x580   :  { %v664_v50 = vpop.f32.mrf.mxu2 }
 0x581   :  { %v665_v51 = vadd.f32 %v3533_v39, %v664_v50 }
 0x582   :  { %v688_v53 = vpop.f32.mrf.mxu3  ;;  %873 = vmatpush.bf16.msrb.mxu1 %v3431_v41 }
 0x583   :  { %v734_v54 = vpack.c.bf16 %v665_v51, %v665_v51 }
 0x584   :  { %v3586_v55 = vpop.eup %3585 }
 0x585   :  { %v730_v56 = vmul.f32 %v3586_v55, %v3584_v33  ;;  %v758_v57 = vsel %vm523_vm0, %v734_v54, 0 }
 0x586   :  { %767 = vmatpush.bf16.msra.mxu2 %v758_v57  ;;  %874 = vmatpush.bf16.msrb.mxu1 %v3430_v42 }
 0x587   :  { %v732_v61 = vpack.c.bf16 %v730_v56, %v730_v56 }
 0x589   :  { %2979 = vmatmul.msk.bf16.vlgmr.msra.gmra.mxu2 %vm455_vm15, %v732_v61 }
 0x58a   :  { %898 = vmatpush.bf16.xpose.msrb.mxu2 %v889_v58  ;;  %v804_v62 = vpop.f32.mrf.mxu3 }
 0x58b   :  { %v805_v3 = vadd.f32 %v3534_v0, %v804_v62 }
 0x58d   :  { %v881_v7 = vpack.c.bf16 %v805_v3, %v805_v3 }
 0x592   :  { %1015 = vmatpush.bf16.msra.mxu2 %v3433_v59  ;;  %v806_v1 = vpop.f32.mrf.mxu3 }
 0x593   :  { %v807_v4 = vadd.f32 %v3534_v0, %v806_v1  ;;  %v3537_v1 = vld [vmem:[%s4594_s13 + $0x2] ss:$0 sm:$0xff] }
 0x595   :  { %v882_v6 = vpack.c.bf16 %v807_v4, %v807_v4 }
 0x596   :  { %1016 = vmatpush.bf16.msra.mxu2 %v3432_v63 }
 0x597   :  { %3023 = vmatmul.msk.bf16.vlgmr.msra.gmra.mxu3 %vm455_vm15, %v882_v6 }
 0x599   :  { %3022 = vmatmul.msk.bf16.vlgmr.msrb.gmra.mxu2 %vm455_vm15, %v881_v7 }
 0x5a7   :  { %3053 = vmatmul.msk.bf16.vlgmr.msrb.gmra.mxu3 %vm225_vm1, %v3950_v60 }
 0x5a9   :  { %3039 = vmatmul.msk.bf16.vlgmr.msra.gmra.mxu2 %vm225_vm1, %v3950_v60 }
 0x5f1   :  { %v711_v8 = vpop.xlane.xlu1 %710 }
 0x5f2   :  { %v715_v9 = vsub.f32 %v687_v45, %v711_v8 }
 0x5f4   :  { %v717_v10 = vmul.f32 1.442695, %v715_v9  ;;  %v3436_v9 = vld [vmem:[%s4591_s10 + $0x30] sm:$0xff] }
 0x5f6   :  { %3587 = vpow2.f32 %v717_v10 }
 0x5fc   :  { %v3588_v12 = vpop.eup %3587 }
 0x5fd   :  { %v721_v13 = vsel %vm455_vm15, %v3588_v12, 0.0 }
 0x5fe   :  { %722 = vadd.xlane.f32.xlu0 %v721_v13 }
 0x60c   :  { %v769_v14 = vpop.f32.mrf.mxu2 }
 0x614   :  { %v771_v15 = vpop.f32.mrf.mxu2 }
 0x61a   :  { %v919_v16 = vpop.f32.mrf.mxu3 }
 0x61b   :  { %v920_v17 = vadd.f32 %v919_v16, %v3999_v31 }
 0x61c   :  { %v900_v18 = vpop.f32.mrf.mxu2 }
 0x61d   :  { %v901_v19 = vadd.f32 %v900_v18, %v3994_v29  ;;  %v926_v20 = vsel %vm455_vm15, %v920_v17, -inf }
 0x61e   :  { %927 = vmax.xlane.f32.xlu1 %v926_v20 }
 0x61f   :  { %v923_v21 = vsel %vm455_vm15, %v901_v19, -inf }
 0x620   :  { %924 = vmax.xlane.f32.xlu0 %v923_v21 }
 0x622   :  { %v921_v22 = vpop.f32.mrf.mxu3 }
 0x624   :  { %v902_v23 = vpop.f32.mrf.mxu2 }
 0x62a   :  { %v1054_v26 = vpop.f32.mrf.mxu3 }
 0x62b   :  { %v4099_v27 = vadd.f32 %v3535_v24, %v1054_v26 }
 0x62c   :  { %v1018_v28 = vpop.f32.mrf.mxu2 }
 0x62d   :  { %v4101_v30 = vadd.f32 %v3536_v25, %v1018_v28 }
 0x632   :  { %v1056_v32 = vpop.f32.mrf.mxu3 }
 0x633   :  { %v1057_v33 = vadd.f32 %v3535_v24, %v1056_v32  ;;  %v1095_v24 = vpack.c.bf16 %v4101_v30, %v4101_v30 }
 0x634   :  { %v1020_v37 = vpop.f32.mrf.mxu2 }
 0x635   :  { %v1098_v34 = vpack.c.bf16 %v1057_v33, %v1057_v33  ;;  %v1021_v39 = vadd.f32 %v3536_v25, %v1020_v37 }
 0x637   :  { %v1122_v38 = vsel %vm455_vm15, %v1098_v34, 0  ;;  %v1096_v40 = vpack.c.bf16 %v1021_v39, %v1021_v39 }
 0x638   :  { %1131 = vmatpush.bf16.xpose.msrb.mxu2 %v1122_v38  ;;  %v3538_v38 = vld [vmem:[%s4594_s13 + $0x3] ss:$0 sm:$0xff] }
 0x63f   :  { %3069 = vmatmul.msk.bf16.vlgmr.msrb.gmra.mxu2 %vm455_vm15, %v1096_v40 }
 0x671   :  { %v723_v43 = vpop.xlane.xlu0 %722 }
 0x672   :  { %3589 = vrcp.f32 %v723_v43 }
 0x678   :  { %v3590_v44 = vpop.eup %3589 }
 0x679   :  { %v729_v45 = vmul.f32 %v3590_v44, %v3588_v12 }
 0x67b   :  { %v731_v46 = vpack.c.bf16 %v729_v45, %v729_v45 }
 0x67d   :  { %2978 = vmatmul.msk.bf16.vlgmr.msra.gmra.mxu1 %vm455_vm15, %v731_v46 }
 0x68d   :  { %3021 = vmatmul.msk.bf16.vlgmr.msrb.gmra.mxu1 %vm225_vm1, %v3950_v60 }
 0x691   :  { %v928_v47 = vpop.xlane.xlu1 %927 }
 0x692   :  { %v930_v48 = vsub.f32 %v920_v17, %v928_v47 }
 0x693   :  { %v925_v49 = vpop.xlane.xlu0 %924 }
 0x694   :  { %v933_v50 = vmul.f32 1.442695, %v930_v48  ;;  %v929_v51 = vsub.f32 %v901_v19, %v925_v49 }
 0x696   :  { %3591 = vpow2.f32 %v933_v50  ;;  %v931_v52 = vmul.f32 1.442695, %v929_v51 }
 0x698   :  { %3593 = vpow2.f32 %v931_v52 }
 0x69c   :  { %v3592_v53 = vpop.eup %3591 }
 0x69d   :  { %v938_v54 = vsel %vm455_vm15, %v3592_v53, 0.0 }
 0x69e   :  { %v3594_v55 = vpop.eup %3593  ;;  %939 = vadd.xlane.f32.xlu2 %v938_v54 }
 0x69f   :  { %v935_v56 = vsel %vm455_vm15, %v3594_v55, 0.0 }
 0x6a0   :  { %936 = vadd.xlane.f32.xlu1 %v935_v56 }
 0x6c2   :  { %v1133_v57 = vpop.f32.mrf.mxu2 }
 0x6c3   :  { %v1134_v58 = vadd.f32 %v1133_v57, %v3999_v31  ;;  %v3437_v31 = vld [vmem:[%s4591_s10 + $0x38] sm:$0xff] }
 0x6c5   :  { %v1140_v59 = vsel %vm455_vm15, %v1134_v58, -inf }
 0x6c6   :  { %1141 = vmax.xlane.f32.xlu0 %v1140_v59 }
 0x6ca   :  { %v1135_v61 = vpop.f32.mrf.mxu2 }
 0x6fa   :  { %v750_v62 = vpop.f32.mrf.mxu1 }
 0x6fb   :  { %v3493_v63 = vpack.i.bf16 %v769_v14, %v750_v62  ;;  %v1097_v14 = vpack.c.bf16 %v4099_v27, %v4099_v27 }
 0x6fd   :  { %3494 = vrot.lane.b32.xlu0 %v3493_v63, %s4617_s5  ;;  %v1103_v18 = vsel %vm455_vm15, %v1097_v14, 0  ;;  %s4638_s5 = smov 8  }
 0x702   :  { %v752_v0 = vpop.f32.mrf.mxu1 }
 0x70a   :  { %v876_v3 = vpop.f32.mrf.mxu1 }
 0x70b   :  { %v877_v4 = vadd.f32 %v3537_v1, %v876_v3  ;;  %v3439_v3 = vld [vmem:[%s4595_s14 + $0x8] sm:$0xff] }
 0x70d   :  { %v947_v6 = vpack.c.bf16 %v877_v4, %v877_v4 }
 0x70f   :  { %v953_v7 = vsel %vm523_vm0, %v947_v6, 0 }
 0x710   :  { %962 = vmatpush.bf16.msra.mxu0 %v953_v7  ;;  %v3438_v7 = vld [vmem:[%s4595_s14] sm:$0xff] }
 0x711   :  { %v940_v8 = vpop.xlane.xlu2 %939 }
 0x712   :  { %3595 = vrcp.f32 %v940_v8  ;;  %v878_v10 = vpop.f32.mrf.mxu1 }
 0x713   :  { %v879_v12 = vadd.f32 %v3537_v1, %v878_v10  ;;  %v937_v13 = vpop.xlane.xlu1 %936 }
 0x714   :  { %1087 = vmatpush.bf16.msrb.mxu0 %v3437_v31  ;;  %3597 = vrcp.f32 %v937_v13 }
 0x715   :  { %v948_v15 = vpack.c.bf16 %v879_v12, %v879_v12 }
 0x717   :  { %v972_v16 = vsel %vm523_vm0, %v948_v15, 0 }
 0x718   :  { %1088 = vmatpush.bf16.msrb.mxu0 %v3436_v9  ;;  %v3596_v17 = vpop.eup %3595  ;;  %981 = vmatpush.bf16.msra.mxu1 %v972_v16 }
 0x719   :  { %v944_v19 = vmul.f32 %v3596_v17, %v3592_v53 }
 0x71a   :  { %v3598_v20 = vpop.eup %3597 }
 0x71b   :  { %v946_v21 = vpack.c.bf16 %v944_v19, %v944_v19  ;;  %v943_v22 = vmul.f32 %v3598_v20, %v3594_v55 }
 0x71c   :  { %1112 = vmatpush.bf16.xpose.msrb.mxu1 %v1103_v18 }
 0x71d   :  { %v945_v23 = vpack.c.bf16 %v943_v22, %v943_v22  ;;  %3025 = vmatmul.msk.bf16.vlgmr.msra.gmra.mxu1 %vm455_vm15, %v946_v21 }
 0x71f   :  { %3024 = vmatmul.msk.bf16.vlgmr.msra.gmra.mxu0 %vm455_vm15, %v945_v23 }
 0x724   :  { %1263 = vmatpush.bf16.msra.mxu1 %v3439_v3 }
 0x728   :  { %1264 = vmatpush.bf16.msra.mxu1 %v3438_v7 }
 0x72d   :  { %3068 = vmatmul.msk.bf16.vlgmr.msrb.gmra.mxu1 %vm455_vm15, %v1095_v24 }
 0x72f   :  { %3067 = vmatmul.msk.bf16.vlgmr.msrb.gmra.mxu0 %vm225_vm1, %v3950_v60 }
 0x739   :  { %v1142_v28 = vpop.xlane.xlu0 %1141 }
 0x73a   :  { %v1144_v33 = vsub.f32 %v1134_v58, %v1142_v28 }
 0x73c   :  { %v1147_v37 = vmul.f32 1.442695, %v1144_v33 }
 0x73e   :  { %3599 = vpow2.f32 %v1147_v37 }
 0x744   :  { %v3600_v44 = vpop.eup %3599 }
 0x745   :  { %v1152_v48 = vsel %vm455_vm15, %v3600_v44, 0.0 }
 0x76f   :  { %v3495_v8 = vpop.permute.xlu0 %3494 }
 0x770   :  { %v3497_v10 = vunpack.i.h.bf16 %v3495_v8  ;;  %v3496_v12 = vunpack.i.l.bf16 %v3495_v8 }
 0x772   :  { %v1226_v16 = vsel %vm455_vm15, %v4054_v35, %v3497_v10  ;;  %v1225_v17 = vsel %vm455_vm15, %v4052_v2, %v3496_v12  ;;  %v3539_v35 = vld [vmem:[%s4596_s15] ss:$0 sm:$0xff]  ;;  %v3449_v12 = vld [vmem:[%s4601_s20 + $0x38] sm:$0xff] }
 0x79a   :  { %v983_v25 = vpop.f32.mrf.mxu1 }
 0x79c   :  { %v964_v26 = vpop.f32.mrf.mxu0 }
 0x79d   :  { %v3498_v27 = vpack.i.bf16 %v983_v25, %v964_v26 }
 0x7a2   :  { %v985_v32 = vpop.f32.mrf.mxu1 }
 0x7a4   :  { %v966_v34 = vpop.f32.mrf.mxu0 }
 0x7aa   :  { %v1114_v39 = vpop.f32.mrf.mxu1 }
 0x7ab   :  { %v1115_v30 = vadd.f32 %v1114_v39, %v3994_v29 }
 0x7ac   :  { %v1090_v40 = vpop.f32.mrf.mxu0 }
 0x7ad   :  { %v1091_v41 = vadd.f32 %v3538_v38, %v1090_v40  ;;  %v1137_v60 = vsel %vm455_vm15, %v1115_v30, -inf }
 0x7ae   :  { %1138 = vmax.xlane.f32.xlu2 %v1137_v60 }
 0x7af   :  { %v1161_v42 = vpack.c.bf16 %v1091_v41, %v1091_v41 }
 0x7b1   :  { %v1167_v43 = vsel %vm523_vm0, %v1161_v42, 0 }
 0x7b2   :  { %v1116_v45 = vpop.f32.mrf.mxu1  ;;  %1176 = vmatpush.bf16.msra.mxu3 %v1167_v43  ;;  %v3441_v43 = vld [vmem:[%s4599_s18 + $0x8] sm:$0xff] }
 0x7b3   :  { %1359 = vmatpush.bf16.msra.mxu2 %v3441_v43 }
 0x7b4   :  { %v1092_v46 = vpop.f32.mrf.mxu0 }
 0x7b5   :  { %v1093_v47 = vadd.f32 %v3538_v38, %v1092_v46 }
 0x7b6   :  { %1153 = vadd.xlane.f32.xlu2 %v1152_v48  ;;  %1474 = vmatpush.bf16.msrb.mxu3 %v3449_v12  ;;  %v3451_v12 = vld [vmem:[%s4633_s7 + $0x48] sm:$0xff] }
 0x7b7   :  { %v1162_v49 = vpack.c.bf16 %v1093_v47, %v1093_v47  ;;  %v3440_v47 = vld [vmem:[%s4599_s18] sm:$0xff] }
 0x7b8   :  { %1360 = vmatpush.bf16.msra.mxu2 %v3440_v47 }
 0x7b9   :  { %v1186_v29 = vsel %vm523_vm0, %v1162_v49, 0 }
 0x7ba   :  { %1195 = vmatpush.bf16.msra.mxu0 %v1186_v29 }
 0x7be   :  { %1586 = vmatpush.bf16.msrb.mxu0 %v3451_v12 }
 0x821   :  { %v1139_v50 = vpop.xlane.xlu2 %1138 }
 0x822   :  { %v1143_v51 = vsub.f32 %v1115_v30, %v1139_v50 }
 0x824   :  { %v1145_v52 = vmul.f32 1.442695, %v1143_v51 }
 0x826   :  { %3601 = vpow2.f32 %v1145_v52 }
 0x829   :  { %v1154_v53 = vpop.xlane.xlu2 %1153 }
 0x82a   :  { %3603 = vrcp.f32 %v1154_v53 }
 0x82c   :  { %v3602_v54 = vpop.eup %3601 }
 0x82d   :  { %v1149_v55 = vsel %vm455_vm15, %v3602_v54, 0.0 }
 0x82e   :  { %1150 = vadd.xlane.f32.xlu1 %v1149_v55 }
 0x830   :  { %v3604_v56 = vpop.eup %3603 }
 0x831   :  { %v1158_v57 = vmul.f32 %v3604_v56, %v3600_v44 }
 0x833   :  { %v1160_v58 = vpack.c.bf16 %v1158_v57, %v1158_v57 }
 0x835   :  { %3071 = vmatmul.msk.bf16.vlgmr.msra.gmra.mxu0 %vm455_vm15, %v1160_v58 }
 0x847   :  { %3499 = vrot.lane.b32.xlu1 %v3498_v27, %s4616_s9 }
 0x8a1   :  { %v1151_v59 = vpop.xlane.xlu1 %1150 }
 0x8a2   :  { %3605 = vrcp.f32 %v1151_v59 }
 0x8a8   :  { %v3606_v61 = vpop.eup %3605 }
 0x8a9   :  { %v1157_v62 = vmul.f32 %v3606_v61, %v3602_v54 }
 0x8ab   :  { %v1159_v63 = vpack.c.bf16 %v1157_v62, %v1157_v62 }
 0x8ad   :  { %3070 = vmatmul.msk.bf16.vlgmr.msra.gmra.mxu3 %vm455_vm15, %v1159_v63  ;;  %v3540_v63 = vld [vmem:[%s4597_s16] ss:$0 sm:$0xff] }
 0x8b2   :  { %v1197_v0 = vpop.f32.mrf.mxu0 }
 0x8b9   :  { %v3500_v9 = vpop.permute.xlu1 %3499 }
 0x8ba   :  { %v1199_v1 = vpop.f32.mrf.mxu0  ;;  %v3502_v13 = vunpack.i.h.bf16 %v3500_v9  ;;  %v3501_v14 = vunpack.i.l.bf16 %v3500_v9 }
 0x8bc   :  { %v1229_v20 = vsel %vm1227_vm2, %v1226_v16, %v3502_v13  ;;  %v1228_v21 = vsel %vm1227_vm2, %v1225_v17, %v3501_v14  ;;  %v3448_v13 = vld [vmem:[%s4601_s20 + $0x30] sm:$0xff]  ;;  %v3447_v14 = vld [vmem:[%s4601_s20 + $0x28] sm:$0xff]  ;;  %v3542_v16 = vld [vmem:[%s4600_s19] ss:$0 sm:$0xff] }
 0x8bd   :  { %1475 = vmatpush.bf16.msrb.mxu3 %v3448_v13  ;;  %v3445_v17 = vld [vmem:[%s4601_s20 + $0x18] sm:$0xff]  ;;  %v3453_v13 = vld [vmem:[%s4634_s8 + $0x48] sm:$0xff] }
 0x8be   :  { %1622 = vmatpush.bf16.msrb.mxu1 %v3453_v13 }
 0x8c1   :  { %1476 = vmatpush.bf16.msrb.mxu3 %v3447_v14  ;;  %v3455_v14 = vld [vmem:[%s4591_s10 + $0x48] sm:$0xff] }
 0x8c2   :  { %1658 = vmatpush.bf16.msrb.mxu2 %v3455_v14 }
 0x930   :  { %v1178_v4 = vpop.f32.mrf.mxu3 }
 0x931   :  { %v3503_v6 = vpack.i.bf16 %v1197_v0, %v1178_v4  ;;  %v3541_v4 = vld [vmem:[%s4598_s17] ss:$0 sm:$0xff] }
 0x933   :  { %3504 = vrot.lane.b32.xlu2 %v3503_v6, %s4615_s30 }
 0x938   :  { %v1180_v31 = vpop.f32.mrf.mxu3 }
 0x98d   :  { %v3505_v15 = vpop.permute.xlu2 %3504 }
 0x98e   :  { %v3507_v18 = vunpack.i.h.bf16 %v3505_v15  ;;  %v3506_v19 = vunpack.i.l.bf16 %v3505_v15  ;;  %v3446_v15 = vld [vmem:[%s4601_s20 + $0x20] sm:$0xff] }
 0x98f   :  { %1477 = vmatpush.bf16.msrb.mxu3 %v3446_v15 }
 0x990   :  { %v1231_v22 = vsel %vm1230_vm3, %v1228_v21, %v3506_v19  ;;  %v1232_v23 = vsel %vm1230_vm3, %v1229_v20, %v3507_v18  ;;  %v3444_v20 = vld [vmem:[%s4601_s20 + $0x10] sm:$0xff] }
 0x991   :  { %v1233_v24 = vpack.c.bf16 %v1232_v23, %v1231_v22  ;;  %v3443_v23 = vld [vmem:[%s4601_s20 + $0x8] sm:$0xff] }
 0x993   :  { %3080 = vmatmul.msk.bf16.vlgmr.msra.gmra.mxu1 %vm225_vm1, %v1233_v24  ;;  %1478 = vmatpush.bf16.msrb.mxu3 %v3445_v17 }
 0x997   :  { %1479 = vmatpush.bf16.msrb.mxu3 %v3444_v20  ;;  %v3454_v20 = vld [vmem:[%s4591_s10 + $0x40] sm:$0xff] }
 0x998   :  { %1659 = vmatpush.bf16.msrb.mxu2 %v3454_v20 }
 0x99b   :  { %1480 = vmatpush.bf16.msrb.mxu3 %v3443_v23 }
 0xa10   :  { %v1266_v25 = vpop.f32.mrf.mxu1 }
 0xa11   :  { %v1267_v26 = vadd.f32 %v3539_v35, %v1266_v25  ;;  %v3442_v25 = vld [vmem:[%s4601_s20] sm:$0xff] }
 0xa12   :  { %1481 = vmatpush.bf16.msrb.mxu3 %v3442_v25 }
 0xa13   :  { %v4172_v2 = vadd.f32 %v1267_v26, %v3904_v5 }
 0xa15   :  { %v1275_v27 = vsel %vm225_vm1, %v4172_v2, 0.0 }
 0xa16   :  { %1276 = vadd.xlane.f32.xlu0 %v1275_v27 }
 0xa18   :  { %v1268_v28 = vpop.f32.mrf.mxu1 }
 0xa19   :  { %v1269_v32 = vadd.f32 %v3539_v35, %v1268_v28 }
 0xa1b   :  { %v4177_v33 = vadd.f32 %v1269_v32, %v3908_v11 }
 0xa1d   :  { %v1278_v34 = vsel %vm225_vm1, %v4177_v33, 0.0 }
 0xa1e   :  { %1279 = vadd.xlane.f32.xlu2 %v1278_v34 }
 0xa89   :  { %v1277_v37 = vpop.xlane.xlu0 %1276 }
 0xa8a   :  { %v1281_v38 = vmul.f32 %v1277_v37, %v3890_v36 }
 0xa8c   :  { %v1283_v39 = vsub.f32 %v4172_v2, %v1281_v38 }
 0xa8e   :  { %v1285_v5 = vmul.f32 %v1283_v39, %v1283_v39 }
 0xa90   :  { %v1287_v30 = vsel %vm225_vm1, %v1285_v5, 0.0 }
 0xa91   :  { %v1280_v40 = vpop.xlane.xlu2 %1279  ;;  %1288 = vadd.xlane.f32.xlu1 %v1287_v30 }
 0xa92   :  { %v1282_v41 = vmul.f32 %v1280_v40, %v3890_v36 }
 0xa94   :  { %v1284_v60 = vsub.f32 %v4177_v33, %v1282_v41 }
 0xa96   :  { %v1286_v11 = vmul.f32 %v1284_v60, %v1284_v60 }
 0xa98   :  { %v1290_v42 = vsel %vm225_vm1, %v1286_v11, 0.0 }
 0xa99   :  { %1291 = vadd.xlane.f32.xlu0 %v1290_v42 }
 0xb04   :  { %v1289_v44 = vpop.xlane.xlu1 %1288 }
 0xb05   :  { %v1293_v45 = vmul.f32 %v1289_v44, %v3890_v36 }
 0xb07   :  { %v1295_v46 = vadd.f32 1e-05, %v1293_v45 }
 0xb09   :  { %3607 = vrsqrt.f32 %v1295_v46  ;;  %vm1303_vm5 = vweird.f32 %v1295_v46 }
 0xb0c   :  { %v1292_v48 = vpop.xlane.xlu0 %1291 }
 0xb0d   :  { %v1294_v49 = vmul.f32 %v1292_v48, %v3890_v36 }
 0xb0f   :  { %v3608_v29 = vpop.eup %3607  ;;  %v1296_v50 = vadd.f32 1e-05, %v1294_v49 }
 0xb10   :  { %v1298_v51 = vmul.f32 %v3608_v29, %v1295_v46  ;;  %vm1304_vm4 = vweird.f32 %v3608_v29 }
 0xb11   :  { %3609 = vrsqrt.f32 %v1296_v50  ;;  %vm1305_vm6 = vmor %vm1303_vm5, %vm1304_vm4  ;;  %vm1313_vm8 = vweird.f32 %v1296_v50 }
 0xb12   :  { %v1299_v52 = vmul.f32 %v3608_v29, %v1298_v51 }
 0xb14   :  { %v1300_v53 = vmul.f32 0.5, %v1299_v52 }
 0xb16   :  { %v1301_v54 = vsub.f32 1.5, %v1300_v53 }
 0xb17   :  { %v3610_v55 = vpop.eup %3609 }
 0xb18   :  { %v1302_v56 = vmul.f32 %v3608_v29, %v1301_v54  ;;  %v1308_v57 = vmul.f32 %v3610_v55, %v1296_v50  ;;  %vm1314_vm7 = vweird.f32 %v3610_v55 }
 0xb19   :  { %vm1315_vm9 = vmor %vm1313_vm8, %vm1314_vm7 }
 0xb1a   :  { %v1309_v58 = vmul.f32 %v3610_v55, %v1308_v57  ;;  %v1306_v59 = vsel %vm1305_vm6, %v3608_v29, %v1302_v56  ;;  %v3543_v56 = vld [vmem:[%s4602_s21] ss:$0 sm:$0xff] }
 0xb1b   :  { %v1317_v0 = vmul.f32 %v1306_v59, %v1283_v39 }
 0xb1c   :  { %v1310_v61 = vmul.f32 0.5, %v1309_v58 }
 0xb1d   :  { %v1322_v6 = vmul.f32 %v3540_v63, %v1317_v0 }
 0xb1e   :  { %v1311_v62 = vsub.f32 1.5, %v1310_v61 }
 0xb1f   :  { %v1327_v8 = vadd.f32 %v3541_v4, %v1322_v6 }
 0xb20   :  { %v1312_v1 = vmul.f32 %v3610_v55, %v1311_v62 }
 0xb22   :  { %v1316_v3 = vsel %vm1315_vm9, %v3610_v55, %v1312_v1 }
 0xb23   :  { %v1318_v31 = vmul.f32 %v1316_v3, %v1284_v60 }
 0xb25   :  { %v1323_v7 = vmul.f32 %v3540_v63, %v1318_v31 }
 0xb27   :  { %v1328_v9 = vadd.f32 %v3541_v4, %v1323_v7 }
 0xb29   :  { %v1329_v10 = vpack.c.bf16 %v1328_v9, %v1327_v8 }
 0xb2b   :  { %3089 = vmatmul.msk.bf16.vlgmr.msra.gmra.mxu2 %vm225_vm1, %v1329_v10 }
 0xbae   :  { %v1362_v18 = vpop.f32.mrf.mxu2 }
 0xbaf   :  { %v1363_v19 = vadd.f32 %v3542_v16, %v1362_v18  ;;  %v3450_v18 = vld [vmem:[%s4633_s7 + $0x40] sm:$0xff] }
 0xbb0   :  { %1587 = vmatpush.bf16.msrb.mxu0 %v3450_v18 }
 0xbb1   :  { %v3090_v21 = vmul.f32 -1.702, %v1363_v19 }
 0xbb3   :  { %v1371_v22 = vmul.f32 1.442695, %v3090_v21 }
 0xbb5   :  { %3611 = vpow2.f32 %v1371_v22 }
 0xbb6   :  { %v1364_v24 = vpop.f32.mrf.mxu2 }
 0xbb7   :  { %v1365_v35 = vadd.f32 %v3542_v16, %v1364_v24 }
 0xbb9   :  { %v3091_v26 = vmul.f32 -1.702, %v1365_v35 }
 0xbbb   :  { %v3612_v27 = vpop.eup %3611  ;;  %v1373_v28 = vmul.f32 1.442695, %v3091_v26 }
 0xbbc   :  { %v1375_v32 = vadd.f32 1.0, %v3612_v27 }
 0xbbd   :  { %3613 = vpow2.f32 %v1373_v28 }
 0xbbe   :  { %3615 = vrcp.f32 %v1375_v32  ;;  %v1388_v11 = vand.u32 2147483648, %v1375_v32  ;;  %vm1382_vm11 = vweird.f32 %v1375_v32  ;;  %v1386_v42 = vand.u32 2147483647, %v1375_v32 }
 0xbc0   :  { %v1389_v48 = vor.u32 1.1754944e-38, %v1388_v11  ;;  %vm1387_vm14 = vcmp.eq.f32.partialorder %v1386_v42, 8.507059e+37  ;;  %v3545_v11 = vld [vmem:[%s4636_s28 + $0x1] ss:$0 sm:$0xff] }
 0xbc3   :  { %v3614_v34 = vpop.eup %3613 }
 0xbc4   :  { %v3616_v37 = vpop.eup %3615  ;;  %v1376_v38 = vadd.f32 1.0, %v3614_v34 }
 0xbc5   :  { %v1378_v39 = vmul.f32 %v3616_v37, %v1375_v32  ;;  %vm1383_vm10 = vweird.f32 %v3616_v37 }
 0xbc6   :  { %3617 = vrcp.f32 %v1376_v38  ;;  %vm1384_vm12 = vmor %vm1382_vm11, %vm1383_vm10  ;;  %v1403_v44 = vand.u32 2147483648, %v1376_v38  ;;  %v1401_v47 = vand.u32 2147483647, %v1376_v38  ;;  %vm1397_vm4 = vweird.f32 %v1376_v38 }
 0xbc7   :  { %v1379_v5 = vsub.f32 1.0, %v1378_v39 }
 0xbc8   :  { %v1404_v50 = vor.u32 1.1754944e-38, %v1403_v44  ;;  %vm1402_vm6 = vcmp.eq.f32.partialorder %v1401_v47, 8.507059e+37 }
 0xbc9   :  { %v1380_v30 = vmul.f32 %v3616_v37, %v1379_v5 }
 0xbcb   :  { %v1381_v41 = vadd.f32 %v3616_v37, %v1380_v30  ;;  %v3544_v30 = vld [vmem:[%s4635_s6 + $0x1] ss:$0 sm:$0xff] }
 0xbcc   :  { %v3618_v40 = vpop.eup %3617 }
 0xbcd   :  { %v1393_v60 = vmul.f32 %v3618_v40, %v1376_v38  ;;  %v1385_v45 = vsel %vm1384_vm12, %v3616_v37, %v1381_v41  ;;  %vm1398_vm13 = vweird.f32 %v3618_v40 }
 0xbce   :  { %v1390_v29 = vsel %vm1387_vm14, %v1389_v48, %v1385_v45  ;;  %vm1399_vm5 = vmor %vm1397_vm4, %vm1398_vm13  ;;  %v3547_v48 = vld [vmem:[%s4593_s12 + $0x4] ss:$0 sm:$0xff] }
 0xbcf   :  { %v1394_v43 = vsub.f32 1.0, %v1393_v60  ;;  %v1407_v53 = vmul.f32 %v1390_v29, %v1363_v19  ;;  %v3452_v19 = vld [vmem:[%s4634_s8 + $0x40] sm:$0xff] }
 0xbd0   :  { %1623 = vmatpush.bf16.msrb.mxu1 %v3452_v19 }
 0xbd1   :  { %v1395_v46 = vmul.f32 %v3618_v40, %v1394_v43 }
 0xbd3   :  { %v1396_v49 = vadd.f32 %v3618_v40, %v1395_v46 }
 0xbd5   :  { %v1400_v51 = vsel %vm1399_vm5, %v3618_v40, %v1396_v49 }
 0xbd6   :  { %v1405_v52 = vsel %vm1402_vm6, %v1404_v50, %v1400_v51  ;;  %v3546_v51 = vld [vmem:[%s4592_s11 + $0x4] ss:$0 sm:$0xff] }
 0xbd7   :  { %v1408_v54 = vmul.f32 %v1405_v52, %v1365_v35 }
 0xbd9   :  { %v1409_v55 = vpack.c.bf16 %v1408_v54, %v1407_v53  ;;  %v3457_v53 = vld [vmem:[%s4633_s7 + $0x58] sm:$0xff]  ;;  %v3548_v54 = vld [vmem:[%s4594_s13 + $0x4] ss:$0 sm:$0xff] }
 0xbdb   :  { %1482 = vmatmul.bf16.vlgmr.msrb.gmra.mxu3 %v1409_v55 }
 0xc5e   :  { %v1483_v57 = vpop.f32.mrf.mxu3 }
 0xc5f   :  { %v1488_v58 = vadd.f32 %v1483_v57, %v4172_v2 }
 0xc61   :  { %v4233_v59 = vadd.f32 %v3543_v56, %v1488_v58  ;;  %v3456_v58 = vld [vmem:[%s4633_s7 + $0x50] sm:$0xff] }
 0xc63   :  { %v1500_v61 = vsel %vm225_vm1, %v4233_v59, 0.0 }
 0xc64   :  { %1501 = vadd.xlane.f32.xlu2 %v1500_v61 }
 0xc66   :  { %v1485_v62 = vpop.f32.mrf.mxu3 }
 0xc67   :  { %v1489_v63 = vadd.f32 %v1485_v62, %v4177_v33 }
 0xc69   :  { %v4238_v0 = vadd.f32 %v3543_v56, %v1489_v63 }
 0xc6b   :  { %v1503_v1 = vsel %vm225_vm1, %v4238_v0, 0.0 }
 0xc6c   :  { %1504 = vadd.xlane.f32.xlu1 %v1503_v1 }
 0xcd7   :  { %v1502_v3 = vpop.xlane.xlu2 %1501 }
 0xcd8   :  { %v1506_v4 = vmul.f32 %v1502_v3, %v3890_v36 }
 0xcda   :  { %v1508_v2 = vsub.f32 %v4233_v59, %v1506_v4 }
 0xcdc   :  { %v1510_v6 = vmul.f32 %v1508_v2, %v1508_v2 }
 0xcde   :  { %v1512_v31 = vsel %vm225_vm1, %v1510_v6, 0.0 }
 0xcdf   :  { %1513 = vadd.xlane.f32.xlu0 %v1512_v31  ;;  %v1505_v7 = vpop.xlane.xlu1 %1504 }
 0xce0   :  { %v1507_v8 = vmul.f32 %v1505_v7, %v3890_v36 }
 0xce2   :  { %v1509_v33 = vsub.f32 %v4238_v0, %v1507_v8 }
 0xce4   :  { %v1511_v9 = vmul.f32 %v1509_v33, %v1509_v33 }
 0xce6   :  { %v1515_v10 = vsel %vm225_vm1, %v1511_v9, 0.0  ;;  %v3458_v9 = vld [vmem:[%s4634_s8 + $0x50] sm:$0xff] }
 0xce7   :  { %1516 = vadd.xlane.f32.xlu2 %v1515_v10 }
 0xd52   :  { %v1514_v15 = vpop.xlane.xlu0 %1513 }
 0xd53   :  { %v1518_v16 = vmul.f32 %v1514_v15, %v3890_v36 }
 0xd55   :  { %v1520_v17 = vadd.f32 1e-05, %v1518_v16  ;;  %v4316_v16 = vld [vmem:[%s4637_s29] sm:$0xff] }
 0xd57   :  { %3619 = vrsqrt.f32 %v1520_v17  ;;  %vm1528_vm8 = vweird.f32 %v1520_v17 }
 0xd5a   :  { %v1517_v21 = vpop.xlane.xlu2 %1516 }
 0xd5b   :  { %v1519_v22 = vmul.f32 %v1517_v21, %v3890_v36  ;;  %v4323_v21 = vld [vmem:[%s4637_s29 + $0x8] sm:$0xff] }
 0xd5d   :  { %v3620_v23 = vpop.eup %3619  ;;  %v1521_v24 = vadd.f32 1e-05, %v1519_v22 }
 0xd5e   :  { %v1523_v35 = vmul.f32 %v3620_v23, %v1520_v17  ;;  %vm1529_vm7 = vweird.f32 %v3620_v23 }
 0xd5f   :  { %3621 = vrsqrt.f32 %v1521_v24  ;;  %vm1530_vm9 = vmor %vm1528_vm8, %vm1529_vm7  ;;  %vm1538_vm11 = vweird.f32 %v1521_v24 }
 0xd60   :  { %v1524_v25 = vmul.f32 %v3620_v23, %v1523_v35 }
 0xd62   :  { %v1525_v26 = vmul.f32 0.5, %v1524_v25 }
 0xd64   :  { %v1526_v27 = vsub.f32 1.5, %v1525_v26 }
 0xd65   :  { %v3622_v28 = vpop.eup %3621 }
 0xd66   :  { %v1527_v32 = vmul.f32 %v3620_v23, %v1526_v27  ;;  %v1533_v34 = vmul.f32 %v3622_v28, %v1521_v24  ;;  %vm1539_vm10 = vweird.f32 %v3622_v28  ;;  %v3549_v24 = vld [vmem:[%s4592_s11 + $0x5] ss:$0 sm:$0xff] }
 0xd67   :  { %vm1540_vm12 = vmor %vm1538_vm11, %vm1539_vm10  ;;  %v3550_v27 = vld [vmem:[%s4593_s12 + $0x5] ss:$0 sm:$0xff] }
 0xd68   :  { %v1534_v37 = vmul.f32 %v3622_v28, %v1533_v34  ;;  %v1531_v38 = vsel %vm1530_vm9, %v3620_v23, %v1527_v32 }
 0xd69   :  { %v1542_v40 = vmul.f32 %v1531_v38, %v1508_v2  ;;  %v3459_v2 = vld [vmem:[%s4634_s8 + $0x58] sm:$0xff] }
 0xd6a   :  { %v1535_v39 = vmul.f32 0.5, %v1534_v37 }
 0xd6b   :  { %v1547_v42 = vmul.f32 %v3544_v30, %v1542_v40 }
 0xd6c   :  { %v1536_v5 = vsub.f32 1.5, %v1535_v39 }
 0xd6d   :  { %v1552_v45 = vadd.f32 %v3545_v11, %v1547_v42 }
 0xd6e   :  { %v1537_v41 = vmul.f32 %v3622_v28, %v1536_v5 }
 0xd70   :  { %v1541_v60 = vsel %vm1540_vm12, %v3622_v28, %v1537_v41  ;;  %vm2720_vm12 = vcmask 1041409  }
 0xd71   :  { %v1543_v43 = vmul.f32 %v1541_v60, %v1509_v33 }
 0xd73   :  { %v1548_v44 = vmul.f32 %v3544_v30, %v1543_v43  ;;  %v3465_v30 = vld [vmem:[%s4634_s8 + $0x68] sm:$0xff] }
 0xd75   :  { %v1553_v46 = vadd.f32 %v3545_v11, %v1548_v44  ;;  %v3464_v11 = vld [vmem:[%s4634_s8 + $0x60] sm:$0xff] }
 0xd77   :  { %v4274_v47 = vpack.c.bf16 %v1553_v46, %v1552_v45 }
 0xd79   :  { %3139 = vmatmul.msk.bf16.vlgmr.msrb.gmra.mxu0 %vm225_vm1, %v4274_v47  ;;  %3153 = vmatmul.msk.bf16.vlgmr.msrb.gmra.mxu1 %vm225_vm1, %v4274_v47 }
 0xd7a   :  { %3167 = vmatmul.msk.bf16.vlgmr.msrb.gmra.mxu2 %vm225_vm1, %v4274_v47 }
 0xdf6   :  { %v1625_v49 = vpop.f32.mrf.mxu1  ;;  %v1589_v50 = vpop.f32.mrf.mxu0 }
 0xdf7   :  { %v1626_v29 = vadd.f32 %v3547_v48, %v1625_v49  ;;  %v1590_v56 = vadd.f32 %v3546_v51, %v1589_v50 }
 0xdf9   :  { %v1668_v52 = vpack.c.bf16 %v1626_v29, %v1626_v29  ;;  %v1666_v3 = vpack.c.bf16 %v1590_v56, %v1590_v56 }
 0xdfb   :  { %v1674_v55 = vsel %vm455_vm15, %v1668_v52, 0 }
 0xdfc   :  { %1683 = vmatpush.bf16.xpose.msra.mxu0 %v1674_v55 }
 0xdfd   :  { %v1661_v57 = vpop.f32.mrf.mxu2 }
 0xdfe   :  { %v1662_v61 = vadd.f32 %v3548_v54, %v1661_v57  ;;  %v1627_v62 = vpop.f32.mrf.mxu1  ;;  %v1591_v31 = vpop.f32.mrf.mxu0  ;;  %v3551_v57 = vld [vmem:[%s4593_s12 + $0x6] ss:$0 sm:$0xff] }
 0xdff   :  { %v1628_v63 = vadd.f32 %v3547_v48, %v1627_v62  ;;  %v1592_v8 = vadd.f32 %v3546_v51, %v1591_v31  ;;  %v3461_v62 = vld [vmem:[%s4591_s10 + $0x58] sm:$0xff] }
 0xe00   :  { %v1732_v1 = vpack.c.bf16 %v1662_v61, %v1662_v61 }
 0xe01   :  { %v1669_v4 = vpack.c.bf16 %v1628_v63, %v1628_v63  ;;  %v1667_v13 = vpack.c.bf16 %v1592_v8, %v1592_v8  ;;  %v3460_v63 = vld [vmem:[%s4591_s10 + $0x50] sm:$0xff]  ;;  %v3463_v8 = vld [vmem:[%s4633_s7 + $0x68] sm:$0xff] }
 0xe02   :  { %v1738_v6 = vsel %vm523_vm0, %v1732_v1, 0 }
 0xe03   :  { %v1693_v7 = vsel %vm455_vm15, %v1669_v4, 0  ;;  %1747 = vmatpush.bf16.msra.mxu2 %v1738_v6  ;;  %3168 = vmatmul.msk.bf16.vlgmr.msra.gmra.mxu0 %vm455_vm15, %v1666_v3 }
 0xe04   :  { %1800 = vmatpush.bf16.msrb.mxu0 %v3457_v53  ;;  %1702 = vmatpush.bf16.xpose.msra.mxu1 %v1693_v7 }
 0xe05   :  { %v1663_v33 = vpop.f32.mrf.mxu2 }
 0xe06   :  { %v1664_v10 = vadd.f32 %v3548_v54, %v1663_v33 }
 0xe07   :  { %1872 = vmatpush.bf16.msrb.mxu2 %v3461_v62 }
 0xe08   :  { %1801 = vmatpush.bf16.msrb.mxu0 %v3456_v58  ;;  %v1733_v12 = vpack.c.bf16 %v1664_v10, %v1664_v10 }
 0xe0a   :  { %v1757_v14 = vsel %vm523_vm0, %v1733_v12, 0 }
 0xe0b   :  { %1766 = vmatpush.bf16.msra.mxu3 %v1757_v14  ;;  %3169 = vmatmul.msk.bf16.vlgmr.msra.gmra.mxu1 %vm455_vm15, %v1667_v13 }
 0xe0c   :  { %1836 = vmatpush.bf16.msrb.mxu1 %v3459_v2  ;;  %1873 = vmatpush.bf16.msrb.mxu2 %v3460_v63 }
 0xe10   :  { %1837 = vmatpush.bf16.msrb.mxu1 %v3458_v9  ;;  %v3462_v9 = vld [vmem:[%s4633_s7 + $0x60] sm:$0xff] }
 0xe13   :  { %3185 = vmatmul.msk.bf16.vlgmr.msrb.gmra.mxu0 %vm225_vm1, %v4274_v47 }
 0xe1b   :  { %3199 = vmatmul.msk.bf16.vlgmr.msrb.gmra.mxu1 %vm225_vm1, %v4274_v47 }
 0xe80   :  { %v1685_v15 = vpop.f32.mrf.mxu0 }
 0xe81   :  { %v1686_v17 = vadd.f32 %v4316_v16, %v1685_v15 }
 0xe83   :  { %v1708_v18 = vsel %vm455_vm15, %v1686_v17, -inf }
 0xe84   :  { %1709 = vmax.xlane.f32.xlu2 %v1708_v18 }
 0xe88   :  { %v1687_v19 = vpop.f32.mrf.mxu0  ;;  %v1704_v20 = vpop.f32.mrf.mxu1 }
 0xe89   :  { %v1705_v22 = vadd.f32 %v4323_v21, %v1704_v20 }
 0xe8b   :  { %v1711_v23 = vsel %vm455_vm15, %v1705_v22, -inf }
 0xe8c   :  { %1712 = vmax.xlane.f32.xlu1 %v1711_v23 }
 0xe90   :  { %v1706_v35 = vpop.f32.mrf.mxu1  ;;  %v1803_v25 = vpop.f32.mrf.mxu0 }
 0xe91   :  { %v4330_v26 = vadd.f32 %v3549_v24, %v1803_v25  ;;  %v3552_v25 = vld [vmem:[%s4594_s13 + $0x5] ss:$0 sm:$0xff] }
 0xe93   :  { %v1880_v14 = vpack.c.bf16 %v4330_v26, %v4330_v26 }
 0xe98   :  { %v1839_v28 = vpop.f32.mrf.mxu1  ;;  %v1805_v40 = vpop.f32.mrf.mxu0 }
 0xe99   :  { %v1840_v32 = vadd.f32 %v3550_v27, %v1839_v28  ;;  %v1806_v60 = vadd.f32 %v3549_v24, %v1805_v40  ;;  %v3470_v40 = vld [vmem:[%s4634_s8 + $0x70] sm:$0xff] }
 0xe9b   :  { %v1882_v34 = vpack.c.bf16 %v1840_v32, %v1840_v32  ;;  %v1881_v42 = vpack.c.bf16 %v1806_v60, %v1806_v60 }
 0xe9d   :  { %v1888_v37 = vsel %vm455_vm15, %v1882_v34, 0 }
 0xe9e   :  { %1897 = vmatpush.bf16.xpose.msrb.mxu3 %v1888_v37  ;;  %v3471_v37 = vld [vmem:[%s4634_s8 + $0x78] sm:$0xff] }
 0xea0   :  { %v1841_v38 = vpop.f32.mrf.mxu1 }
 0xea1   :  { %v1842_v39 = vadd.f32 %v3550_v27, %v1841_v38 }
 0xea3   :  { %v1883_v5 = vpack.c.bf16 %v1842_v39, %v1842_v39 }
 0xea5   :  { %v1907_v41 = vsel %vm455_vm15, %v1883_v5, 0 }
 0xea6   :  { %1916 = vmatpush.bf16.xpose.msra.mxu0 %v1907_v41 }
 0xead   :  { %3215 = vmatmul.msk.bf16.vlgmr.msra.gmra.mxu0 %vm455_vm15, %v1881_v42 }
 0xeae   :  { %2050 = vmatpush.bf16.msrb.mxu0 %v3465_v30 }
 0xeb2   :  { %2051 = vmatpush.bf16.msrb.mxu0 %v3464_v11 }
 0xebd   :  { %3245 = vmatmul.msk.bf16.vlgmr.msrb.gmra.mxu0 %vm225_vm1, %v4274_v47 }
 0xef7   :  { %v1710_v43 = vpop.xlane.xlu2 %1709 }
 0xef8   :  { %v1714_v44 = vsub.f32 %v1686_v17, %v1710_v43 }
 0xefa   :  { %v1716_v45 = vmul.f32 1.442695, %v1714_v44 }
 0xefc   :  { %3623 = vpow2.f32 %v1716_v45 }
 0xeff   :  { %v1713_v46 = vpop.xlane.xlu1 %1712 }
 0xf00   :  { %v1715_v48 = vsub.f32 %v1705_v22, %v1713_v46 }
 0xf02   :  { %v3624_v49 = vpop.eup %3623  ;;  %v1718_v29 = vmul.f32 1.442695, %v1715_v48 }
 0xf03   :  { %v1720_v50 = vsel %vm455_vm15, %v3624_v49, 0.0 }
 0xf04   :  { %3625 = vpow2.f32 %v1718_v29  ;;  %1721 = vadd.xlane.f32.xlu1 %v1720_v50 }
 0xf0a   :  { %v3626_v51 = vpop.eup %3625 }
 0xf0b   :  { %v1723_v52 = vsel %vm455_vm15, %v3626_v51, 0.0 }
 0xf0c   :  { %1724 = vadd.xlane.f32.xlu0 %v1723_v52  ;;  %v3553_v52 = vld [vmem:[%s4592_s11 + $0x6] ss:$0 sm:$0xff] }
 0xf2a   :  { %v1918_v53 = vpop.f32.mrf.mxu0 }
 0xf2b   :  { %v1919_v54 = vadd.f32 %v4323_v21, %v1918_v53 }
 0xf2d   :  { %v1925_v55 = vsel %vm455_vm15, %v1919_v54, -inf }
 0xf2e   :  { %1926 = vmax.xlane.f32.xlu0 %v1925_v55 }
 0xf32   :  { %v1920_v56 = vpop.f32.mrf.mxu0 }
 0xf3a   :  { %v2053_v58 = vpop.f32.mrf.mxu0 }
 0xf3b   :  { %v4353_v61 = vadd.f32 %v3551_v57, %v2053_v58 }
 0xf3d   :  { %v2096_v41 = vpack.c.bf16 %v4353_v61, %v4353_v61 }
 0xf3f   :  { %v2102_v44 = vsel %vm455_vm15, %v2096_v41, 0 }
 0xf42   :  { %v2055_v10 = vpop.f32.mrf.mxu0 }
 0xf43   :  { %v2056_v12 = vadd.f32 %v3551_v57, %v2055_v10 }
 0xf45   :  { %v2097_v13 = vpack.c.bf16 %v2056_v12, %v2056_v12  ;;  %v3554_v12 = vld [vmem:[%s4593_s12 + $0x7] ss:$0 sm:$0xff] }
 0xf47   :  { %v2121_v15 = vsel %vm455_vm15, %v2097_v13, 0  ;;  %v3555_v13 = vld [vmem:[%s4592_s11 + $0x7] ss:$0 sm:$0xff] }
 0xf77   :  { %v1722_v1 = vpop.xlane.xlu1 %1721 }
 0xf78   :  { %3627 = vrcp.f32 %v1722_v1 }
 0xf7e   :  { %v3628_v3 = vpop.eup %3627 }
 0xf7f   :  { %v1728_v4 = vmul.f32 %v3628_v3, %v3624_v49  ;;  %v1725_v2 = vpop.xlane.xlu0 %1724  ;;  %v3469_v49 = vld [vmem:[%s4633_s7 + $0x78] sm:$0xff] }
 0xf80   :  { %3629 = vrcp.f32 %v1725_v2 }
 0xf81   :  { %v1730_v6 = vpack.c.bf16 %v1728_v4, %v1728_v4 }
 0xf83   :  { %3170 = vmatmul.msk.bf16.vlgmr.msra.gmra.mxu2 %vm455_vm15, %v1730_v6 }
 0xf86   :  { %v3630_v31 = vpop.eup %3629 }
 0xf87   :  { %v1729_v7 = vmul.f32 %v3630_v31, %v3626_v51  ;;  %v3468_v51 = vld [vmem:[%s4633_s7 + $0x70] sm:$0xff] }
 0xf89   :  { %v1731_v33 = vpack.c.bf16 %v1729_v7, %v1729_v7 }
 0xf8b   :  { %3171 = vmatmul.msk.bf16.vlgmr.msra.gmra.mxu3 %vm455_vm15, %v1731_v33 }
 0xf8c   :  { %2014 = vmatpush.bf16.msra.mxu3 %v3463_v8 }
 0xf90   :  { %2015 = vmatpush.bf16.msra.mxu3 %v3462_v9 }
 0xf93   :  { %3213 = vmatmul.msk.bf16.vlgmr.msrb.gmra.mxu2 %vm225_vm1, %v4274_v47 }
 0xf9b   :  { %3214 = vmatmul.msk.bf16.vlgmr.msrb.gmra.mxu3 %vm455_vm15, %v1880_v14 }
 0xf9c   :  { %2130 = vmatpush.bf16.xpose.msrb.mxu3 %v2121_v15 }
 0xfa1   :  { %v1927_v17 = vpop.xlane.xlu0 %1926 }
 0xfa2   :  { %v1929_v18 = vsub.f32 %v1919_v54, %v1927_v17 }
 0xfa4   :  { %v1932_v19 = vmul.f32 1.442695, %v1929_v18 }
 0xfa6   :  { %3631 = vpow2.f32 %v1932_v19 }
 0xfab   :  { %3231 = vmatmul.msk.bf16.vlgmr.msra.gmra.mxu3 %vm225_vm1, %v4274_v47 }
 0xfac   :  { %v3632_v20 = vpop.eup %3631  ;;  %2264 = vmatpush.bf16.msra.mxu3 %v3471_v37 }
 0xfad   :  { %v1937_v22 = vsel %vm455_vm15, %v3632_v20, 0.0 }
 0xfae   :  { %1938 = vadd.xlane.f32.xlu1 %v1937_v22 }
 0xfb0   :  { %2265 = vmatpush.bf16.msra.mxu3 %v3470_v40 }
0x1006   :  { %v4378_v23 = vpop.f32.mrf.mxu2 }
0x100e   :  { %v1751_v24 = vpop.f32.mrf.mxu2  ;;  %v4380_v35 = vpop.f32.mrf.mxu3 }
0x1016   :  { %v1770_v26 = vpop.f32.mrf.mxu3  ;;  %v1875_v27 = vpop.f32.mrf.mxu2 }
0x1017   :  { %v1876_v28 = vadd.f32 %v3552_v25, %v1875_v27 }
0x1019   :  { %v1946_v32 = vpack.c.bf16 %v1876_v28, %v1876_v28  ;;  %v3467_v28 = vld [vmem:[%s4591_s10 + $0x68] sm:$0xff] }
0x101b   :  { %v1952_v34 = vsel %vm523_vm0, %v1946_v32, 0  ;;  %v3466_v32 = vld [vmem:[%s4591_s10 + $0x60] sm:$0xff] }
0x101c   :  { %1961 = vmatpush.bf16.msra.mxu1 %v1952_v34 }
0x101e   :  { %v1877_v38 = vpop.f32.mrf.mxu2  ;;  %v1899_v39 = vpop.f32.mrf.mxu3 }
0x101f   :  { %v1878_v5 = vadd.f32 %v3552_v25, %v1877_v38  ;;  %v1900_v30 = vadd.f32 %v4316_v16, %v1899_v39 }
0x1020   :  { %2086 = vmatpush.bf16.msrb.mxu1 %v3467_v28 }
0x1021   :  { %v1947_v60 = vpack.c.bf16 %v1878_v5, %v1878_v5  ;;  %v1939_v11 = vpop.xlane.xlu1 %1938  ;;  %v1922_v42 = vsel %vm455_vm15, %v1900_v30, -inf }
0x1022   :  { %3633 = vrcp.f32 %v1939_v11  ;;  %1923 = vmax.xlane.f32.xlu2 %v1922_v42 }
0x1023   :  { %v1971_v43 = vsel %vm523_vm0, %v1947_v60, 0 }
0x1024   :  { %1980 = vmatpush.bf16.msra.mxu2 %v1971_v43  ;;  %2087 = vmatpush.bf16.msrb.mxu1 %v3466_v32 }
0x1026   :  { %v1901_v45 = vpop.f32.mrf.mxu3 }
0x1028   :  { %2111 = vmatpush.bf16.xpose.msrb.mxu2 %v2102_v44  ;;  %v3634_v46 = vpop.eup %3633 }
0x1029   :  { %v1943_v48 = vmul.f32 %v3634_v46, %v3632_v20 }
0x102b   :  { %v1945_v29 = vpack.c.bf16 %v1943_v48, %v1943_v48 }
0x102d   :  { %3217 = vmatmul.msk.bf16.vlgmr.msra.gmra.mxu2 %vm455_vm15, %v1945_v29 }
0x102e   :  { %v2017_v50 = vpop.f32.mrf.mxu3 }
0x102f   :  { %v2018_v54 = vadd.f32 %v3553_v52, %v2017_v50 }
0x1030   :  { %2228 = vmatpush.bf16.msra.mxu2 %v3469_v49 }
0x1031   :  { %v2094_v57 = vpack.c.bf16 %v2018_v54, %v2018_v54 }
0x1034   :  { %2229 = vmatpush.bf16.msra.mxu2 %v3468_v51 }
0x1036   :  { %v2019_v53 = vpop.f32.mrf.mxu3 }
0x1037   :  { %v2020_v55 = vadd.f32 %v3553_v52, %v2019_v53  ;;  %v3556_v53 = vld [vmem:[%s4594_s13 + $0x6] ss:$0 sm:$0xff] }
0x1039   :  { %v2095_v56 = vpack.c.bf16 %v2020_v55, %v2020_v55 }
0x103b   :  { %3261 = vmatmul.msk.bf16.vlgmr.msrb.gmra.mxu3 %vm455_vm15, %v2095_v56 }
0x103d   :  { %3260 = vmatmul.msk.bf16.vlgmr.msrb.gmra.mxu2 %vm455_vm15, %v2094_v57 }
0x104b   :  { %3291 = vmatmul.msk.bf16.vlgmr.msra.gmra.mxu3 %vm225_vm1, %v4274_v47 }
0x104d   :  { %3277 = vmatmul.msk.bf16.vlgmr.msra.gmra.mxu2 %vm225_vm1, %v4274_v47 }
0x1095   :  { %v1924_v58 = vpop.xlane.xlu2 %1923 }
0x1096   :  { %v1928_v61 = vsub.f32 %v1900_v30, %v1924_v58 }
0x1098   :  { %v1930_v62 = vmul.f32 1.442695, %v1928_v61  ;;  %v3472_v61 = vld [vmem:[%s4591_s10 + $0x70] sm:$0xff] }
0x109a   :  { %3635 = vpow2.f32 %v1930_v62 }
0x10a0   :  { %v3636_v63 = vpop.eup %3635 }
0x10a1   :  { %v1934_v1 = vsel %vm455_vm15, %v3636_v63, 0.0 }
0x10a2   :  { %1935 = vadd.xlane.f32.xlu0 %v1934_v1 }
0x10b0   :  { %v1982_v3 = vpop.f32.mrf.mxu2 }
0x10b8   :  { %v1984_v4 = vpop.f32.mrf.mxu2 }
0x10be   :  { %v2132_v2 = vpop.f32.mrf.mxu3 }
0x10bf   :  { %v2133_v6 = vadd.f32 %v4323_v21, %v2132_v2 }
0x10c0   :  { %v2113_v31 = vpop.f32.mrf.mxu2 }
0x10c1   :  { %v2114_v7 = vadd.f32 %v4316_v16, %v2113_v31  ;;  %v2139_v8 = vsel %vm455_vm15, %v2133_v6, -inf }
0x10c2   :  { %2140 = vmax.xlane.f32.xlu2 %v2139_v8 }
0x10c3   :  { %v2136_v33 = vsel %vm455_vm15, %v2114_v7, -inf }
0x10c4   :  { %2137 = vmax.xlane.f32.xlu0 %v2136_v33 }
0x10c6   :  { %v2134_v9 = vpop.f32.mrf.mxu3 }
0x10c8   :  { %v2115_v10 = vpop.f32.mrf.mxu2 }
0x10ce   :  { %v2267_v14 = vpop.f32.mrf.mxu3 }
0x10cf   :  { %v4425_v15 = vadd.f32 %v3554_v12, %v2267_v14 }
0x10d0   :  { %v2231_v17 = vpop.f32.mrf.mxu2 }
0x10d1   :  { %v4427_v18 = vadd.f32 %v3555_v13, %v2231_v17 }
0x10d6   :  { %v2269_v19 = vpop.f32.mrf.mxu3 }
0x10d7   :  { %v2270_v20 = vadd.f32 %v3554_v12, %v2269_v19  ;;  %v2308_v12 = vpack.c.bf16 %v4427_v18, %v4427_v18 }
0x10d8   :  { %v2233_v24 = vpop.f32.mrf.mxu2 }
0x10d9   :  { %v2311_v22 = vpack.c.bf16 %v2270_v20, %v2270_v20  ;;  %v2234_v26 = vadd.f32 %v3555_v13, %v2233_v24 }
0x10db   :  { %v2335_v25 = vsel %vm455_vm15, %v2311_v22, 0  ;;  %v2309_v27 = vpack.c.bf16 %v2234_v26, %v2234_v26 }
0x10dc   :  { %2344 = vmatpush.bf16.xpose.msrb.mxu2 %v2335_v25  ;;  %v3557_v25 = vld [vmem:[%s4594_s13 + $0x7] ss:$0 sm:$0xff]  ;;  %s4639_s13 = smov 16  }
0x10e3   :  { %3307 = vmatmul.msk.bf16.vlgmr.msrb.gmra.mxu2 %vm455_vm15, %v2309_v27 }
0x1115   :  { %v1936_v34 = vpop.xlane.xlu0 %1935 }
0x1116   :  { %3637 = vrcp.f32 %v1936_v34 }
0x111c   :  { %v3638_v37 = vpop.eup %3637 }
0x111d   :  { %v1942_v38 = vmul.f32 %v3638_v37, %v3636_v63 }
0x111f   :  { %v1944_v39 = vpack.c.bf16 %v1942_v38, %v1942_v38 }
0x1121   :  { %3216 = vmatmul.msk.bf16.vlgmr.msra.gmra.mxu1 %vm455_vm15, %v1944_v39 }
0x1131   :  { %3259 = vmatmul.msk.bf16.vlgmr.msrb.gmra.mxu1 %vm225_vm1, %v4274_v47 }
0x1135   :  { %v2141_v5 = vpop.xlane.xlu2 %2140 }
0x1136   :  { %v2143_v30 = vsub.f32 %v2133_v6, %v2141_v5 }
0x1137   :  { %v2138_v40 = vpop.xlane.xlu0 %2137 }
0x1138   :  { %v2146_v41 = vmul.f32 1.442695, %v2143_v30  ;;  %v2142_v60 = vsub.f32 %v2114_v7, %v2138_v40 }
0x113a   :  { %3639 = vpow2.f32 %v2146_v41  ;;  %v2144_v11 = vmul.f32 1.442695, %v2142_v60 }
0x113c   :  { %3641 = vpow2.f32 %v2144_v11 }
0x1140   :  { %v3640_v42 = vpop.eup %3639 }
0x1141   :  { %v2151_v43 = vsel %vm455_vm15, %v3640_v42, 0.0 }
0x1142   :  { %v3642_v44 = vpop.eup %3641  ;;  %2152 = vadd.xlane.f32.xlu1 %v2151_v43 }
0x1143   :  { %v2148_v45 = vsel %vm455_vm15, %v3642_v44, 0.0 }
0x1144   :  { %2149 = vadd.xlane.f32.xlu2 %v2148_v45 }
0x1166   :  { %v2346_v46 = vpop.f32.mrf.mxu2 }
0x1167   :  { %v2347_v48 = vadd.f32 %v4323_v21, %v2346_v46  ;;  %v3473_v21 = vld [vmem:[%s4591_s10 + $0x78] sm:$0xff] }
0x1169   :  { %v2353_v49 = vsel %vm455_vm15, %v2347_v48, -inf }
0x116a   :  { %2354 = vmax.xlane.f32.xlu0 %v2353_v49 }
0x116e   :  { %v2348_v29 = vpop.f32.mrf.mxu2 }
0x119e   :  { %v1963_v50 = vpop.f32.mrf.mxu1 }
0x119f   :  { %v3508_v51 = vpack.i.bf16 %v1982_v3, %v1963_v50  ;;  %v2310_v3 = vpack.c.bf16 %v4425_v15, %v4425_v15 }
0x11a1   :  { %3509 = vrot.lane.b32.xlu0 %v3508_v51, %s4638_s5  ;;  %v2316_v31 = vsel %vm455_vm15, %v2310_v3, 0 }
0x11a6   :  { %v1965_v52 = vpop.f32.mrf.mxu1 }
0x11ae   :  { %v2089_v54 = vpop.f32.mrf.mxu1 }
0x11af   :  { %v2090_v55 = vadd.f32 %v3556_v53, %v2089_v54  ;;  %v3475_v54 = vld [vmem:[%s4595_s14 + $0x18] sm:$0xff] }
0x11b1   :  { %v2160_v56 = vpack.c.bf16 %v2090_v55, %v2090_v55 }
0x11b3   :  { %v2166_v57 = vsel %vm523_vm0, %v2160_v56, 0 }
0x11b4   :  { %2175 = vmatpush.bf16.msra.mxu0 %v2166_v57  ;;  %v3474_v57 = vld [vmem:[%s4595_s14 + $0x10] sm:$0xff] }
0x11b5   :  { %v2153_v58 = vpop.xlane.xlu1 %2152 }
0x11b6   :  { %3643 = vrcp.f32 %v2153_v58  ;;  %v2091_v62 = vpop.f32.mrf.mxu1 }
0x11b7   :  { %v2092_v63 = vadd.f32 %v3556_v53, %v2091_v62  ;;  %v2150_v1 = vpop.xlane.xlu2 %2149 }
0x11b8   :  { %2300 = vmatpush.bf16.msrb.mxu0 %v3473_v21  ;;  %3645 = vrcp.f32 %v2150_v1 }
0x11b9   :  { %v2161_v4 = vpack.c.bf16 %v2092_v63, %v2092_v63 }
0x11bb   :  { %v2185_v2 = vsel %vm523_vm0, %v2161_v4, 0 }
0x11bc   :  { %2301 = vmatpush.bf16.msrb.mxu0 %v3472_v61  ;;  %v3644_v6 = vpop.eup %3643  ;;  %2194 = vmatpush.bf16.msra.mxu1 %v2185_v2 }
0x11bd   :  { %v2157_v7 = vmul.f32 %v3644_v6, %v3640_v42 }
0x11be   :  { %v3646_v8 = vpop.eup %3645 }
0x11bf   :  { %v2159_v33 = vpack.c.bf16 %v2157_v7, %v2157_v7  ;;  %v2156_v9 = vmul.f32 %v3646_v8, %v3642_v44 }
0x11c0   :  { %2325 = vmatpush.bf16.xpose.msrb.mxu1 %v2316_v31 }
0x11c1   :  { %v2158_v10 = vpack.c.bf16 %v2156_v9, %v2156_v9  ;;  %3263 = vmatmul.msk.bf16.vlgmr.msra.gmra.mxu1 %vm455_vm15, %v2159_v33 }
0x11c3   :  { %3262 = vmatmul.msk.bf16.vlgmr.msra.gmra.mxu0 %vm455_vm15, %v2158_v10 }
0x11c8   :  { %2476 = vmatpush.bf16.msra.mxu1 %v3475_v54 }
0x11cc   :  { %2477 = vmatpush.bf16.msra.mxu1 %v3474_v57 }
0x11d1   :  { %3306 = vmatmul.msk.bf16.vlgmr.msrb.gmra.mxu1 %vm455_vm15, %v2308_v12 }
0x11d3   :  { %3305 = vmatmul.msk.bf16.vlgmr.msrb.gmra.mxu0 %vm225_vm1, %v4274_v47 }
0x11dd   :  { %v2355_v17 = vpop.xlane.xlu0 %2354 }
0x11de   :  { %v2357_v20 = vsub.f32 %v2347_v48, %v2355_v17 }
0x11e0   :  { %v2360_v24 = vmul.f32 1.442695, %v2357_v20 }
0x11e2   :  { %3647 = vpow2.f32 %v2360_v24 }
0x11e8   :  { %v3648_v37 = vpop.eup %3647 }
0x11e9   :  { %v2365_v30 = vsel %vm455_vm15, %v3648_v37, 0.0 }
0x1213   :  { %v3510_v58 = vpop.permute.xlu0 %3509 }
0x1214   :  { %v3512_v62 = vunpack.i.h.bf16 %v3510_v58  ;;  %v3511_v63 = vunpack.i.l.bf16 %v3510_v58 }
0x1216   :  { %v2439_v2 = vsel %vm455_vm15, %v4380_v35, %v3512_v62  ;;  %v2438_v6 = vsel %vm455_vm15, %v4378_v23, %v3511_v63  ;;  %v3558_v35 = vld [vmem:[%s4596_s15 + $0x1] ss:$0 sm:$0xff]  ;;  %v3485_v63 = vld [vmem:[%s4601_s20 + $0x78] sm:$0xff] }
0x123e   :  { %v2196_v13 = vpop.f32.mrf.mxu1 }
0x1240   :  { %v2177_v14 = vpop.f32.mrf.mxu0 }
0x1241   :  { %v3513_v15 = vpack.i.bf16 %v2196_v13, %v2177_v14 }
0x1246   :  { %v2198_v19 = vpop.f32.mrf.mxu1 }
0x1248   :  { %v2179_v22 = vpop.f32.mrf.mxu0 }
0x124e   :  { %v2327_v26 = vpop.f32.mrf.mxu1 }
0x124f   :  { %v2328_v18 = vadd.f32 %v4316_v16, %v2327_v26 }
0x1250   :  { %v2303_v27 = vpop.f32.mrf.mxu0 }
0x1251   :  { %v2304_v28 = vadd.f32 %v3557_v25, %v2303_v27  ;;  %v2350_v47 = vsel %vm455_vm15, %v2328_v18, -inf }
0x1252   :  { %2351 = vmax.xlane.f32.xlu1 %v2350_v47 }
0x1253   :  { %v2374_v32 = vpack.c.bf16 %v2304_v28, %v2304_v28 }
0x1255   :  { %v2380_v34 = vsel %vm523_vm0, %v2374_v32, 0 }
0x1256   :  { %v2329_v38 = vpop.f32.mrf.mxu1  ;;  %2389 = vmatpush.bf16.msrb.mxu3 %v2380_v34  ;;  %v3477_v34 = vld [vmem:[%s4599_s18 + $0x18] sm:$0xff] }
0x1257   :  { %2576 = vmatpush.bf16.msra.mxu2 %v3477_v34 }
0x1258   :  { %v2305_v39 = vpop.f32.mrf.mxu0 }
0x1259   :  { %v2306_v5 = vadd.f32 %v3557_v25, %v2305_v39 }
0x125a   :  { %2366 = vadd.xlane.f32.xlu1 %v2365_v30  ;;  %2692 = vmatpush.bf16.msra.mxu3 %v3485_v63 }
0x125b   :  { %v2375_v40 = vpack.c.bf16 %v2306_v5, %v2306_v5  ;;  %v3476_v5 = vld [vmem:[%s4599_s18 + $0x10] sm:$0xff] }
0x125c   :  { %2577 = vmatpush.bf16.msra.mxu2 %v3476_v5 }
0x125d   :  { %v2399_v16 = vsel %vm523_vm0, %v2375_v40, 0 }
0x125e   :  { %2408 = vmatpush.bf16.msra.mxu0 %v2399_v16 }
0x12c5   :  { %v2352_v41 = vpop.xlane.xlu1 %2351 }
0x12c6   :  { %v2356_v60 = vsub.f32 %v2328_v18, %v2352_v41 }
0x12c8   :  { %v2358_v11 = vmul.f32 1.442695, %v2356_v60 }
0x12ca   :  { %3649 = vpow2.f32 %v2358_v11 }
0x12cd   :  { %v2367_v42 = vpop.xlane.xlu1 %2366 }
0x12ce   :  { %3651 = vrcp.f32 %v2367_v42 }
0x12d0   :  { %v3650_v43 = vpop.eup %3649 }
0x12d1   :  { %v2362_v44 = vsel %vm455_vm15, %v3650_v43, 0.0 }
0x12d2   :  { %2363 = vadd.xlane.f32.xlu2 %v2362_v44 }
0x12d4   :  { %v3652_v45 = vpop.eup %3651 }
0x12d5   :  { %v2371_v46 = vmul.f32 %v3652_v45, %v3648_v37 }
0x12d7   :  { %v2373_v48 = vpack.c.bf16 %v2371_v46, %v2371_v46 }
0x12d9   :  { %3309 = vmatmul.msk.bf16.vlgmr.msra.gmra.mxu0 %vm455_vm15, %v2373_v48 }
0x12ea   :  { %3514 = vrot.lane.b32.xlu2 %v3513_v15, %s4639_s13 }
0x1345   :  { %v2364_v49 = vpop.xlane.xlu2 %2363 }
0x1346   :  { %3653 = vrcp.f32 %v2364_v49 }
0x134c   :  { %v3654_v29 = vpop.eup %3653 }
0x134d   :  { %v2370_v50 = vmul.f32 %v3654_v29, %v3650_v43  ;;  %v3515_v61 = vpop.permute.xlu2 %3514 }
0x134e   :  { %v3517_v1 = vunpack.i.h.bf16 %v3515_v61  ;;  %v3516_v3 = vunpack.i.l.bf16 %v3515_v61 }
0x134f   :  { %v2372_v51 = vpack.c.bf16 %v2370_v50, %v2370_v50 }
0x1350   :  { %v2441_v8 = vsel %vm1227_vm2, %v2439_v2, %v3517_v1  ;;  %v2440_v33 = vsel %vm1227_vm2, %v2438_v6, %v3516_v3  ;;  %v3484_v1 = vld [vmem:[%s4601_s20 + $0x70] sm:$0xff]  ;;  %v3483_v3 = vld [vmem:[%s4601_s20 + $0x68] sm:$0xff]  ;;  %v3561_v2 = vld [vmem:[%s4600_s19 + $0x1] ss:$0 sm:$0xff] }
0x1351   :  { %3308 = vmatmul.msk.bf16.vlgmr.msrb.gmra.mxu3 %vm455_vm15, %v2372_v51  ;;  %v3559_v51 = vld [vmem:[%s4597_s16 + $0x1] ss:$0 sm:$0xff]  ;;  %v3481_v6 = vld [vmem:[%s4601_s20 + $0x58] sm:$0xff]  ;;  %s2837_s16 = sshll.u32 %s4606_s25, 4  ;;  %s2838_s16 = int_to_ptr.hbm [resolvable:$true] %s2837_s16 }
0x1352   :  { %2693 = vmatpush.bf16.msra.mxu3 %v3484_v1 }
0x1356   :  { %v2410_v52 = vpop.f32.mrf.mxu0  ;;  %2694 = vmatpush.bf16.msra.mxu3 %v3483_v3  ;;  %v3487_v3 = vld [vmem:[%s4605_s24 + $0x8] sm:$0xff] }
0x1357   :  { %2806 = vmatpush.bf16.msrb.mxu0 %v3487_v3 }
0x135e   :  { %v2412_v53 = vpop.f32.mrf.mxu0 }
0x13d4   :  { %v2391_v55 = vpop.f32.mrf.mxu3 }
0x13d5   :  { %v3518_v56 = vpack.i.bf16 %v2410_v52, %v2391_v55  ;;  %v3560_v55 = vld [vmem:[%s4598_s17 + $0x1] ss:$0 sm:$0xff] }
0x13d7   :  { %3519 = vrot.lane.b32.xlu1 %v3518_v56, %s4640_s1 }
0x13dc   :  { %v2393_v21 = vpop.f32.mrf.mxu3 }
0x1449   :  { %v3520_v4 = vpop.permute.xlu1 %3519 }
0x144a   :  { %v3522_v31 = vunpack.i.h.bf16 %v3520_v4  ;;  %v3521_v7 = vunpack.i.l.bf16 %v3520_v4  ;;  %v3482_v4 = vld [vmem:[%s4601_s20 + $0x60] sm:$0xff] }
0x144b   :  { %2695 = vmatpush.bf16.msra.mxu3 %v3482_v4 }
0x144c   :  { %v2442_v9 = vsel %vm1230_vm3, %v2440_v33, %v3521_v7  ;;  %v2443_v10 = vsel %vm1230_vm3, %v2441_v8, %v3522_v31  ;;  %v3480_v8 = vld [vmem:[%s4601_s20 + $0x50] sm:$0xff] }
0x144d   :  { %v2444_v12 = vpack.c.bf16 %v2443_v10, %v2442_v9  ;;  %v3479_v10 = vld [vmem:[%s4601_s20 + $0x48] sm:$0xff] }
0x144f   :  { %3323 = vmatmul.msk.bf16.vlgmr.msra.gmra.mxu1 %vm225_vm1, %v2444_v12  ;;  %2696 = vmatpush.bf16.msra.mxu3 %v3481_v6  ;;  %v3486_v6 = vld [vmem:[%s4605_s24] sm:$0xff] }
0x1450   :  { %2807 = vmatpush.bf16.msrb.mxu0 %v3486_v6 }
0x1453   :  { %2697 = vmatpush.bf16.msra.mxu3 %v3480_v8 }
0x1457   :  { %2698 = vmatpush.bf16.msra.mxu3 %v3479_v10 }
0x14cc   :  { %v2479_v13 = vpop.f32.mrf.mxu1 }
0x14cd   :  { %v2480_v14 = vadd.f32 %v3558_v35, %v2479_v13  ;;  %v3478_v13 = vld [vmem:[%s4601_s20 + $0x40] sm:$0xff] }
0x14ce   :  { %2699 = vmatpush.bf16.msra.mxu3 %v3478_v13 }
0x14cf   :  { %v4498_v23 = vadd.f32 %v2480_v14, %v4233_v59 }
0x14d1   :  { %v2490_v15 = vsel %vm225_vm1, %v4498_v23, 0.0 }
0x14d2   :  { %2491 = vadd.xlane.f32.xlu0 %v2490_v15 }
0x14d4   :  { %v2481_v17 = vpop.f32.mrf.mxu1 }
0x14d5   :  { %v2482_v19 = vadd.f32 %v3558_v35, %v2481_v17 }
0x14d7   :  { %v4503_v20 = vadd.f32 %v2482_v19, %v4238_v0 }
0x14d9   :  { %v2493_v22 = vsel %vm225_vm1, %v4503_v20, 0.0 }
0x14da   :  { %2494 = vadd.xlane.f32.xlu2 %v2493_v22 }
0x1545   :  { %v2492_v24 = vpop.xlane.xlu0 %2491 }
0x1546   :  { %v2496_v25 = vmul.f32 %v2492_v24, %v3890_v36 }
0x1548   :  { %v2498_v26 = vsub.f32 %v4498_v23, %v2496_v25 }
0x154a   :  { %v2500_v59 = vmul.f32 %v2498_v26, %v2498_v26 }
0x154c   :  { %v2502_v18 = vsel %vm225_vm1, %v2500_v59, 0.0 }
0x154d   :  { %v2495_v27 = vpop.xlane.xlu2 %2494  ;;  %2503 = vadd.xlane.f32.xlu1 %v2502_v18 }
0x154e   :  { %v2497_v28 = vmul.f32 %v2495_v27, %v3890_v36 }
0x1550   :  { %v2499_v47 = vsub.f32 %v4503_v20, %v2497_v28 }
0x1552   :  { %v2501_v0 = vmul.f32 %v2499_v47, %v2499_v47 }
0x1554   :  { %v2505_v32 = vsel %vm225_vm1, %v2501_v0, 0.0 }
0x1555   :  { %2506 = vadd.xlane.f32.xlu0 %v2505_v32 }
0x15c0   :  { %v2504_v37 = vpop.xlane.xlu1 %2503 }
0x15c1   :  { %v2508_v38 = vmul.f32 %v2504_v37, %v3890_v36 }
0x15c3   :  { %v2510_v39 = vadd.f32 1e-05, %v2508_v38 }
0x15c5   :  { %3655 = vrsqrt.f32 %v2510_v39  ;;  %vm2518_vm0 = vweird.f32 %v2510_v39 }
0x15c8   :  { %v2507_v30 = vpop.xlane.xlu0 %2506 }
0x15c9   :  { %v2509_v40 = vmul.f32 %v2507_v30, %v3890_v36 }
0x15cb   :  { %v3656_v16 = vpop.eup %3655  ;;  %v2511_v41 = vadd.f32 1e-05, %v2509_v40 }
0x15cc   :  { %v2513_v60 = vmul.f32 %v3656_v16, %v2510_v39  ;;  %vm2519_vm15 = vweird.f32 %v3656_v16 }
0x15cd   :  { %3657 = vrsqrt.f32 %v2511_v41  ;;  %vm2520_vm2 = vmor %vm2518_vm0, %vm2519_vm15  ;;  %vm2528_vm13 = vweird.f32 %v2511_v41  ;;  %vm2723_vm15 = vcmask 254976  }
0x15ce   :  { %v2514_v11 = vmul.f32 %v3656_v16, %v2513_v60 }
0x15d0   :  { %v2515_v42 = vmul.f32 0.5, %v2514_v11 }
0x15d2   :  { %v2516_v43 = vsub.f32 1.5, %v2515_v42 }
0x15d3   :  { %v3658_v44 = vpop.eup %3657 }
0x15d4   :  { %v2517_v45 = vmul.f32 %v3656_v16, %v2516_v43  ;;  %v2523_v46 = vmul.f32 %v3658_v44, %v2511_v41  ;;  %vm2529_vm3 = vweird.f32 %v3658_v44 }
0x15d5   :  { %vm2530_vm14 = vmor %vm2528_vm13, %vm2529_vm3  ;;  %vm2814_vm13 = vcmask 1041408  }
0x15d6   :  { %v2524_v48 = vmul.f32 %v3658_v44, %v2523_v46  ;;  %v2521_v49 = vsel %vm2520_vm2, %v3656_v16, %v2517_v45 }
0x15d7   :  { %v2532_v52 = vmul.f32 %v2521_v49, %v2498_v26  ;;  %v3562_v49 = vld [vmem:[%s4602_s21 + $0x1] ss:$0 sm:$0xff] }
0x15d8   :  { %v2525_v29 = vmul.f32 0.5, %v2524_v48 }
0x15d9   :  { %v2537_v56 = vmul.f32 %v3559_v51, %v2532_v52 }
0x15da   :  { %v2526_v50 = vsub.f32 1.5, %v2525_v29 }
0x15db   :  { %v2542_v58 = vadd.f32 %v3560_v55, %v2537_v56 }
0x15dc   :  { %v2527_v53 = vmul.f32 %v3658_v44, %v2526_v50 }
0x15de   :  { %v2531_v54 = vsel %vm2530_vm14, %v3658_v44, %v2527_v53 }
0x15df   :  { %v2533_v21 = vmul.f32 %v2531_v54, %v2499_v47 }
0x15e1   :  { %v2538_v57 = vmul.f32 %v3559_v51, %v2533_v21 }
0x15e3   :  { %v2543_v61 = vadd.f32 %v3560_v55, %v2538_v57 }
0x15e5   :  { %v2544_v62 = vpack.c.bf16 %v2543_v61, %v2542_v58 }
0x15e7   :  { %3339 = vmatmul.msk.bf16.vlgmr.msra.gmra.mxu2 %vm225_vm1, %v2544_v62 }
0x166a   :  { %v2579_v31 = vpop.f32.mrf.mxu2 }
0x166b   :  { %v2580_v7 = vadd.f32 %v3561_v2, %v2579_v31 }
0x166d   :  { %v3340_v33 = vmul.f32 -1.702, %v2580_v7 }
0x166f   :  { %v2588_v9 = vmul.f32 1.442695, %v3340_v33 }
0x1671   :  { %3659 = vpow2.f32 %v2588_v9 }
0x1672   :  { %v2581_v12 = vpop.f32.mrf.mxu2 }
0x1673   :  { %v2582_v35 = vadd.f32 %v3561_v2, %v2581_v12 }
0x1675   :  { %v3341_v14 = vmul.f32 -1.702, %v2582_v35 }
0x1677   :  { %v3660_v15 = vpop.eup %3659  ;;  %v2590_v17 = vmul.f32 1.442695, %v3341_v14 }
0x1678   :  { %v2592_v19 = vadd.f32 1.0, %v3660_v15 }
0x1679   :  { %3661 = vpow2.f32 %v2590_v17 }
0x167a   :  { %3663 = vrcp.f32 %v2592_v19  ;;  %v2605_v0 = vand.u32 2147483648, %v2592_v19  ;;  %vm2599_vm5 = vweird.f32 %v2592_v19  ;;  %v2603_v32 = vand.u32 2147483647, %v2592_v19 }
0x167c   :  { %v2606_v30 = vor.u32 1.1754944e-38, %v2605_v0  ;;  %vm2604_vm8 = vcmp.eq.f32.partialorder %v2603_v32, 8.507059e+37 }
0x167f   :  { %v3662_v22 = vpop.eup %3661 }
0x1680   :  { %v3664_v24 = vpop.eup %3663  ;;  %v2593_v25 = vadd.f32 1.0, %v3662_v22 }
0x1681   :  { %v2595_v26 = vmul.f32 %v3664_v24, %v2592_v19  ;;  %vm2600_vm4 = vweird.f32 %v3664_v24 }
0x1682   :  { %3665 = vrcp.f32 %v2593_v25  ;;  %vm2601_vm6 = vmor %vm2599_vm5, %vm2600_vm4  ;;  %v2620_v37 = vand.u32 2147483648, %v2593_v25  ;;  %v2618_v5 = vand.u32 2147483647, %v2593_v25  ;;  %vm2614_vm9 = vweird.f32 %v2593_v25 }
0x1683   :  { %v2596_v59 = vsub.f32 1.0, %v2595_v26 }
0x1684   :  { %v2621_v41 = vor.u32 1.1754944e-38, %v2620_v37  ;;  %vm2619_vm11 = vcmp.eq.f32.partialorder %v2618_v5, 8.507059e+37 }
0x1685   :  { %v2597_v18 = vmul.f32 %v3664_v24, %v2596_v59 }
0x1687   :  { %v2598_v28 = vadd.f32 %v3664_v24, %v2597_v18 }
0x1688   :  { %v3666_v27 = vpop.eup %3665 }
0x1689   :  { %v2610_v47 = vmul.f32 %v3666_v27, %v2593_v25  ;;  %v2602_v38 = vsel %vm2601_vm6, %v3664_v24, %v2598_v28  ;;  %vm2615_vm7 = vweird.f32 %v3666_v27 }
0x168a   :  { %v2607_v16 = vsel %vm2604_vm8, %v2606_v30, %v2602_v38  ;;  %vm2616_vm10 = vmor %vm2614_vm9, %vm2615_vm7 }
0x168b   :  { %v2611_v34 = vsub.f32 1.0, %v2610_v47  ;;  %v2624_v42 = vmul.f32 %v2607_v16, %v2580_v7 }
0x168d   :  { %v2612_v39 = vmul.f32 %v3666_v27, %v2611_v34 }
0x168f   :  { %v2613_v40 = vadd.f32 %v3666_v27, %v2612_v39 }
0x1691   :  { %v2617_v60 = vsel %vm2616_vm10, %v3666_v27, %v2613_v40 }
0x1692   :  { %v2622_v11 = vsel %vm2619_vm11, %v2621_v41, %v2617_v60 }
0x1693   :  { %v2625_v43 = vmul.f32 %v2622_v11, %v2582_v35  ;;  %v3564_v35 = vld [vmem:[%s4604_s23] ss:$0 sm:$0xff] }
0x1695   :  { %v2626_v44 = vpack.c.bf16 %v2625_v43, %v2624_v42 }
0x1697   :  { %2700 = vmatmul.bf16.vlgmr.msra.gmra.mxu3 %v2626_v44 }
0x171a   :  { %v2701_v45 = vpop.f32.mrf.mxu3 }
0x171b   :  { %v2706_v48 = vadd.f32 %v2701_v45, %v4498_v23 }
0x171d   :  { %v2713_v51 = vadd.f32 %v3562_v49, %v2706_v48 }
0x1722   :  { %v2703_v46 = vpop.f32.mrf.mxu3 }
0x1723   :  { %v2707_v29 = vadd.f32 %v2703_v46, %v4503_v20 }
0x1725   :  { %v2714_v50 = vadd.f32 %v3562_v49, %v2707_v29 }
0x1727   :  { %v2719_v52 = vrot.slane %v2714_v50, 7 }
0x1729   :  { %v2721_v53 = vsel %vm2720_vm12, %v2719_v52, %v2713_v51 }
0x172a   :  { %v2724_v54 = vsel %vm2723_vm15, %v2721_v53, 0.0 }
0x172b   :  { %2725 = vadd.xlane.f32.xlu2 %v2724_v54 }
0x179e   :  { %v2726_v55 = vpop.xlane.xlu2 %2725 }
0x179f   :  { %v2727_v56 = vmul.f32 %v2726_v55, %v3890_v36 }
0x17a1   :  { %v2729_v21 = vrot.slane %v2727_v56, 1  ;;  %v2732_v23 = vsub.f32 %v2713_v51, %v2727_v56 }
0x17a3   :  { %v2733_v57 = vsub.f32 %v2714_v50, %v2729_v21  ;;  %v2734_v61 = vmul.f32 %v2732_v23, %v2732_v23 }
0x17a5   :  { %v2735_v58 = vmul.f32 %v2733_v57, %v2733_v57 }
0x17a7   :  { %v2738_v62 = vrot.slane %v2735_v58, 7 }
0x17a9   :  { %v2739_v20 = vsel %vm2720_vm12, %v2738_v62, %v2734_v61 }
0x17aa   :  { %v2741_v63 = vsel %vm2723_vm15, %v2739_v20, 0.0 }
0x17ab   :  { %2742 = vadd.xlane.f32.xlu0 %v2741_v63 }
0x181e   :  { %v2743_v1 = vpop.xlane.xlu0 %2742 }
0x181f   :  { %v2744_v4 = vmul.f32 %v2743_v1, %v3890_v36  ;;  %v3563_v36 = vld [vmem:[%s4603_s22] ss:$0 sm:$0xff]  ;;  %s3703_s22 = smov [#allocation2]  }
0x1820   :  { %s2835_s23 = sshll.u32 %s3703_s22, 4  ;;  %s2836_s23 = int_to_ptr.vmem [resolvable:$true] %s2835_s23 }
0x1821   :  { %v2745_v2 = vadd.f32 1e-05, %v2744_v4 }
0x1823   :  { %3667 = vrsqrt.f32 %v2745_v2  ;;  %vm2752_vm2 = vweird.f32 %v2745_v2 }
0x1829   :  { %v3668_v31 = vpop.eup %3667 }
0x182a   :  { %v2747_v7 = vmul.f32 %v3668_v31, %v2745_v2  ;;  %vm2753_vm0 = vweird.f32 %v3668_v31 }
0x182b   :  { %vm2754_vm3 = vmor %vm2752_vm2, %vm2753_vm0 }
0x182c   :  { %v2748_v8 = vmul.f32 %v3668_v31, %v2747_v7 }
0x182e   :  { %v2749_v33 = vmul.f32 0.5, %v2748_v8 }
0x1830   :  { %v2750_v9 = vsub.f32 1.5, %v2749_v33 }
0x1832   :  { %v2751_v10 = vmul.f32 %v3668_v31, %v2750_v9 }
0x1834   :  { %v2755_v12 = vsel %vm2754_vm3, %v3668_v31, %v2751_v10 }
0x1835   :  { %v2757_v13 = vrot.slane %v2755_v12, 1  ;;  %v2760_v14 = vmul.f32 %v2755_v12, %v2732_v23 }
0x1837   :  { %v2761_v15 = vmul.f32 %v2757_v13, %v2733_v57  ;;  %v2765_v17 = vmul.f32 %v3563_v36, %v2760_v14 }
0x1839   :  { %v2766_v19 = vmul.f32 %v3563_v36, %v2761_v15  ;;  %v2770_v22 = vadd.f32 %v3564_v35, %v2765_v17 }
0x183b   :  { %v2771_v24 = vadd.f32 %v3564_v35, %v2766_v19  ;;  %v2772_v25 = vpack.c.bf16 %v2770_v22, %v2770_v22 }
0x183d   :  { %v2773_v26 = vpack.c.bf16 %v2771_v24, %v2771_v24  ;;  %v2780_v18 = vunpack.c.l.b16 %v2772_v25 }
0x183f   :  { %v2781_v59 = vunpack.c.l.b16 %v2773_v26 }
0x1841   :  { %v2782_v27 = vrot.slane %v2781_v59, 7 }
0x1843   :  { %v2783_v28 = vsel %vm2720_vm12, %v2782_v27, %v2780_v18 }
0x1844   :  { %v2784_v47 = vpack.c.b16 %v2783_v28, %v2783_v28 }
0x1846   :  { %3399 = vmatmul.msk.bf16.vlgmr.msrb.gmra.mxu0 %vm225_vm1, %v2784_v47 }
0x18c3   :  { %v2809_v0 = vpop.f32.mrf.mxu0 }
0x18c4   :  { %v2813_v32 = vmul.f32 %v2809_v0, %v2809_v0 }
0x18c6   :  { %v2815_v34 = vsel %vm2814_vm13, %v2813_v32, 0.0 }
0x18c7   :  { %2816 = vadd.xlane.f32.xlu1 %v2815_v34 }
0x18cb   :  { %v2811_v37 = vpop.f32.mrf.mxu0 }
0x193a   :  { %v2817_v38 = vpop.xlane.xlu1 %2816 }
0x193b   :  { %3669 = vrsqrt.f32 %v2817_v38  ;;  %vm2824_vm4 = vweird.f32 %v2817_v38 }
0x1941   :  { %v3670_v39 = vpop.eup %3669 }
0x1942   :  { %v2819_v5 = vmul.f32 %v3670_v39, %v2817_v38  ;;  %vm2825_vm14 = vweird.f32 %v3670_v39 }
0x1943   :  { %vm2826_vm1 = vmor %vm2824_vm4, %vm2825_vm14 }
0x1944   :  { %v2820_v30 = vmul.f32 %v3670_v39, %v2819_v5 }
0x1946   :  { %v2821_v40 = vmul.f32 0.5, %v2820_v30 }
0x1948   :  { %v2822_v16 = vsub.f32 1.5, %v2821_v40 }
0x194a   :  { %v2823_v41 = vmul.f32 %v3670_v39, %v2822_v16 }
0x194c   :  { %v2827_v60 = vsel %vm2826_vm1, %v3670_v39, %v2823_v41 }
0x194d   :  { %v2828_v11 = vmul.f32 %v2827_v60, %v2809_v0 }
0x194f   :  { %2829 = vst [vmem:[#allocation2] sm:$0x3] %v2828_v11 }
0x1950   :  { %2840 = dma.vmem_to_hbm [thread:$0]  %s2836_s23, 32, %s2838_s16, [#allocation3]  }
0x1951   :  { %3697 = dma.done.wait [#allocation3], 32  }
0x1952   :  { %3698 = vsyncadd [#allocation3], 4294967264 }
0x1953   :  { %2845 = vsyncpa [#allocation3], 1 }

</bundles_post_ra>
